<compile_context>
chip_gen: v7x
topology: tpu7x:2x2x1
jax: 0.10.0
libtpu: 0.0.40
codegen_flags: <defaults>
</compile_context>

<pallas_src>
import functools

import jax
import jax.numpy as jnp
from jax.experimental import pallas as pl
from jax.experimental.pallas import tpu as pltpu


def _round_up(x, m):
    return (x + m - 1) // m * m


def _choose_tiling(m, max_tile=512):
    """Split M rows into grid tiles: one full-extent tile if small, else
    ~max_tile-row tiles rounded to a multiple of 8 (sublane alignment)."""
    if m <= max_tile:
        return 1, m                      # full-extent block: no (8,128) issue
    n = -(-m // max_tile)
    tile = _round_up(-(-m // n), 8)
    return n, tile


# ---------------------------------------------------------------------------
# Pallas kernels
# ---------------------------------------------------------------------------
def _conv_mm_elu_kernel(x_ref, w_ref, b_ref, o_ref):
    """One M-tile of: ELU(x @ w + b).  w/b are pre-padded to 128 output lanes."""
    acc = jnp.dot(x_ref[...], w_ref[...], preferred_element_type=jnp.float32)
    acc = acc + b_ref[...]
    neg = jnp.minimum(acc, 0.0)
    # expm1(neg) without cancellation: tanh(x/2) * (exp(x) + 1) == exp(x) - 1.
    elu_neg = jnp.tanh(0.5 * neg) * (jnp.exp(neg) + 1.0)
    o_ref[...] = jnp.where(acc > 0, acc, elu_neg).astype(o_ref.dtype)


def _mlp_fused_kernel(x_ref, few_ref, feb_ref, hw_ref, hb_ref, o_ref):
    """Fused fe + (policy|value) heads.  `f` never leaves VMEM/vregs."""
    f = jnp.dot(x_ref[...], few_ref[...], preferred_element_type=jnp.float32)
    f = f + feb_ref[...]
    out = jnp.dot(f, hw_ref[...], preferred_element_type=jnp.float32)
    o_ref[...] = (out + hb_ref[...]).astype(o_ref.dtype)


# ---------------------------------------------------------------------------
# Pallas wrappers
# ---------------------------------------------------------------------------
def conv_matmul_elu(x, w_pad, b_pad, n_out=32, max_tile=512):
    """x:(M,K) f32, w_pad:(K,128), b_pad:(1,128) -> ELU(x@w+b)[:, :n_out]."""
    M, K = x.shape
    Np = w_pad.shape[1]
    n_tiles, tile_m = _choose_tiling(M, max_tile)
    Mp = n_tiles * tile_m
    if Mp != M:
        x = jnp.pad(x, ((0, Mp - M), (0, 0)))
    out = pl.pallas_call(
        _conv_mm_elu_kernel,
        out_shape=jax.ShapeDtypeStruct((Mp, Np), jnp.float32),
        grid=(n_tiles,),
        in_specs=[
            pl.BlockSpec((tile_m, K), lambda i: (i, 0)),
            pl.BlockSpec((K, Np), lambda i: (0, 0)),
            pl.BlockSpec((1, Np), lambda i: (0, 0)),
        ],
        out_specs=pl.BlockSpec((tile_m, Np), lambda i: (i, 0)),
        compiler_params=pltpu.CompilerParams(
            dimension_semantics=("parallel",)),
    )(x, w_pad, b_pad)
    return out[:M, :n_out]


def mlp_fused(flat, fe_w, fe_b, head_w, head_b, max_tile=512):
    """flat:(M,512) -> (M,128) padded head output (policy cols then value col)."""
    M, K = flat.shape
    Hd = fe_w.shape[1]
    Np = head_w.shape[1]
    n_tiles, tile_m = _choose_tiling(M, max_tile)
    Mp = n_tiles * tile_m
    if Mp != M:
        flat = jnp.pad(flat, ((0, Mp - M), (0, 0)))
    out = pl.pallas_call(
        _mlp_fused_kernel,
        out_shape=jax.ShapeDtypeStruct((Mp, Np), jnp.float32),
        grid=(n_tiles,),
        in_specs=[
            pl.BlockSpec((tile_m, K), lambda i: (i, 0)),
            pl.BlockSpec((K, Hd), lambda i: (0, 0)),
            pl.BlockSpec((1, Hd), lambda i: (0, 0)),
            pl.BlockSpec((Hd, Np), lambda i: (0, 0)),
            pl.BlockSpec((1, Np), lambda i: (0, 0)),
        ],
        out_specs=pl.BlockSpec((tile_m, Np), lambda i: (i, 0)),
        compiler_params=pltpu.CompilerParams(
            dimension_semantics=("parallel",)),
    )(flat, fe_w, fe_b, head_w, head_b)
    return out[:M]


# ---------------------------------------------------------------------------
# Glue: im2col patch extraction (data rearrangement only, no compute)
# ---------------------------------------------------------------------------
def _extract_patches(x, ksize=3, stride=2):
    """x:(N,H,W,C) -> (N,Ho,Wo,ksize*ksize*C); feature order (kh, kw, c)."""
    N, H, W, C = x.shape
    Ho = (H - ksize) // stride + 1
    Wo = (W - ksize) // stride + 1
    cols = []
    for kh in range(ksize):
        for kw in range(ksize):
            cols.append(x[:, kh:kh + stride * Ho:stride,
                          kw:kw + stride * Wo:stride, :])
    return jnp.concatenate(cols, axis=-1)


# ---------------------------------------------------------------------------
# Parameters: generated in PyTorch layout, then converted / padded ONCE here.
# ---------------------------------------------------------------------------
def init_params(key, action_size, distribution):
    gain_relu = 2.0 ** 0.5               # nn.init.calculate_gain('relu')
    gain_policy = 0.01
    hidden = 128
    policy_width = (action_size * 2
                    if distribution in ("Beta", "TanhNormal", "Normal")
                    else action_size)
    keys = jax.random.split(key, 6)
    orth = jax.nn.initializers.orthogonal

    def conv_params(k, cin, cout):
        # PyTorch Conv2d weight (cout, cin, 3, 3); orthogonal_ over (cout, cin*9).
        w_pt = orth(gain_relu)(k, (cout, cin * 9), jnp.float32)
        w_pt = w_pt.reshape(cout, cin, 3, 3)
        # -> im2col rows ordered (kh, kw, cin) to match _extract_patches,
        #    output columns zero-padded to 128 (lane-dense stores).
        w_im = jnp.transpose(w_pt, (2, 3, 1, 0)).reshape(9 * cin, cout)
        w_im = jnp.pad(w_im, ((0, 0), (0, 128 - cout)))
        return w_im, jnp.zeros((1, 128), jnp.float32)

    c0w, c0b = conv_params(keys[0], 4, 32)
    c1w, c1b = conv_params(keys[1], 32, 32)
    c2w, c2b = conv_params(keys[2], 32, 32)

    # fe: PyTorch Linear(512, 128); its input is the NCHW flatten (C=32,H=4,W=4).
    # Fold the NCHW->NHWC flatten-order change into a one-time row permutation
    # of fe_w so the forward can reshape the NHWC conv output directly.
    fe_w_pt = orth(1.0)(keys[3], (hidden, 512), jnp.float32)          # (out, in)
    fe_w = (fe_w_pt.reshape(hidden, 32, 4, 4)                         # (out,C,H,W)
            .transpose(0, 2, 3, 1)                                    # (out,H,W,C)
            .reshape(hidden, 512).T)                                  # (512_nhwc, 128)
    fe_b = jnp.zeros((1, hidden), jnp.float32)

    # policy + value heads merged into one GEMM; column `policy_width` is value.
    pol_w = orth(gain_policy)(keys[4], (policy_width, hidden), jnp.float32)
    val_w = orth(1.0)(keys[5], (1, hidden), jnp.float32)
    head_w = jnp.concatenate([pol_w, val_w], axis=0).T                # (128, A+1)
    head_w = jnp.pad(head_w, ((0, 0), (0, 128 - (policy_width + 1))))
    head_b = jnp.zeros((1, 128), jnp.float32)

    params = dict(conv0_w=c0w, conv0_b=c0b,
                  conv1_w=c1w, conv1_b=c1b,
                  conv2_w=c2w, conv2_b=c2b,
                  fe_w=fe_w, fe_b=fe_b,
                  head_w=head_w, head_b=head_b)
    return params, policy_width


# ---------------------------------------------------------------------------
# Forward pass (matches ActorCriticCNN.forward)
# ---------------------------------------------------------------------------
def actor_critic_cnn_forward(params, observation, *, policy_width):
    # observation: (time, batch, 4, 42, 42)  -- NCHW per frame, like PyTorch
    T, B, C, H, W = observation.shape
    x = observation.reshape(T * B, C, H, W).transpose(0, 2, 3, 1)     # NHWC

    for i in range(3):
        p = _extract_patches(x, ksize=3, stride=2)                    # (N,Ho,Wo,9*Cin)
        N, Ho, Wo, K = p.shape
        y = conv_matmul_elu(p.reshape(N * Ho * Wo, K),
                            params[f"conv{i}_w"], params[f"conv{i}_b"])
        x = y.reshape(N, Ho, Wo, 32)

    # NHWC flatten; the NCHW ordering expected by PyTorch's fe weight was
    # folded into fe_w's row permutation at init, so no runtime transpose.
    flat = x.reshape(T * B, -1)                                       # (T*B, 512)

    heads = mlp_fused(flat, params["fe_w"], params["fe_b"],
                      params["head_w"], params["head_b"])             # (T*B, 128)

    policy = heads[:, :policy_width].reshape(T, B, policy_width)
    value = heads[:, policy_width].reshape(T, B)                      # .squeeze(-1)
    return policy, value


if __name__ == "__main__":
    action_size = 3
    distribution = "Normal"              # -> policy output width = 2 * action_size

    key = jax.random.PRNGKey(0)
    k_par, k_obs = jax.random.split(key)
    params, policy_width = init_params(k_par, action_size, distribution)

    T, B = 2, 2
    obs = jax.random.normal(k_obs, (T, B, 4, 42, 42), dtype=jnp.float32)

    fwd = jax.jit(functools.partial(actor_critic_cnn_forward,
                                    policy_width=policy_width))
    policy, value = fwd(params, obs)
    jax.block_until_ready((policy, value))

    assert policy.shape == (T, B, policy_width), policy.shape
    assert value.shape == (T, B), value.shape
    assert jnp.all(jnp.isfinite(policy)) and jnp.all(jnp.isfinite(value))
    print("KERNEL_OK")
</pallas_src>

<mosaic_0001>
module attributes {stable_mosaic.version = 11 : i64} {
  func.func @_conv_mm_elu_kernel(%arg0: i32, %arg1: memref<400x36xf32, #tpu.memory_space<vmem>>, %arg2: memref<36x128xf32, #tpu.memory_space<vmem>>, %arg3: memref<1x128xf32, #tpu.memory_space<vmem>>, %arg4: memref<400x128xf32, #tpu.memory_space<vmem>>) attributes {dimension_semantics = [#tpu.dimension_semantics<parallel>], iteration_bounds = array<i64: 4>, scalar_prefetch = 0 : i64, scratch_operands = 0 : i64, tpu.core_type = #tpu.core_type<tc>, window_params = [{transform_indices = @transform_0, window_bounds = array<i64: 400, 36>}, {pipeline_mode = #tpu.pipeline_mode<synchronous>, transform_indices = @transform_1, window_bounds = array<i64: 36, 128>}, {pipeline_mode = #tpu.pipeline_mode<synchronous>, transform_indices = @transform_2, window_bounds = array<i64: 1, 128>}, {transform_indices = @transform_3, window_bounds = array<i64: 400, 128>}]} {
    %c0 = arith.constant 0 : index
    %c0_0 = arith.constant 0 : index
    %0 = vector.load %arg1[%c0, %c0_0] : memref<400x36xf32, #tpu.memory_space<vmem>>, vector<400x36xf32>
    %c0_1 = arith.constant 0 : index
    %c0_2 = arith.constant 0 : index
    %1 = vector.load %arg2[%c0_1, %c0_2] : memref<36x128xf32, #tpu.memory_space<vmem>>, vector<36x128xf32>
    %cst = arith.constant dense<0.000000e+00> : vector<400x128xf32>
    %2 = tpu.matmul %0, %1, %cst {dimension_numbers = #tpu.dot_dimension_numbers<[1], [0], [0], [1], [0, 0, 1, 1], [], []>} : vector<400x36xf32>, vector<36x128xf32>, vector<400x128xf32> -> vector<400x128xf32>
    %c0_3 = arith.constant 0 : index
    %c0_4 = arith.constant 0 : index
    %3 = vector.load %arg3[%c0_3, %c0_4] : memref<1x128xf32, #tpu.memory_space<vmem>>, vector<1x128xf32>
    %4 = vector.broadcast %3 : vector<1x128xf32> to vector<400x128xf32>
    %5 = arith.addf %2, %4 : vector<400x128xf32>
    %cst_5 = arith.constant 0.000000e+00 : f32
    %6 = vector.broadcast %cst_5 : f32 to vector<400x128xf32>
    %7 = arith.minimumf %5, %6 : vector<400x128xf32>
    %cst_6 = arith.constant 5.000000e-01 : f32
    %8 = vector.broadcast %cst_6 : f32 to vector<400x128xf32>
    %9 = arith.mulf %8, %7 : vector<400x128xf32>
    %10 = math.tanh %9 : vector<400x128xf32>
    %11 = math.exp %7 : vector<400x128xf32>
    %cst_7 = arith.constant 1.000000e+00 : f32
    %12 = vector.broadcast %cst_7 : f32 to vector<400x128xf32>
    %13 = arith.addf %11, %12 : vector<400x128xf32>
    %14 = arith.mulf %10, %13 : vector<400x128xf32>
    %cst_8 = arith.constant 0.000000e+00 : f32
    %15 = vector.broadcast %cst_8 : f32 to vector<400x128xf32>
    %16 = arith.cmpf ogt, %5, %15 : vector<400x128xf32>
    %17 = arith.select %16, %5, %14 : vector<400x128xi1>, vector<400x128xf32>
    %c0_9 = arith.constant 0 : index
    %c0_10 = arith.constant 0 : index
    %18 = vector.load %arg4[%c0_9, %c0_10] : memref<400x128xf32, #tpu.memory_space<vmem>>, vector<400x128xf32>
    tpu.vector_store %arg4[%c0_9, %c0_10], %17 {strides = array<i32>} : memref<400x128xf32, #tpu.memory_space<vmem>>, vector<400x128xf32>,
    return
  }
  func.func @transform_0(%arg0: i32) -> (i32, i32) {
    %c0_i32 = arith.constant 0 : i32
    %c0_i32_0 = arith.constant 0 : i32
    return %arg0, %c0_i32 : i32, i32
  }
  func.func @transform_1(%arg0: i32) -> (i32, i32) {
    %c0_i32 = arith.constant 0 : i32
    %c0_i32_0 = arith.constant 0 : i32
    %c0_i32_1 = arith.constant 0 : i32
    return %c0_i32, %c0_i32_0 : i32, i32
  }
  func.func @transform_2(%arg0: i32) -> (i32, i32) {
    %c0_i32 = arith.constant 0 : i32
    %c0_i32_0 = arith.constant 0 : i32
    %c0_i32_1 = arith.constant 0 : i32
    return %c0_i32, %c0_i32_0 : i32, i32
  }
  func.func @transform_3(%arg0: i32) -> (i32, i32) {
    %c0_i32 = arith.constant 0 : i32
    %c0_i32_0 = arith.constant 0 : i32
    return %arg0, %c0_i32 : i32, i32
  }
}

module attributes {stable_mosaic.version = 11 : i64} {
  func.func @_conv_mm_elu_kernel(%arg0: i32, %arg1: memref<324x288xf32, #tpu.memory_space<vmem>>, %arg2: memref<288x128xf32, #tpu.memory_space<vmem>>, %arg3: memref<1x128xf32, #tpu.memory_space<vmem>>, %arg4: memref<324x128xf32, #tpu.memory_space<vmem>>) attributes {dimension_semantics = [#tpu.dimension_semantics<parallel>], iteration_bounds = array<i64: 1>, scalar_prefetch = 0 : i64, scratch_operands = 0 : i64, tpu.core_type = #tpu.core_type<tc>, window_params = [{transform_indices = @transform_0, window_bounds = array<i64: 324, 288>}, {pipeline_mode = #tpu.pipeline_mode<synchronous>, transform_indices = @transform_1, window_bounds = array<i64: 288, 128>}, {pipeline_mode = #tpu.pipeline_mode<synchronous>, transform_indices = @transform_2, window_bounds = array<i64: 1, 128>}, {transform_indices = @transform_3, window_bounds = array<i64: 324, 128>}]} {
    %c0 = arith.constant 0 : index
    %c0_0 = arith.constant 0 : index
    %0 = vector.load %arg1[%c0, %c0_0] : memref<324x288xf32, #tpu.memory_space<vmem>>, vector<324x288xf32>
    %c0_1 = arith.constant 0 : index
    %c0_2 = arith.constant 0 : index
    %1 = vector.load %arg2[%c0_1, %c0_2] : memref<288x128xf32, #tpu.memory_space<vmem>>, vector<288x128xf32>
    %cst = arith.constant dense<0.000000e+00> : vector<324x128xf32>
    %2 = tpu.matmul %0, %1, %cst {dimension_numbers = #tpu.dot_dimension_numbers<[1], [0], [0], [1], [0, 0, 1, 1], [], []>} : vector<324x288xf32>, vector<288x128xf32>, vector<324x128xf32> -> vector<324x128xf32>
    %c0_3 = arith.constant 0 : index
    %c0_4 = arith.constant 0 : index
    %3 = vector.load %arg3[%c0_3, %c0_4] : memref<1x128xf32, #tpu.memory_space<vmem>>, vector<1x128xf32>
    %4 = vector.broadcast %3 : vector<1x128xf32> to vector<324x128xf32>
    %5 = arith.addf %2, %4 : vector<324x128xf32>
    %cst_5 = arith.constant 0.000000e+00 : f32
    %6 = vector.broadcast %cst_5 : f32 to vector<324x128xf32>
    %7 = arith.minimumf %5, %6 : vector<324x128xf32>
    %cst_6 = arith.constant 5.000000e-01 : f32
    %8 = vector.broadcast %cst_6 : f32 to vector<324x128xf32>
    %9 = arith.mulf %8, %7 : vector<324x128xf32>
    %10 = math.tanh %9 : vector<324x128xf32>
    %11 = math.exp %7 : vector<324x128xf32>
    %cst_7 = arith.constant 1.000000e+00 : f32
    %12 = vector.broadcast %cst_7 : f32 to vector<324x128xf32>
    %13 = arith.addf %11, %12 : vector<324x128xf32>
    %14 = arith.mulf %10, %13 : vector<324x128xf32>
    %cst_8 = arith.constant 0.000000e+00 : f32
    %15 = vector.broadcast %cst_8 : f32 to vector<324x128xf32>
    %16 = arith.cmpf ogt, %5, %15 : vector<324x128xf32>
    %17 = arith.select %16, %5, %14 : vector<324x128xi1>, vector<324x128xf32>
    %c0_9 = arith.constant 0 : index
    %c0_10 = arith.constant 0 : index
    %18 = vector.load %arg4[%c0_9, %c0_10] : memref<324x128xf32, #tpu.memory_space<vmem>>, vector<324x128xf32>
    tpu.vector_store %arg4[%c0_9, %c0_10], %17 {strides = array<i32>} : memref<324x128xf32, #tpu.memory_space<vmem>>, vector<324x128xf32>,
    return
  }
  func.func @transform_0(%arg0: i32) -> (i32, i32) {
    %c0_i32 = arith.constant 0 : i32
    %c0_i32_0 = arith.constant 0 : i32
    return %arg0, %c0_i32 : i32, i32
  }
  func.func @transform_1(%arg0: i32) -> (i32, i32) {
    %c0_i32 = arith.constant 0 : i32
    %c0_i32_0 = arith.constant 0 : i32
    %c0_i32_1 = arith.constant 0 : i32
    return %c0_i32, %c0_i32_0 : i32, i32
  }
  func.func @transform_2(%arg0: i32) -> (i32, i32) {
    %c0_i32 = arith.constant 0 : i32
    %c0_i32_0 = arith.constant 0 : i32
    %c0_i32_1 = arith.constant 0 : i32
    return %c0_i32, %c0_i32_0 : i32, i32
  }
  func.func @transform_3(%arg0: i32) -> (i32, i32) {
    %c0_i32 = arith.constant 0 : i32
    %c0_i32_0 = arith.constant 0 : i32
    return %arg0, %c0_i32 : i32, i32
  }
}

module attributes {stable_mosaic.version = 11 : i64} {
  func.func @_conv_mm_elu_kernel(%arg0: i32, %arg1: memref<64x288xf32, #tpu.memory_space<vmem>>, %arg2: memref<288x128xf32, #tpu.memory_space<vmem>>, %arg3: memref<1x128xf32, #tpu.memory_space<vmem>>, %arg4: memref<64x128xf32, #tpu.memory_space<vmem>>) attributes {dimension_semantics = [#tpu.dimension_semantics<parallel>], iteration_bounds = array<i64: 1>, scalar_prefetch = 0 : i64, scratch_operands = 0 : i64, tpu.core_type = #tpu.core_type<tc>, window_params = [{transform_indices = @transform_0, window_bounds = array<i64: 64, 288>}, {pipeline_mode = #tpu.pipeline_mode<synchronous>, transform_indices = @transform_1, window_bounds = array<i64: 288, 128>}, {pipeline_mode = #tpu.pipeline_mode<synchronous>, transform_indices = @transform_2, window_bounds = array<i64: 1, 128>}, {transform_indices = @transform_3, window_bounds = array<i64: 64, 128>}]} {
    %c0 = arith.constant 0 : index
    %c0_0 = arith.constant 0 : index
    %0 = vector.load %arg1[%c0, %c0_0] : memref<64x288xf32, #tpu.memory_space<vmem>>, vector<64x288xf32>
    %c0_1 = arith.constant 0 : index
    %c0_2 = arith.constant 0 : index
    %1 = vector.load %arg2[%c0_1, %c0_2] : memref<288x128xf32, #tpu.memory_space<vmem>>, vector<288x128xf32>
    %cst = arith.constant dense<0.000000e+00> : vector<64x128xf32>
    %2 = tpu.matmul %0, %1, %cst {dimension_numbers = #tpu.dot_dimension_numbers<[1], [0], [0], [1], [0, 0, 1, 1], [], []>} : vector<64x288xf32>, vector<288x128xf32>, vector<64x128xf32> -> vector<64x128xf32>
    %c0_3 = arith.constant 0 : index
    %c0_4 = arith.constant 0 : index
    %3 = vector.load %arg3[%c0_3, %c0_4] : memref<1x128xf32, #tpu.memory_space<vmem>>, vector<1x128xf32>
    %4 = vector.broadcast %3 : vector<1x128xf32> to vector<64x128xf32>
    %5 = arith.addf %2, %4 : vector<64x128xf32>
    %cst_5 = arith.constant 0.000000e+00 : f32
    %6 = vector.broadcast %cst_5 : f32 to vector<64x128xf32>
    %7 = arith.minimumf %5, %6 : vector<64x128xf32>
    %cst_6 = arith.constant 5.000000e-01 : f32
    %8 = vector.broadcast %cst_6 : f32 to vector<64x128xf32>
    %9 = arith.mulf %8, %7 : vector<64x128xf32>
    %10 = math.tanh %9 : vector<64x128xf32>
    %11 = math.exp %7 : vector<64x128xf32>
    %cst_7 = arith.constant 1.000000e+00 : f32
    %12 = vector.broadcast %cst_7 : f32 to vector<64x128xf32>
    %13 = arith.addf %11, %12 : vector<64x128xf32>
    %14 = arith.mulf %10, %13 : vector<64x128xf32>
    %cst_8 = arith.constant 0.000000e+00 : f32
    %15 = vector.broadcast %cst_8 : f32 to vector<64x128xf32>
    %16 = arith.cmpf ogt, %5, %15 : vector<64x128xf32>
    %17 = arith.select %16, %5, %14 : vector<64x128xi1>, vector<64x128xf32>
    %c0_9 = arith.constant 0 : index
    %c0_10 = arith.constant 0 : index
    %18 = vector.load %arg4[%c0_9, %c0_10] : memref<64x128xf32, #tpu.memory_space<vmem>>, vector<64x128xf32>
    tpu.vector_store %arg4[%c0_9, %c0_10], %17 {strides = array<i32>} : memref<64x128xf32, #tpu.memory_space<vmem>>, vector<64x128xf32>,
    return
  }
  func.func @transform_0(%arg0: i32) -> (i32, i32) {
    %c0_i32 = arith.constant 0 : i32
    %c0_i32_0 = arith.constant 0 : i32
    return %arg0, %c0_i32 : i32, i32
  }
  func.func @transform_1(%arg0: i32) -> (i32, i32) {
    %c0_i32 = arith.constant 0 : i32
    %c0_i32_0 = arith.constant 0 : i32
    %c0_i32_1 = arith.constant 0 : i32
    return %c0_i32, %c0_i32_0 : i32, i32
  }
  func.func @transform_2(%arg0: i32) -> (i32, i32) {
    %c0_i32 = arith.constant 0 : i32
    %c0_i32_0 = arith.constant 0 : i32
    %c0_i32_1 = arith.constant 0 : i32
    return %c0_i32, %c0_i32_0 : i32, i32
  }
  func.func @transform_3(%arg0: i32) -> (i32, i32) {
    %c0_i32 = arith.constant 0 : i32
    %c0_i32_0 = arith.constant 0 : i32
    return %arg0, %c0_i32 : i32, i32
  }
}

module attributes {stable_mosaic.version = 11 : i64} {
  func.func @_mlp_fused_kernel(%arg0: i32, %arg1: memref<4x512xf32, #tpu.memory_space<vmem>>, %arg2: memref<512x128xf32, #tpu.memory_space<vmem>>, %arg3: memref<1x128xf32, #tpu.memory_space<vmem>>, %arg4: memref<128x128xf32, #tpu.memory_space<vmem>>, %arg5: memref<1x128xf32, #tpu.memory_space<vmem>>, %arg6: memref<4x128xf32, #tpu.memory_space<vmem>>) attributes {dimension_semantics = [#tpu.dimension_semantics<parallel>], iteration_bounds = array<i64: 1>, scalar_prefetch = 0 : i64, scratch_operands = 0 : i64, tpu.core_type = #tpu.core_type<tc>, window_params = [{transform_indices = @transform_0, window_bounds = array<i64: 4, 512>}, {pipeline_mode = #tpu.pipeline_mode<synchronous>, transform_indices = @transform_1, window_bounds = array<i64: 512, 128>}, {pipeline_mode = #tpu.pipeline_mode<synchronous>, transform_indices = @transform_2, window_bounds = array<i64: 1, 128>}, {pipeline_mode = #tpu.pipeline_mode<synchronous>, transform_indices = @transform_3, window_bounds = array<i64: 128, 128>}, {pipeline_mode = #tpu.pipeline_mode<synchronous>, transform_indices = @transform_4, window_bounds = array<i64: 1, 128>}, {transform_indices = @transform_5, window_bounds = array<i64: 4, 128>}]} {
    %c0 = arith.constant 0 : index
    %c0_0 = arith.constant 0 : index
    %0 = vector.load %arg1[%c0, %c0_0] : memref<4x512xf32, #tpu.memory_space<vmem>>, vector<4x512xf32>
    %c0_1 = arith.constant 0 : index
    %c0_2 = arith.constant 0 : index
    %1 = vector.load %arg2[%c0_1, %c0_2] : memref<512x128xf32, #tpu.memory_space<vmem>>, vector<512x128xf32>
    %cst = arith.constant dense<0.000000e+00> : vector<4x128xf32>
    %2 = tpu.matmul %0, %1, %cst {dimension_numbers = #tpu.dot_dimension_numbers<[1], [0], [0], [1], [0, 0, 1, 1], [], []>} : vector<4x512xf32>, vector<512x128xf32>, vector<4x128xf32> -> vector<4x128xf32>
    %c0_3 = arith.constant 0 : index
    %c0_4 = arith.constant 0 : index
    %3 = vector.load %arg3[%c0_3, %c0_4] : memref<1x128xf32, #tpu.memory_space<vmem>>, vector<1x128xf32>
    %4 = vector.broadcast %3 : vector<1x128xf32> to vector<4x128xf32>
    %5 = arith.addf %2, %4 : vector<4x128xf32>
    %c0_5 = arith.constant 0 : index
    %c0_6 = arith.constant 0 : index
    %6 = vector.load %arg4[%c0_5, %c0_6] : memref<128x128xf32, #tpu.memory_space<vmem>>, vector<128x128xf32>
    %cst_7 = arith.constant dense<0.000000e+00> : vector<4x128xf32>
    %7 = tpu.matmul %5, %6, %cst_7 {dimension_numbers = #tpu.dot_dimension_numbers<[1], [0], [0], [1], [0, 0, 1, 1], [], []>} : vector<4x128xf32>, vector<128x128xf32>, vector<4x128xf32> -> vector<4x128xf32>
    %c0_8 = arith.constant 0 : index
    %c0_9 = arith.constant 0 : index
    %8 = vector.load %arg5[%c0_8, %c0_9] : memref<1x128xf32, #tpu.memory_space<vmem>>, vector<1x128xf32>
    %9 = vector.broadcast %8 : vector<1x128xf32> to vector<4x128xf32>
    %10 = arith.addf %7, %9 : vector<4x128xf32>
    %c0_10 = arith.constant 0 : index
    %c0_11 = arith.constant 0 : index
    %11 = vector.load %arg6[%c0_10, %c0_11] : memref<4x128xf32, #tpu.memory_space<vmem>>, vector<4x128xf32>
    tpu.vector_store %arg6[%c0_10, %c0_11], %10 {strides = array<i32>} : memref<4x128xf32, #tpu.memory_space<vmem>>, vector<4x128xf32>,
    return
  }
  func.func @transform_0(%arg0: i32) -> (i32, i32) {
    %c0_i32 = arith.constant 0 : i32
    %c0_i32_0 = arith.constant 0 : i32
    return %arg0, %c0_i32 : i32, i32
  }
  func.func @transform_1(%arg0: i32) -> (i32, i32) {
    %c0_i32 = arith.constant 0 : i32
    %c0_i32_0 = arith.constant 0 : i32
    %c0_i32_1 = arith.constant 0 : i32
    return %c0_i32, %c0_i32_0 : i32, i32
  }
  func.func @transform_2(%arg0: i32) -> (i32, i32) {
    %c0_i32 = arith.constant 0 : i32
    %c0_i32_0 = arith.constant 0 : i32
    %c0_i32_1 = arith.constant 0 : i32
    return %c0_i32, %c0_i32_0 : i32, i32
  }
  func.func @transform_3(%arg0: i32) -> (i32, i32) {
    %c0_i32 = arith.constant 0 : i32
    %c0_i32_0 = arith.constant 0 : i32
    %c0_i32_1 = arith.constant 0 : i32
    return %c0_i32, %c0_i32_0 : i32, i32
  }
  func.func @transform_4(%arg0: i32) -> (i32, i32) {
    %c0_i32 = arith.constant 0 : i32
    %c0_i32_0 = arith.constant 0 : i32
    %c0_i32_1 = arith.constant 0 : i32
    return %c0_i32, %c0_i32_0 : i32, i32
  }
  func.func @transform_5(%arg0: i32) -> (i32, i32) {
    %c0_i32 = arith.constant 0 : i32
    %c0_i32_0 = arith.constant 0 : i32
    return %arg0, %c0_i32 : i32, i32
  }
}

</mosaic_0001>

<bundles_post_ra>
// kernel: actor_critic_cnn_forward.4
= control target key start
LH: loop header
LB: loop body
LE: loop exit
PB: predicated region body
PF: predicated region fallthrough
CT: control target
= control target key end

     0   :  { %s1714_s12 = smov 0   ;;  %s2377_s0 = inlined_call_operand.vmem [shape: f32[1600,36], index: 0, kind: input, shape index: {}]   ;;  %s2378_s1 = inlined_call_operand.vmem [shape: f32[36,128], index: 1, kind: input, shape index: {}]   ;;  %s2379_s2 = inlined_call_operand.vmem [shape: f32[1,128], index: 2, kind: input, shape index: {}]   ;;  %s2380_s3 = inlined_call_operand.vmem [shape: f32[1600,128], index: 3, kind: output, shape index: {}]  }
   0x1 LB: > { %s1262_s13 = sadd.s32 4294967295, %s1692_s12   ;;  %p1266_p0 = scmp.ge.s32.totalorder %s1692_s12, 1  ;;  %s1692_s12 = sphi %s1714_s12, %s13_s12  }
   0x2   : > { %p138_p1 = scmp.lt.s32.totalorder %s1692_s12, 5 }
   0x4   : > { %p139_p2 = pnand %p1266_p0, %p138_p1 }
   0x5   : > { %v224_v0 = vld [vmem:[%s2378_s1] sm:$0xff] (!%p139_p2)  ;;  %v225_v1 = vld [vmem:[%s2378_s1 + $0x8] sm:$0xff] (!%p139_p2)  ;;  %v226_v2 = vld [vmem:[%s2378_s1 + $0x10] sm:$0xff] (!%p139_p2)  ;;  %s162_s20 = smul.u32 (!%p139_p2), 50, %s1262_s13  ;;  %vm387_vm0 = vcmask (!%p139_p2), 1043456   ;;  %vm236_vm1 = vcmask (!%p139_p2), 293888  }
   0x6   : > { %142 = sbr.rel (%p139_p2) target bundleno = 368 (0x170), region = 32  ;;  %v1463_v3 = vpack.c.bf16 (!%p139_p2), %v225_v1, %v224_v0  ;;  %v227_v4 = vld [vmem:[%s2378_s1 + $0x18] sm:$0xff] (!%p139_p2)  ;;  %v228_v6 = vld [vmem:[%s2378_s1 + $0x20] sm:$0xf] (!%p139_p2) }
   0x7   : > { %v1467_v5 = vpack.c.bf16 (!%p139_p2), %v227_v4, %v226_v2  ;;  %p163_p3 = scmp.lt.s32.totalorder (!%p139_p2), %s162_s20, 199  ;;  %v1854_v57 = vld [vmem:[%s2379_s2] ss:$0 sm:$0xff] (!%p139_p2) }
   0x8   : > { %1464 = vmatprep.subr.bf16.mxu0 (!%p139_p2), %v1463_v3  ;;  %1471 = vmatprep.subr.bf16.mxu1 (!%p139_p2), %v1463_v3 }
   0x9   : > { %1466 = vmatpush3.bf16.msra.mxu0 (!%p139_p2), %v1463_v3  ;;  %1474 = vmatpush3.bf16.msra.mxu1 (!%p139_p2), %v1463_v3 }
   0xa   : > { %1468 = vmatprep.subr.bf16.mxu0 (!%p139_p2), %v1467_v5  ;;  %1472 = vmatprep.subr.bf16.mxu1 (!%p139_p2), %v1467_v5 }
   0xd   : > { %s2382_s20 = smov (!%p163_p3, %s162_s20), 199  ;;  %1470 = vmatpush3.bf16.msra.mxu0 %v1467_v5  ;;  %1475 = vmatpush3.bf16.msra.mxu1 %v1467_v5 }
   0xe   : > { %s1267_s25 = sshll.u32 %s2382_s20, 3  ;;  %1386 = vmatprep.subr.msk.mxu0 %vm387_vm0, %v228_v6  ;;  %1473 = vmatprep.subr.msk.mxu1 %vm387_vm0, %v228_v6 }
   0xf   : > { %s1745_s28 = scalar_lea.vmem %s2377_s0, %s1267_s25  ;;  %s1932_s6 = scalar_lea.vmem %s2380_s3, %s1267_s25 }
  0x10   : > { %v174_v7 = vld [vmem:[%s1745_s28] sm:$0xff]  ;;  %v200_v8 = vld [vmem:[%s1745_s28 + $0xd0] sm:$0xff]  ;;  %v175_v9 = vld [vmem:[%s1745_s28 + $0x8] sm:$0xff] }
  0x11   : > { %1388 = vmatprep.mubr.msk.f32.mxu0 %vm236_vm1, %v174_v7  ;;  %1427 = vmatprep.mubr.msk.f32.mxu1 %vm236_vm1, %v200_v8  ;;  %v201_v10 = vld [vmem:[%s1745_s28 + $0xd8] sm:$0xff]  ;;  %v176_v11 = vld [vmem:[%s1745_s28 + $0x10] sm:$0xff]  ;;  %v202_v12 = vld [vmem:[%s1745_s28 + $0xe0] sm:$0xff] }
  0x12   : > { %1387 = vmatpush3.msk.msra.mxu0 %vm387_vm0, %v228_v6  ;;  %1476 = vmatpush3.msk.msra.mxu1 %vm387_vm0, %v228_v6  ;;  %v177_v13 = vld [vmem:[%s1745_s28 + $0x18] sm:$0xff]  ;;  %v203_v14 = vld [vmem:[%s1745_s28 + $0xe8] sm:$0xff]  ;;  %v178_v15 = vld [vmem:[%s1745_s28 + $0x20] sm:$0xff] }
  0x13   : > { %1389 = vmatmul.mubr.msk.f32.vlgmr.msra.gmra.mrb[0].mxu0 %vm236_vm1, %v175_v9  ;;  %1428 = vmatmul.mubr.msk.f32.vlgmr.msra.gmra.mrb[0].mxu1 %vm236_vm1, %v201_v10  ;;  %v204_v16 = vld [vmem:[%s1745_s28 + $0xf0] sm:$0xff]  ;;  %v179_v17 = vld [vmem:[%s1745_s28 + $0x28] sm:$0xff]  ;;  %v205_v18 = vld [vmem:[%s1745_s28 + $0xf8] sm:$0xff] }
  0x14   : > { %1391 = vmatprep.mubr.msk.f32.mxu0 %vm236_vm1, %v176_v11  ;;  %1430 = vmatprep.mubr.msk.f32.mxu1 %vm236_vm1, %v202_v12  ;;  %v180_v19 = vld [vmem:[%s1745_s28 + $0x30] sm:$0xff]  ;;  %v206_v20 = vld [vmem:[%s1745_s28 + $0x100] sm:$0xff]  ;;  %v181_v21 = vld [vmem:[%s1745_s28 + $0x38] sm:$0xff] }
  0x15   : > { %v207_v22 = vld [vmem:[%s1745_s28 + $0x108] sm:$0xff]  ;;  %v182_v23 = vld [vmem:[%s1745_s28 + $0x40] sm:$0xff]  ;;  %v208_v24 = vld [vmem:[%s1745_s28 + $0x110] sm:$0xff] }
  0x16   : > { %v183_v25 = vld [vmem:[%s1745_s28 + $0x48] sm:$0xff]  ;;  %v209_v26 = vld [vmem:[%s1745_s28 + $0x118] sm:$0xff]  ;;  %v184_v27 = vld [vmem:[%s1745_s28 + $0x50] sm:$0xff] }
  0x17   : > { %1392 = vmatmul.mubr.msk.f32.gmra.mrb[2].mxu0 %vm236_vm1, %v177_v13  ;;  %1431 = vmatmul.mubr.msk.f32.gmra.mrb[2].mxu1 %vm236_vm1, %v203_v14  ;;  %v210_v28 = vld [vmem:[%s1745_s28 + $0x120] sm:$0xff]  ;;  %v185_v29 = vld [vmem:[%s1745_s28 + $0x58] sm:$0xff]  ;;  %v211_v30 = vld [vmem:[%s1745_s28 + $0x128] sm:$0xff] }
  0x18   : > { %1394 = vmatprep.mubr.msk.f32.mxu0 %vm236_vm1, %v178_v15  ;;  %1433 = vmatprep.mubr.msk.f32.mxu1 %vm236_vm1, %v204_v16  ;;  %v186_v31 = vld [vmem:[%s1745_s28 + $0x60] sm:$0xff]  ;;  %v212_v32 = vld [vmem:[%s1745_s28 + $0x130] sm:$0xff]  ;;  %v187_v33 = vld [vmem:[%s1745_s28 + $0x68] sm:$0xff] }
  0x19   : > { %v213_v34 = vld [vmem:[%s1745_s28 + $0x138] sm:$0xff]  ;;  %v188_v35 = vld [vmem:[%s1745_s28 + $0x70] sm:$0xff]  ;;  %v214_v36 = vld [vmem:[%s1745_s28 + $0x140] sm:$0xff] }
  0x1a   : > { %v189_v37 = vld [vmem:[%s1745_s28 + $0x78] sm:$0xff]  ;;  %v215_v38 = vld [vmem:[%s1745_s28 + $0x148] sm:$0xff]  ;;  %v190_v39 = vld [vmem:[%s1745_s28 + $0x80] sm:$0xff] }
  0x1b   : > { %1395 = vmatmul.mubr.msk.f32.gmra.mrb[4].mxu0 %vm236_vm1, %v179_v17  ;;  %1434 = vmatmul.mubr.msk.f32.gmra.mrb[4].mxu1 %vm236_vm1, %v205_v18  ;;  %v216_v40 = vld [vmem:[%s1745_s28 + $0x150] sm:$0xff]  ;;  %v191_v41 = vld [vmem:[%s1745_s28 + $0x88] sm:$0xff]  ;;  %v217_v42 = vld [vmem:[%s1745_s28 + $0x158] sm:$0xff] }
  0x1c   : > { %1397 = vmatprep.mubr.msk.f32.mxu0 %vm236_vm1, %v180_v19  ;;  %1436 = vmatprep.mubr.msk.f32.mxu1 %vm236_vm1, %v206_v20  ;;  %v192_v43 = vld [vmem:[%s1745_s28 + $0x90] sm:$0xff]  ;;  %v218_v44 = vld [vmem:[%s1745_s28 + $0x160] sm:$0xff]  ;;  %v193_v45 = vld [vmem:[%s1745_s28 + $0x98] sm:$0xff] }
  0x1d   : > { %v219_v46 = vld [vmem:[%s1745_s28 + $0x168] sm:$0xff]  ;;  %v194_v47 = vld [vmem:[%s1745_s28 + $0xa0] sm:$0xff]  ;;  %v220_v48 = vld [vmem:[%s1745_s28 + $0x170] sm:$0xff] }
  0x1e   : > { %v195_v49 = vld [vmem:[%s1745_s28 + $0xa8] sm:$0xff]  ;;  %v221_v50 = vld [vmem:[%s1745_s28 + $0x178] sm:$0xff]  ;;  %v196_v51 = vld [vmem:[%s1745_s28 + $0xb0] sm:$0xff] }
  0x1f   : > { %1398 = vmatmul.mubr.msk.f32.gmra.mrb[6].mxu0 %vm236_vm1, %v181_v21  ;;  %1437 = vmatmul.mubr.msk.f32.gmra.mrb[6].mxu1 %vm236_vm1, %v207_v22  ;;  %v222_v52 = vld [vmem:[%s1745_s28 + $0x180] sm:$0xff]  ;;  %v197_v53 = vld [vmem:[%s1745_s28 + $0xb8] sm:$0xff]  ;;  %v223_v54 = vld [vmem:[%s1745_s28 + $0x188] sm:$0xff] }
  0x20   : > { %1400 = vmatprep.mubr.msk.f32.mxu0 %vm236_vm1, %v182_v23  ;;  %1439 = vmatprep.mubr.msk.f32.mxu1 %vm236_vm1, %v208_v24  ;;  %v198_v55 = vld [vmem:[%s1745_s28 + $0xc0] sm:$0xff]  ;;  %v199_v56 = vld [vmem:[%s1745_s28 + $0xc8] sm:$0xff] }
  0x23   : > { %1401 = vmatmul.mubr.msk.f32.gmra.mrb[8].mxu0 %vm236_vm1, %v183_v25  ;;  %1440 = vmatmul.mubr.msk.f32.gmra.mrb[8].mxu1 %vm236_vm1, %v209_v26 }
  0x24   : > { %1403 = vmatprep.mubr.msk.f32.mxu0 %vm236_vm1, %v184_v27  ;;  %1442 = vmatprep.mubr.msk.f32.mxu1 %vm236_vm1, %v210_v28 }
  0x27   : > { %1404 = vmatmul.mubr.msk.f32.gmra.mrb[10].mxu0 %vm236_vm1, %v185_v29  ;;  %1443 = vmatmul.mubr.msk.f32.gmra.mrb[10].mxu1 %vm236_vm1, %v211_v30 }
  0x28   : > { %1406 = vmatprep.mubr.msk.f32.mxu0 %vm236_vm1, %v186_v31  ;;  %1445 = vmatprep.mubr.msk.f32.mxu1 %vm236_vm1, %v212_v32 }
  0x2b   : > { %1407 = vmatmul.mubr.msk.f32.gmra.mrb[12].mxu0 %vm236_vm1, %v187_v33  ;;  %1446 = vmatmul.mubr.msk.f32.gmra.mrb[12].mxu1 %vm236_vm1, %v213_v34 }
  0x2c   : > { %1409 = vmatprep.mubr.msk.f32.mxu0 %vm236_vm1, %v188_v35  ;;  %1448 = vmatprep.mubr.msk.f32.mxu1 %vm236_vm1, %v214_v36 }
  0x2f   : > { %1410 = vmatmul.mubr.msk.f32.gmra.mrb[14].mxu0 %vm236_vm1, %v189_v37  ;;  %1449 = vmatmul.mubr.msk.f32.gmra.mrb[14].mxu1 %vm236_vm1, %v215_v38 }
  0x30   : > { %1412 = vmatprep.mubr.msk.f32.mxu0 %vm236_vm1, %v190_v39  ;;  %1451 = vmatprep.mubr.msk.f32.mxu1 %vm236_vm1, %v216_v40 }
  0x33   : > { %1413 = vmatmul.mubr.msk.f32.gmra.mrb[16].mxu0 %vm236_vm1, %v191_v41  ;;  %1452 = vmatmul.mubr.msk.f32.gmra.mrb[16].mxu1 %vm236_vm1, %v217_v42 }
  0x34   : > { %1415 = vmatprep.mubr.msk.f32.mxu0 %vm236_vm1, %v192_v43  ;;  %1454 = vmatprep.mubr.msk.f32.mxu1 %vm236_vm1, %v218_v44 }
  0x37   : > { %1416 = vmatmul.mubr.msk.f32.gmra.mrb[18].mxu0 %vm236_vm1, %v193_v45  ;;  %1455 = vmatmul.mubr.msk.f32.gmra.mrb[18].mxu1 %vm236_vm1, %v219_v46 }
  0x38   : > { %1418 = vmatprep.mubr.msk.f32.mxu0 %vm236_vm1, %v194_v47  ;;  %1457 = vmatprep.mubr.msk.f32.mxu1 %vm236_vm1, %v220_v48 }
  0x3b   : > { %1419 = vmatmul.mubr.msk.f32.gmra.mrb[20].mxu0 %vm236_vm1, %v195_v49  ;;  %1458 = vmatmul.mubr.msk.f32.gmra.mrb[20].mxu1 %vm236_vm1, %v221_v50 }
  0x3c   : > { %1421 = vmatprep.mubr.msk.f32.mxu0 %vm236_vm1, %v196_v51  ;;  %1460 = vmatprep.mubr.msk.f32.mxu1 %vm236_vm1, %v222_v52 }
  0x3f   : > { %1422 = vmatmul.mubr.msk.f32.gmra.mrb[22].mxu0 %vm236_vm1, %v197_v53  ;;  %1461 = vmatmul.mubr.msk.f32.gmra.mrb[22].mxu1 %vm236_vm1, %v223_v54 }
  0x40   : > { %1424 = vmatprep.mubr.msk.f32.mxu0 %vm236_vm1, %v198_v55 }
  0x43   : > { %1425 = vmatmul.mubr.msk.f32.gmra.mrb[24].mxu0 %vm236_vm1, %v199_v56 }
  0xe6   : > { %v1390_v58 = vpop.f32.mrb[0].mxu0  ;;  %v1429_v59 = vpop.f32.mrb[0].mxu1 }
  0xe7   : > { %v1857_v60 = vadd.f32 %v1390_v58, %v1854_v57  ;;  %v1860_v61 = vadd.f32 %v1429_v59, %v1854_v57  ;;  %v457_v62 = vpop.f32.mrb[1].mxu0  ;;  %v587_v63 = vpop.f32.mrb[1].mxu1 }
  0xe8   : > { %v1863_v0 = vadd.f32 %v1854_v57, %v457_v62  ;;  %v1866_v1 = vadd.f32 %v1854_v57, %v587_v63 }
  0xe9   : > { %v707_v2 = vmin.f32 %v1857_v60, 0.0  ;;  %v733_v3 = vmin.f32 %v1860_v61, 0.0  ;;  %vm1057_vm2 = vcmp.gt.f32.partialorder %v1857_v60, 0.0  ;;  %vm1083_vm3 = vcmp.gt.f32.partialorder %v1860_v61, 0.0 }
  0xea   : > { %v706_v4 = vmin.f32 %v1863_v0, 0.0  ;;  %v1393_v5 = vpop.f32.mrb[2].mxu0  ;;  %v1432_v6 = vpop.f32.mrb[2].mxu1  ;;  %v732_v11 = vmin.f32 %v1866_v1, 0.0  ;;  %vm1056_vm4 = vcmp.gt.f32.partialorder %v1863_v0, 0.0  ;;  %vm1082_vm5 = vcmp.gt.f32.partialorder %v1866_v1, 0.0 }
  0xeb   : > { %v757_v7 = vmul.f32 0.5, %v707_v2  ;;  %v858_v8 = vmul.f32 1.442695, %v707_v2  ;;  %v783_v9 = vmul.f32 0.5, %v733_v3  ;;  %v910_v10 = vmul.f32 1.442695, %v733_v3 }
  0xec   : > { %v756_v12 = vmul.f32 0.5, %v706_v4  ;;  %v1873_v13 = vadd.f32 %v1393_v5, %v1854_v57  ;;  %v1876_v14 = vadd.f32 %v1432_v6, %v1854_v57  ;;  %v467_v15 = vpop.f32.mrb[3].mxu0  ;;  %v597_v16 = vpop.f32.mrb[3].mxu1  ;;  %v856_v17 = vmul.f32 1.442695, %v706_v4 }
  0xed   : > { %1485 = vtanh.f32 %v757_v7  ;;  %v1879_v18 = vadd.f32 %v1854_v57, %v467_v15  ;;  %v782_v21 = vmul.f32 0.5, %v732_v11  ;;  %v908_v26 = vmul.f32 1.442695, %v732_v11 }
  0xee   : > { %1487 = vpow2.f32 %v858_v8  ;;  %v1396_v19 = vpop.f32.mrb[4].mxu0  ;;  %v1435_v20 = vpop.f32.mrb[4].mxu1  ;;  %v709_v22 = vmin.f32 %v1873_v13, 0.0  ;;  %v735_v23 = vmin.f32 %v1876_v14, 0.0  ;;  %v1884_v27 = vadd.f32 %v1854_v57, %v597_v16 }
  0xef   : > { %1489 = vtanh.f32 %v783_v9  ;;  %v477_v24 = vpop.f32.mrb[5].mxu0  ;;  %v607_v25 = vpop.f32.mrb[5].mxu1  ;;  %v708_v29 = vmin.f32 %v1879_v18, 0.0  ;;  %v1888_v34 = vadd.f32 %v1396_v19, %v1854_v57  ;;  %v1894_v38 = vadd.f32 %v1435_v20, %v1854_v57 }
  0xf0   : > { %1491 = vpow2.f32 %v910_v10  ;;  %v759_v28 = vmul.f32 0.5, %v709_v22  ;;  %v862_v30 = vmul.f32 1.442695, %v709_v22  ;;  %v785_v32 = vmul.f32 0.5, %v735_v23 }
  0xf1   : > { %1493 = vtanh.f32 %v756_v12  ;;  %v914_v33 = vmul.f32 1.442695, %v735_v23  ;;  %v734_v37 = vmin.f32 %v1884_v27, 0.0  ;;  %v1897_v39 = vadd.f32 %v1854_v57, %v477_v24 }
  0xf2   : > { %1495 = vpow2.f32 %v856_v17  ;;  %v1399_v31 = vpop.f32.mrb[6].mxu0  ;;  %v1438_v35 = vpop.f32.mrb[6].mxu1  ;;  %v758_v41 = vmul.f32 0.5, %v708_v29  ;;  %v711_v42 = vmin.f32 %v1888_v34, 0.0  ;;  %v860_v43 = vmul.f32 1.442695, %v708_v29 }
  0xf3   : > { %1497 = vtanh.f32 %v782_v21  ;;  %v1890_v36 = vpop.f32.mrb[7].mxu0  ;;  %v1899_v40 = vpop.f32.mrb[7].mxu1  ;;  %v737_v44 = vmin.f32 %v1894_v38, 0.0  ;;  %v1905_v45 = vadd.f32 %v1854_v57, %v607_v25  ;;  %v784_v49 = vmul.f32 0.5, %v734_v37 }
  0xf4   : > { %1499 = vpow2.f32 %v908_v26  ;;  %v710_v50 = vmin.f32 %v1897_v39, 0.0  ;;  %v912_v54 = vmul.f32 1.442695, %v734_v37  ;;  %v761_v55 = vmul.f32 0.5, %v711_v42 }
  0xf5   : > { %1501 = vtanh.f32 %v759_v28  ;;  %v866_v59 = vmul.f32 1.442695, %v711_v42  ;;  %v787_v62 = vmul.f32 0.5, %v737_v44  ;;  %v918_v2 = vmul.f32 1.442695, %v737_v44 }
  0xf6   : > { %1503 = vpow2.f32 %v862_v30  ;;  %v1907_v46 = vpop.f32.mrb[8].mxu0  ;;  %v1909_v47 = vpop.f32.mrb[8].mxu1  ;;  %v736_v3 = vmin.f32 %v1905_v45, 0.0  ;;  %v1921_v4 = vadd.f32 %v1399_v31, %v1854_v57  ;;  %v760_v10 = vmul.f32 0.5, %v710_v50 }
  0xf7   : > { %v1486_v48 = vpop.eup %1485  ;;  %1505 = vtanh.f32 %v785_v32  ;;  %v1913_v51 = vpop.f32.mrb[9].mxu0  ;;  %vm1059_vm6 = vcmp.gt.f32.partialorder %v1873_v13, 0.0  ;;  %v864_v16 = vmul.f32 1.442695, %v710_v50  ;;  %v1941_v19 = vadd.f32 %v1438_v35, %v1854_v57 }
  0xf8   : > { %v1915_v52 = vpop.f32.mrb[9].mxu1  ;;  %v1488_v53 = vpop.eup %1487  ;;  %1507 = vpow2.f32 %v914_v33  ;;  %v713_v17 = vmin.f32 %v1921_v4, 0.0  ;;  %vm1085_vm7 = vcmp.gt.f32.partialorder %v1876_v14, 0.0  ;;  %v786_v25 = vmul.f32 0.5, %v736_v3 }
  0xf9   : > { %v1490_v56 = vpop.eup %1489  ;;  %v957_v58 = vadd.f32 1.0, %v1488_v53  ;;  %1509 = vtanh.f32 %v758_v41  ;;  %v916_v26 = vmul.f32 1.442695, %v736_v3  ;;  %vm1058_vm8 = vcmp.gt.f32.partialorder %v1879_v18, 0.0 }
  0xfa   : > { %v1492_v63 = vpop.eup %1491  ;;  %1511 = vpow2.f32 %v860_v43  ;;  %v1923_v5 = vpop.f32.mrb[10].mxu0  ;;  %v763_v41 = vmul.f32 0.5, %v713_v17  ;;  %v739_v42 = vmin.f32 %v1941_v19, 0.0  ;;  %v1964_v43 = vadd.f32 %v1854_v57, %v1890_v36 }
  0xfb   : > { %v1925_v6 = vpop.f32.mrb[10].mxu1  ;;  %v1494_v7 = vpop.eup %1493  ;;  %v1007_v8 = vmul.f32 %v1486_v48, %v957_v58  ;;  %v983_v9 = vadd.f32 1.0, %v1492_v63  ;;  %1513 = vtanh.f32 %v784_v49  ;;  %vm1084_vm9 = vcmp.gt.f32.partialorder %v1884_v27, 0.0 }
  0xfc   : > { %v1934_v11 = vpop.f32.mrb[11].mxu0  ;;  %v1936_v12 = vpop.f32.mrb[11].mxu1  ;;  %1515 = vpow2.f32 %v912_v54  ;;  %v870_v53 = vmul.f32 1.442695, %v713_v17  ;;  %v789_v54 = vmul.f32 0.5, %v739_v42  ;;  %vm1061_vm10 = vcmp.gt.f32.partialorder %v1888_v34, 0.0 }
  0xfd   : > { %v1496_v15 = vpop.eup %1495  ;;  %v1107_v21 = vsel %vm1057_vm2, %v1857_v60, %v1007_v8  ;;  %v1033_v22 = vmul.f32 %v1490_v56, %v983_v9  ;;  %1517 = vtanh.f32 %v761_v55  ;;  %v712_v55 = vmin.f32 %v1964_v43, 0.0 }
  0xfe   : > { %v1498_v20 = vpop.eup %1497  ;;  %v956_v23 = vadd.f32 1.0, %v1496_v15  ;;  %1157 = vst [vmem:[%s1932_s6 + $0x8] sm:$0xff] %v1107_v21  ;;  %1519 = vpow2.f32 %v866_v59  ;;  %v1948_v28 = vpop.f32.mrb[12].mxu0  ;;  %vm1087_vm11 = vcmp.gt.f32.partialorder %v1894_v38, 0.0  ;;  %v1996_v21 = vadd.f32 %v1907_v46, %v1854_v57 }
  0xff   : > { %v1500_v24 = vpop.eup %1499  ;;  %v1950_v29 = vpop.f32.mrb[12].mxu1  ;;  %v1133_v60 = vsel %vm1083_vm3, %v1860_v61, %v1033_v22  ;;  %1521 = vtanh.f32 %v787_v62  ;;  %v762_v8 = vmul.f32 0.5, %v712_v55  ;;  %v868_v17 = vmul.f32 1.442695, %v712_v55 }
 0x100   : > { %v1502_v30 = vpop.eup %1501  ;;  %v1006_v31 = vmul.f32 %v1494_v7, %v956_v23  ;;  %v982_v32 = vadd.f32 1.0, %v1500_v24  ;;  %v1955_v33 = vpop.f32.mrb[13].mxu0  ;;  %1183 = vst [vmem:[%s1932_s6 + $0xd8] sm:$0xff] %v1133_v60  ;;  %1523 = vpow2.f32 %v918_v2  ;;  %v922_v7 = vmul.f32 1.442695, %v739_v42 }
 0x101   : > { %v1957_v35 = vpop.f32.mrb[13].mxu1  ;;  %v1504_v37 = vpop.eup %1503  ;;  %1525 = vtanh.f32 %v760_v10  ;;  %vm1060_vm12 = vcmp.gt.f32.partialorder %v1897_v39, 0.0  ;;  %vm1086_vm13 = vcmp.gt.f32.partialorder %v1905_v45, 0.0  ;;  %vm1063_vm14 = vcmp.gt.f32.partialorder %v1921_v4, 0.0 }
 0x102   : > { %v1506_v61 = vpop.eup %1505  ;;  %v1106_v44 = vsel %vm1056_vm4, %v1863_v0, %v1006_v31  ;;  %v1032_v48 = vmul.f32 %v1498_v20, %v982_v32  ;;  %v959_v49 = vadd.f32 1.0, %v1504_v37  ;;  %1527 = vpow2.f32 %v864_v16  ;;  %v1972_v36 = vpop.f32.mrb[14].mxu0 }
 0x103   : > { %v1508_v50 = vpop.eup %1507  ;;  %1156 = vst [vmem:[%s1932_s6] sm:$0xff] %v1106_v44  ;;  %v1974_v56 = vpop.f32.mrb[14].mxu1  ;;  %1529 = vtanh.f32 %v786_v25  ;;  %v1992_v20 = vadd.f32 %v1854_v57, %v1899_v40  ;;  %v715_v31 = vmin.f32 %v1996_v21, 0.0  ;;  %v2014_v32 = vadd.f32 %v1909_v47, %v1854_v57 }
 0x104   : > { %v1510_v58 = vpop.eup %1509  ;;  %v1132_v0 = vsel %vm1082_vm5, %v1866_v1, %v1032_v48  ;;  %v1009_v59 = vmul.f32 %v1502_v30, %v959_v49  ;;  %v985_v62 = vadd.f32 1.0, %v1508_v50  ;;  %v1979_v63 = vpop.f32.mrb[15].mxu0  ;;  %1531 = vpow2.f32 %v916_v26 }
 0x105   : > { %v1981_v2 = vpop.f32.mrb[15].mxu1  ;;  %v1512_v3 = vpop.eup %1511  ;;  %1182 = vst [vmem:[%s1932_s6 + $0xd0] sm:$0xff] %v1132_v0  ;;  %1533 = vtanh.f32 %v763_v41  ;;  %v738_v46 = vmin.f32 %v1992_v20, 0.0  ;;  %v765_v49 = vmul.f32 0.5, %v715_v31  ;;  %vm1089_vm15 = vcmp.gt.f32.partialorder %v1941_v19, 0.0 }
 0x106   : > { %v1514_v9 = vpop.eup %1513  ;;  %v1109_v1 = vsel %vm1059_vm6, %v1873_v13, %v1009_v59  ;;  %v1035_v10 = vmul.f32 %v1506_v61, %v985_v62  ;;  %v958_v15 = vadd.f32 1.0, %v1512_v3  ;;  %1535 = vpow2.f32 %v870_v53  ;;  %v1998_v22 = vpop.f32.mrb[16].mxu0 }
 0x107   : > { %v1516_v16 = vpop.eup %1515  ;;  %1159 = vst [vmem:[%s1932_s6 + $0x18] sm:$0xff] %v1109_v1  ;;  %v2000_v13 = vpop.f32.mrb[16].mxu1  ;;  %1537 = vtanh.f32 %v789_v54  ;;  %v788_v44 = vmul.f32 0.5, %v738_v46  ;;  %v920_v48 = vmul.f32 1.442695, %v738_v46  ;;  %v741_v3 = vmin.f32 %v2014_v32, 0.0 }
 0x108   : > { %v1518_v23 = vpop.eup %1517  ;;  %v1135_v24 = vsel %vm1085_vm7, %v1876_v14, %v1035_v10  ;;  %v1008_v25 = vmul.f32 %v1510_v58, %v958_v15  ;;  %v984_v26 = vadd.f32 1.0, %v1516_v16  ;;  %v2005_v30 = vpop.f32.mrb[17].mxu0  ;;  %1539 = vpow2.f32 %v922_v7 }
 0x109   : > { %v2007_v40 = vpop.f32.mrb[17].mxu1  ;;  %v1520_v60 = vpop.eup %1519  ;;  %1185 = vst [vmem:[%s1932_s6 + $0xe8] sm:$0xff] %v1135_v24  ;;  %1541 = vtanh.f32 %v762_v8  ;;  %v874_v58 = vmul.f32 1.442695, %v715_v31  ;;  %v791_v10 = vmul.f32 0.5, %v741_v3  ;;  %v2041_v16 = vadd.f32 %v1854_v57, %v1913_v51 }
 0x10a   : > { %v1522_v14 = vpop.eup %1521  ;;  %v1108_v37 = vsel %vm1058_vm8, %v1879_v18, %v1008_v25  ;;  %v1034_v41 = vmul.f32 %v1514_v9, %v984_v26  ;;  %v961_v42 = vadd.f32 1.0, %v1520_v60  ;;  %1543 = vpow2.f32 %v868_v17  ;;  %v2020_v50 = vpop.f32.mrb[18].mxu0 }
 0x10b   : > { %v1524_v61 = vpop.eup %1523  ;;  %1158 = vst [vmem:[%s1932_s6 + $0x10] sm:$0xff] %v1108_v37  ;;  %v2022_v53 = vpop.f32.mrb[18].mxu1  ;;  %1545 = vtanh.f32 %v788_v44  ;;  %v926_v15 = vmul.f32 1.442695, %v741_v3  ;;  %v714_v51 = vmin.f32 %v2041_v16, 0.0  ;;  %vm1062_vm0 = vcmp.gt.f32.partialorder %v1964_v43, 0.0 }
 0x10c   : > { %v1526_v47 = vpop.eup %1525  ;;  %v1134_v54 = vsel %vm1084_vm9, %v1884_v27, %v1034_v41  ;;  %v1011_v18 = vmul.f32 %v1518_v23, %v961_v42  ;;  %v987_v55 = vadd.f32 1.0, %v1524_v61  ;;  %v2027_v0 = vpop.f32.mrb[19].mxu0  ;;  %1547 = vpow2.f32 %v920_v48 }
 0x10d   : > { %v2029_v59 = vpop.f32.mrb[19].mxu1  ;;  %v1528_v62 = vpop.eup %1527  ;;  %1184 = vst [vmem:[%s1932_s6 + $0xe0] sm:$0xff] %v1134_v54  ;;  %1549 = vtanh.f32 %v765_v49  ;;  %v764_v44 = vmul.f32 0.5, %v714_v51  ;;  %v872_v48 = vmul.f32 1.442695, %v714_v51  ;;  %vm1088_vm1 = vcmp.gt.f32.partialorder %v1992_v20, 0.0 }
 0x10e   : > { %v1530_v7 = vpop.eup %1529  ;;  %v1111_v27 = vsel %vm1061_vm10, %v1888_v34, %v1011_v18  ;;  %v1037_v8 = vmul.f32 %v1522_v14, %v987_v55  ;;  %v960_v9 = vadd.f32 1.0, %v1528_v62  ;;  %v2043_v17 = vpop.f32.mrb[20].mxu0  ;;  %1551 = vpow2.f32 %v874_v58 }
 0x10f   : > { %v1532_v1 = vpop.eup %1531  ;;  %1161 = vst [vmem:[%s1932_s6 + $0x28] sm:$0xff] %v1111_v27  ;;  %v2045_v23 = vpop.f32.mrb[20].mxu1  ;;  %1553 = vtanh.f32 %v791_v10  ;;  %v2059_v14 = vadd.f32 %v1854_v57, %v1915_v52  ;;  %v2074_v55 = vadd.f32 %v1923_v5, %v1854_v57  ;;  %vm1065_vm2 = vcmp.gt.f32.partialorder %v1996_v21, 0.0 }
 0x110   : > { %v1534_v24 = vpop.eup %1533  ;;  %v1137_v34 = vsel %vm1087_vm11, %v1894_v38, %v1037_v8  ;;  %v1010_v25 = vmul.f32 %v1526_v47, %v960_v9  ;;  %v986_v26 = vadd.f32 1.0, %v1532_v1  ;;  %v2050_v60 = vpop.f32.mrb[21].mxu0  ;;  %1555 = vpow2.f32 %v926_v15 }
 0x111   : > { %v2052_v46 = vpop.f32.mrb[21].mxu1  ;;  %v1536_v31 = vpop.eup %1535  ;;  %1187 = vst [vmem:[%s1932_s6 + $0xf8] sm:$0xff] %v1137_v34  ;;  %v740_v49 = vmin.f32 %v2059_v14, 0.0  ;;  %1557 = vtanh.f32 %v764_v44  ;;  %v2083_v8 = vadd.f32 %v1925_v6, %v1854_v57  ;;  %v717_v15 = vmin.f32 %v2074_v55, 0.0 }
 0x112   : > { %v1538_v38 = vpop.eup %1537  ;;  %v1110_v37 = vsel %vm1060_vm12, %v1897_v39, %v1010_v25  ;;  %v1036_v41 = vmul.f32 %v1530_v7, %v986_v26  ;;  %v963_v42 = vadd.f32 1.0, %v1536_v31  ;;  %v2067_v47 = vpop.f32.mrb[22].mxu0  ;;  %1559 = vpow2.f32 %v872_v48 }
 0x113   : > { %v1540_v61 = vpop.eup %1539  ;;  %1160 = vst [vmem:[%s1932_s6 + $0x20] sm:$0xff] %v1110_v37  ;;  %v2076_v58 = vpop.f32.mrb[22].mxu1  ;;  %v790_v7 = vmul.f32 0.5, %v740_v49  ;;  %v924_v27 = vmul.f32 1.442695, %v740_v49  ;;  %v743_v6 = vmin.f32 %v2083_v8, 0.0  ;;  %v2112_v48 = vadd.f32 %v1854_v57, %v1936_v12 }
 0x114   : > { %v1542_v52 = vpop.eup %1541  ;;  %v1136_v54 = vsel %vm1086_vm13, %v1905_v45, %v1036_v41  ;;  %v1013_v39 = vmul.f32 %v1534_v24, %v963_v42  ;;  %v989_v18 = vadd.f32 1.0, %v1540_v61  ;;  %v2078_v62 = vpop.f32.mrb[23].mxu0  ;;  %v878_v37 = vmul.f32 1.442695, %v717_v15 }
 0x115   : > { %v1544_v3 = vpop.eup %1543  ;;  %1186 = vst [vmem:[%s1932_s6 + $0xf0] sm:$0xff] %v1136_v54  ;;  %v2085_v45 = vpop.f32.mrb[23].mxu1  ;;  %1561 = vtanh.f32 %v790_v7  ;;  %v793_v41 = vmul.f32 0.5, %v743_v6  ;;  %v930_v44 = vmul.f32 1.442695, %v743_v6  ;;  %vm1091_vm3 = vcmp.gt.f32.partialorder %v2014_v32, 0.0 }
 0x116   : > { %v1113_v5 = vsel %vm1063_vm14, %v1921_v4, %v1013_v39  ;;  %v1039_v9 = vmul.f32 %v1538_v38, %v989_v18  ;;  %v962_v1 = vadd.f32 1.0, %v1544_v3  ;;  %v1546_v10 = vpop.eup %1545  ;;  %v2094_v24 = vpop.f32.mrb[24].mxu0  ;;  %1563 = vpow2.f32 %v924_v27 }
 0x117   : > { %1163 = vst [vmem:[%s1932_s6 + $0x38] sm:$0xff] %v1113_v5  ;;  %v1548_v34 = vpop.eup %1547  ;;  %v2100_v26 = vpop.f32.mrb[25].mxu0  ;;  %v767_v38 = vmul.f32 0.5, %v717_v15  ;;  %v742_v18 = vmin.f32 %v2112_v48, 0.0  ;;  %vm1064_vm4 = vcmp.gt.f32.partialorder %v2041_v16, 0.0  ;;  %vm1090_vm5 = vcmp.gt.f32.partialorder %v2059_v14, 0.0 }
 0x118   : > { %v1139_v4 = vsel %vm1089_vm15, %v1941_v19, %v1039_v9  ;;  %v1012_v25 = vmul.f32 %v1542_v52, %v962_v1  ;;  %v1550_v31 = vpop.eup %1549  ;;  %v988_v51 = vadd.f32 1.0, %v1548_v34  ;;  %v2108_v19 = vadd.f32 %v1854_v57, %v1934_v11 }
 0x119   : > { %1189 = vst [vmem:[%s1932_s6 + $0x108] sm:$0xff] %v1139_v4  ;;  %v1552_v42 = vpop.eup %1551  ;;  %1565 = vtanh.f32 %v767_v38  ;;  %v2120_v11 = vadd.f32 %v1948_v28, %v1854_v57  ;;  %v792_v9 = vmul.f32 0.5, %v742_v18  ;;  %v928_v15 = vmul.f32 1.442695, %v742_v18 }
 0x11a   : > { %v1112_v61 = vsel %vm1062_vm0, %v1964_v43, %v1012_v25  ;;  %v1554_v49 = vpop.eup %1553  ;;  %v1038_v52 = vmul.f32 %v1546_v10, %v988_v51  ;;  %v965_v54 = vadd.f32 1.0, %v1552_v42  ;;  %1567 = vpow2.f32 %v878_v37 }
 0x11b   : > { %1162 = vst [vmem:[%s1932_s6 + $0x30] sm:$0xff] %v1112_v61  ;;  %v1556_v39 = vpop.eup %1555  ;;  %v716_v43 = vmin.f32 %v2108_v19, 0.0  ;;  %1569 = vtanh.f32 %v793_v41  ;;  %v2134_v34 = vadd.f32 %v1950_v29, %v1854_v57  ;;  %v2150_v18 = vadd.f32 %v1854_v57, %v1957_v35 }
 0x11c   : > { %v1138_v12 = vsel %vm1088_vm1, %v1992_v20, %v1038_v52  ;;  %v1015_v3 = vmul.f32 %v1550_v31, %v965_v54  ;;  %v991_v7 = vadd.f32 1.0, %v1556_v39  ;;  %1571 = vpow2.f32 %v930_v44  ;;  %v1558_v1 = vpop.eup %1557 }
 0x11d   : > { %1188 = vst [vmem:[%s1932_s6 + $0x100] sm:$0xff] %v1138_v12  ;;  %v766_v27 = vmul.f32 0.5, %v716_v43  ;;  %v876_v5 = vmul.f32 1.442695, %v716_v43  ;;  %v1560_v6 = vpop.eup %1559  ;;  %v719_v20 = vmin.f32 %v2120_v11, 0.0  ;;  %v745_v41 = vmin.f32 %v2134_v34, 0.0 }
 0x11e   : > { %v1115_v10 = vsel %vm1065_vm2, %v1996_v21, %v1015_v3  ;;  %v1041_v28 = vmul.f32 %v1554_v49, %v991_v7  ;;  %v964_v31 = vadd.f32 1.0, %v1560_v6  ;;  %v2139_v21 = vadd.f32 %v1854_v57, %v1955_v33 }
 0x11f   : > { %1165 = vst [vmem:[%s1932_s6 + $0x48] sm:$0xff] %v1115_v10  ;;  %1573 = vtanh.f32 %v766_v27  ;;  %v1562_v4 = vpop.eup %1561  ;;  %v769_v38 = vmul.f32 0.5, %v719_v20  ;;  %v882_v37 = vmul.f32 1.442695, %v719_v20  ;;  %v934_v61 = vmul.f32 1.442695, %v745_v41 }
 0x120   : > { %v1141_v25 = vsel %vm1091_vm3, %v2014_v32, %v1041_v28  ;;  %1575 = vpow2.f32 %v876_v5  ;;  %v1564_v51 = vpop.eup %1563  ;;  %v1014_v42 = vmul.f32 %v1558_v1, %v964_v31  ;;  %v795_v32 = vmul.f32 0.5, %v745_v41 }
 0x121   : > { %1191 = vst [vmem:[%s1932_s6 + $0x118] sm:$0xff] %v1141_v25  ;;  %1577 = vtanh.f32 %v792_v9  ;;  %v990_v29 = vadd.f32 1.0, %v1564_v51  ;;  %v718_v44 = vmin.f32 %v2139_v21, 0.0  ;;  %vm1067_vm6 = vcmp.gt.f32.partialorder %v2074_v55, 0.0 }
 0x122   : > { %1579 = vpow2.f32 %v928_v15  ;;  %v1114_v49 = vsel %vm1064_vm4, %v2041_v16, %v1014_v42  ;;  %v2155_v16 = vadd.f32 %v1972_v36, %v1854_v57  ;;  %vm1093_vm7 = vcmp.gt.f32.partialorder %v2083_v8, 0.0 }
 0x123   : > { %1581 = vtanh.f32 %v769_v38  ;;  %v1566_v33 = vpop.eup %1565  ;;  %v1040_v52 = vmul.f32 %v1562_v4, %v990_v29  ;;  %1164 = vst [vmem:[%s1932_s6 + $0x40] sm:$0xff] %v1114_v49  ;;  %v768_v39 = vmul.f32 0.5, %v718_v44  ;;  %v880_v43 = vmul.f32 1.442695, %v718_v44 }
 0x124   : > { %1583 = vpow2.f32 %v882_v37  ;;  %v1568_v54 = vpop.eup %1567  ;;  %v744_v5 = vmin.f32 %v2150_v18, 0.0  ;;  %v2163_v35 = vadd.f32 %v1974_v56, %v1854_v57  ;;  %v721_v1 = vmin.f32 %v2155_v16, 0.0 }
 0x125   : > { %1585 = vtanh.f32 %v795_v32  ;;  %v1570_v12 = vpop.eup %1569  ;;  %v1140_v3 = vsel %vm1090_vm5, %v2059_v14, %v1040_v52  ;;  %v967_v7 = vadd.f32 1.0, %v1568_v54  ;;  %vm1066_vm8 = vcmp.gt.f32.partialorder %v2108_v19, 0.0 }
 0x126   : > { %1587 = vpow2.f32 %v934_v61  ;;  %v1572_v27 = vpop.eup %1571  ;;  %1190 = vst [vmem:[%s1932_s6 + $0x110] sm:$0xff] %v1140_v3  ;;  %v794_v10 = vmul.f32 0.5, %v744_v5  ;;  %v932_v28 = vmul.f32 1.442695, %v744_v5  ;;  %v747_v15 = vmin.f32 %v2163_v35, 0.0 }
 0x127   : > { %v1017_v14 = vmul.f32 %v1566_v33, %v967_v7  ;;  %v993_v9 = vadd.f32 1.0, %v1572_v27  ;;  %1589 = vpow2.f32 %v880_v43  ;;  %v771_v25 = vmul.f32 0.5, %v721_v1 }
 0x128   : > { %1591 = vtanh.f32 %v768_v39  ;;  %v886_v56 = vmul.f32 1.442695, %v721_v1  ;;  %v797_v38 = vmul.f32 0.5, %v747_v15  ;;  %v938_v42 = vmul.f32 1.442695, %v747_v15 }
 0x129   : > { %v1574_v36 = vpop.eup %1573  ;;  %v1117_v20 = vsel %vm1067_vm6, %v2074_v55, %v1017_v14  ;;  %v1043_v4 = vmul.f32 %v1570_v12, %v993_v9  ;;  %1593 = vtanh.f32 %v794_v10  ;;  %v2175_v55 = vadd.f32 %v1854_v57, %v1979_v63 }
 0x12a   : > { %v1576_v6 = vpop.eup %1575  ;;  %1167 = vst [vmem:[%s1932_s6 + $0x58] sm:$0xff] %v1117_v20  ;;  %1595 = vpow2.f32 %v932_v28  ;;  %v2180_v44 = vadd.f32 %v1854_v57, %v1981_v2  ;;  %vm1092_vm9 = vcmp.gt.f32.partialorder %v2112_v48, 0.0  ;;  %v2186_v63 = vadd.f32 %v1998_v22, %v1854_v57 }
 0x12b   : > { %v1578_v31 = vpop.eup %1577  ;;  %v966_v51 = vadd.f32 1.0, %v1576_v6  ;;  %v1143_v41 = vsel %vm1093_vm7, %v2083_v8, %v1043_v4  ;;  %1597 = vtanh.f32 %v771_v25  ;;  %v720_v8 = vmin.f32 %v2175_v55, 0.0 }
 0x12c   : > { %v1580_v37 = vpop.eup %1579  ;;  %1193 = vst [vmem:[%s1932_s6 + $0x128] sm:$0xff] %v1143_v41  ;;  %1599 = vpow2.f32 %v886_v56  ;;  %v746_v3 = vmin.f32 %v2180_v44, 0.0  ;;  %vm1069_vm10 = vcmp.gt.f32.partialorder %v2120_v11, 0.0  ;;  %v723_v9 = vmin.f32 %v2186_v63, 0.0 }
 0x12d   : > { %v1582_v29 = vpop.eup %1581  ;;  %v1016_v32 = vmul.f32 %v1574_v36, %v966_v51  ;;  %v992_v61 = vadd.f32 1.0, %v1580_v37  ;;  %1601 = vtanh.f32 %v797_v38  ;;  %v770_v43 = vmul.f32 0.5, %v720_v8 }
 0x12e   : > { %v1584_v33 = vpop.eup %1583  ;;  %1603 = vpow2.f32 %v938_v42  ;;  %v884_v12 = vmul.f32 1.442695, %v720_v8  ;;  %v936_v14 = vmul.f32 1.442695, %v746_v3  ;;  %vm1095_vm11 = vcmp.gt.f32.partialorder %v2134_v34, 0.0 }
 0x12f   : > { %v1586_v49 = vpop.eup %1585  ;;  %v1116_v52 = vsel %vm1066_vm8, %v2108_v19, %v1016_v32  ;;  %v1042_v54 = vmul.f32 %v1578_v31, %v992_v61  ;;  %v969_v39 = vadd.f32 1.0, %v1584_v33  ;;  %1605 = vtanh.f32 %v770_v43 }
 0x130   : > { %v1588_v2 = vpop.eup %1587  ;;  %1166 = vst [vmem:[%s1932_s6 + $0x50] sm:$0xff] %v1116_v52  ;;  %v796_v19 = vmul.f32 0.5, %v746_v3  ;;  %1607 = vpow2.f32 %v884_v12  ;;  %v890_v15 = vmul.f32 1.442695, %v723_v9  ;;  %v2203_v25 = vadd.f32 %v2000_v13, %v1854_v57 }
 0x131   : > { %v1142_v22 = vsel %vm1092_vm9, %v2112_v48, %v1042_v54  ;;  %v1019_v7 = vmul.f32 %v1582_v29, %v969_v39  ;;  %v995_v27 = vadd.f32 1.0, %v1588_v2  ;;  %v1590_v5 = vpop.eup %1589  ;;  %v773_v48 = vmul.f32 0.5, %v723_v9 }
 0x132   : > { %1192 = vst [vmem:[%s1932_s6 + $0x120] sm:$0xff] %v1142_v22  ;;  %v1592_v1 = vpop.eup %1591  ;;  %v968_v28 = vadd.f32 1.0, %v1590_v5  ;;  %1609 = vtanh.f32 %v796_v19  ;;  %vm1068_vm12 = vcmp.gt.f32.partialorder %v2139_v21, 0.0  ;;  %vm1094_vm13 = vcmp.gt.f32.partialorder %v2150_v18, 0.0 }
 0x133   : > { %v1119_v36 = vsel %vm1069_vm10, %v2120_v11, %v1019_v7  ;;  %v1045_v10 = vmul.f32 %v1586_v49, %v995_v27  ;;  %v1594_v6 = vpop.eup %1593  ;;  %1611 = vpow2.f32 %v936_v14  ;;  %v2210_v56 = vadd.f32 %v1854_v57, %v2005_v30 }
 0x134   : > { %1169 = vst [vmem:[%s1932_s6 + $0x68] sm:$0xff] %v1119_v36  ;;  %v1018_v4 = vmul.f32 %v1592_v1, %v968_v28  ;;  %v1596_v11 = vpop.eup %1595  ;;  %1613 = vpow2.f32 %v890_v15  ;;  %v749_v13 = vmin.f32 %v2203_v25, 0.0  ;;  %v2223_v30 = vadd.f32 %v2020_v50, %v1854_v57 }
 0x135   : > { %v1145_v20 = vsel %vm1095_vm11, %v2134_v34, %v1045_v10  ;;  %v2214_v34 = vadd.f32 %v1854_v57, %v2007_v40  ;;  %v1598_v31 = vpop.eup %1597  ;;  %v994_v38 = vadd.f32 1.0, %v1596_v11  ;;  %1615 = vtanh.f32 %v773_v48 }
 0x136   : > { %1195 = vst [vmem:[%s1932_s6 + $0x138] sm:$0xff] %v1145_v20  ;;  %v1118_v51 = vsel %vm1068_vm12, %v2139_v21, %v1018_v4  ;;  %v1600_v37 = vpop.eup %1599  ;;  %v722_v41 = vmin.f32 %v2210_v56, 0.0  ;;  %v799_v21 = vmul.f32 0.5, %v749_v13  ;;  %v942_v61 = vmul.f32 1.442695, %v749_v13 }
 0x137   : > { %1168 = vst [vmem:[%s1932_s6 + $0x60] sm:$0xff] %v1118_v51  ;;  %v748_v42 = vmin.f32 %v2214_v34, 0.0  ;;  %v1602_v40 = vpop.eup %1601  ;;  %v1044_v29 = vmul.f32 %v1594_v6, %v994_v38  ;;  %v971_v32 = vadd.f32 1.0, %v1600_v37  ;;  %vm1071_vm14 = vcmp.gt.f32.partialorder %v2155_v16, 0.0 }
 0x138   : > { %v1604_v33 = vpop.eup %1603  ;;  %v772_v8 = vmul.f32 0.5, %v722_v41  ;;  %v888_v49 = vmul.f32 1.442695, %v722_v41  ;;  %1617 = vtanh.f32 %v799_v21  ;;  %vm1097_vm15 = vcmp.gt.f32.partialorder %v2163_v35, 0.0 }
 0x139   : > { %v798_v52 = vmul.f32 0.5, %v748_v42  ;;  %v1144_v54 = vsel %vm1094_vm13, %v2150_v18, %v1044_v29  ;;  %v1021_v39 = vmul.f32 %v1598_v31, %v971_v32  ;;  %v997_v50 = vadd.f32 1.0, %v1604_v33  ;;  %v1606_v2 = vpop.eup %1605 }
 0x13a   : > { %1194 = vst [vmem:[%s1932_s6 + $0x130] sm:$0xff] %v1144_v54  ;;  %1619 = vpow2.f32 %v942_v61  ;;  %v940_v43 = vmul.f32 1.442695, %v748_v42  ;;  %v725_v12 = vmin.f32 %v2223_v30, 0.0  ;;  %v1608_v3 = vpop.eup %1607  ;;  %v2235_v18 = vadd.f32 %v2022_v53, %v1854_v57 }
 0x13b   : > { %v1121_v22 = vsel %vm1071_vm14, %v2155_v16, %v1021_v39  ;;  %v1047_v7 = vmul.f32 %v1602_v40, %v997_v50  ;;  %1621 = vtanh.f32 %v772_v8  ;;  %v970_v5 = vadd.f32 1.0, %v1608_v3 }
 0x13c   : > { %v1610_v27 = vpop.eup %1609  ;;  %1171 = vst [vmem:[%s1932_s6 + $0x78] sm:$0xff] %v1121_v22  ;;  %1623 = vpow2.f32 %v888_v49  ;;  %v775_v19 = vmul.f32 0.5, %v725_v12  ;;  %v894_v14 = vmul.f32 1.442695, %v725_v12  ;;  %vm1070_vm0 = vcmp.gt.f32.partialorder %v2175_v55, 0.0 }
 0x13d   : > { %v1612_v9 = vpop.eup %1611  ;;  %v1147_v1 = vsel %vm1097_vm15, %v2163_v35, %v1047_v7  ;;  %1625 = vtanh.f32 %v798_v52  ;;  %v751_v16 = vmin.f32 %v2235_v18, 0.0  ;;  %v1020_v53 = vmul.f32 %v1606_v2, %v970_v5 }
 0x13e   : > { %1197 = vst [vmem:[%s1932_s6 + $0x148] sm:$0xff] %v1147_v1  ;;  %v996_v36 = vadd.f32 1.0, %v1612_v9  ;;  %1627 = vpow2.f32 %v940_v43  ;;  %v2246_v10 = vadd.f32 %v1854_v57, %v2027_v0  ;;  %v1614_v28 = vpop.eup %1613  ;;  %v2250_v35 = vadd.f32 %v1854_v57, %v2029_v59 }
 0x13f   : > { %1629 = vtanh.f32 %v775_v19  ;;  %v801_v48 = vmul.f32 0.5, %v751_v16  ;;  %v946_v15 = vmul.f32 1.442695, %v751_v16  ;;  %v1616_v6 = vpop.eup %1615  ;;  %v1120_v20 = vsel %vm1070_vm0, %v2175_v55, %v1020_v53 }
 0x140   : > { %v1046_v4 = vmul.f32 %v1610_v27, %v996_v36  ;;  %v973_v11 = vadd.f32 1.0, %v1614_v28  ;;  %1631 = vpow2.f32 %v894_v14  ;;  %1170 = vst [vmem:[%s1932_s6 + $0x70] sm:$0xff] %v1120_v20  ;;  %vm1096_vm1 = vcmp.gt.f32.partialorder %v2180_v44, 0.0 }
 0x141   : > { %1633 = vtanh.f32 %v801_v48  ;;  %v724_v0 = vmin.f32 %v2246_v10, 0.0  ;;  %v750_v31 = vmin.f32 %v2250_v35, 0.0  ;;  %vm1073_vm2 = vcmp.gt.f32.partialorder %v2186_v63, 0.0 }
 0x142   : > { %v1146_v51 = vsel %vm1096_vm1, %v2180_v44, %v1046_v4  ;;  %v1023_v38 = vmul.f32 %v1616_v6, %v973_v11  ;;  %1635 = vpow2.f32 %v946_v15  ;;  %v1618_v57 = vpop.eup %1617  ;;  %vm1099_vm3 = vcmp.gt.f32.partialorder %v2203_v25, 0.0  ;;  %v2265_v44 = vld [vmem:[%s2379_s2] ss:$0 sm:$0xff] }
 0x143   : > { %1196 = vst [vmem:[%s1932_s6 + $0x140] sm:$0xff] %v1146_v51  ;;  %v774_v59 = vmul.f32 0.5, %v724_v0  ;;  %v892_v55 = vmul.f32 1.442695, %v724_v0  ;;  %v800_v13 = vmul.f32 0.5, %v750_v31  ;;  %v2269_v40 = vadd.f32 %v2265_v44, %v2043_v17 }
 0x144   : > { %v1620_v37 = vpop.eup %1619  ;;  %v1123_v41 = vsel %vm1073_vm2, %v2186_v63, %v1023_v38  ;;  %v944_v42 = vmul.f32 1.442695, %v750_v31  ;;  %v2273_v29 = vadd.f32 %v2265_v44, %v2045_v23  ;;  %vm1072_vm4 = vcmp.gt.f32.partialorder %v2210_v56, 0.0 }
 0x145   : > { %v1622_v32 = vpop.eup %1621  ;;  %1173 = vst [vmem:[%s1932_s6 + $0x88] sm:$0xff] %v1123_v41  ;;  %v999_v21 = vadd.f32 1.0, %v1620_v37  ;;  %1637 = vtanh.f32 %v774_v59  ;;  %v2279_v63 = vadd.f32 %v2265_v44, %v2050_v60  ;;  %v727_v33 = vmin.f32 %v2269_v40, 0.0 }
 0x146   : > { %v1624_v61 = vpop.eup %1623  ;;  %1639 = vpow2.f32 %v892_v55  ;;  %v753_v17 = vmin.f32 %v2273_v29, 0.0  ;;  %v2285_v23 = vadd.f32 %v2265_v44, %v2052_v46  ;;  %vm1098_vm5 = vcmp.gt.f32.partialorder %v2214_v34, 0.0 }
 0x147   : > { %v1626_v8 = vpop.eup %1625  ;;  %v1049_v49 = vmul.f32 %v1618_v57, %v999_v21  ;;  %v972_v52 = vadd.f32 1.0, %v1624_v61  ;;  %1641 = vtanh.f32 %v800_v13  ;;  %v777_v60 = vmul.f32 0.5, %v727_v33 }
 0x148   : > { %v1628_v54 = vpop.eup %1627  ;;  %1643 = vpow2.f32 %v944_v42  ;;  %v898_v39 = vmul.f32 1.442695, %v727_v33  ;;  %v803_v50 = vmul.f32 0.5, %v753_v17  ;;  %v950_v3 = vmul.f32 1.442695, %v753_v17 }
 0x149   : > { %v1630_v2 = vpop.eup %1629  ;;  %v1149_v43 = vsel %vm1099_vm3, %v2203_v25, %v1049_v49  ;;  %v1022_v46 = vmul.f32 %v1622_v32, %v972_v52  ;;  %v998_v12 = vadd.f32 1.0, %v1628_v54  ;;  %1645 = vtanh.f32 %v777_v60 }
 0x14a   : > { %v1632_v22 = vpop.eup %1631  ;;  %1199 = vst [vmem:[%s1932_s6 + $0x158] sm:$0xff] %v1149_v43  ;;  %v726_v7 = vmin.f32 %v2279_v63, 0.0  ;;  %v752_v27 = vmin.f32 %v2285_v23, 0.0  ;;  %v2296_v5 = vadd.f32 %v2265_v44, %v2067_v47  ;;  %1647 = vpow2.f32 %v898_v39 }
 0x14b   : > { %v1634_v19 = vpop.eup %1633  ;;  %v1122_v25 = vsel %vm1072_vm4, %v2210_v56, %v1022_v46  ;;  %v1048_v14 = vmul.f32 %v1626_v8, %v998_v12  ;;  %v975_v9 = vadd.f32 1.0, %v1632_v22  ;;  %1649 = vtanh.f32 %v803_v50 }
 0x14c   : > { %v1636_v1 = vpop.eup %1635  ;;  %1172 = vst [vmem:[%s1932_s6 + $0x80] sm:$0xff] %v1122_v25  ;;  %v776_v16 = vmul.f32 0.5, %v726_v7  ;;  %v896_v53 = vmul.f32 1.442695, %v726_v7  ;;  %v802_v36 = vmul.f32 0.5, %v752_v27  ;;  %1651 = vpow2.f32 %v950_v3 }
 0x14d   : > { %v1148_v47 = vsel %vm1098_vm5, %v2214_v34, %v1048_v14  ;;  %v1025_v28 = vmul.f32 %v1630_v2, %v975_v9  ;;  %v1001_v48 = vadd.f32 1.0, %v1636_v1  ;;  %vm1075_vm6 = vcmp.gt.f32.partialorder %v2223_v30, 0.0 }
 0x14e   : > { %1198 = vst [vmem:[%s1932_s6 + $0x150] sm:$0xff] %v1148_v47  ;;  %1653 = vtanh.f32 %v776_v16  ;;  %v948_v56 = vmul.f32 1.442695, %v752_v27  ;;  %v729_v15 = vmin.f32 %v2296_v5, 0.0  ;;  %vm1101_vm7 = vcmp.gt.f32.partialorder %v2235_v18, 0.0 }
 0x14f   : > { %v1638_v6 = vpop.eup %1637  ;;  %v1125_v20 = vsel %vm1075_vm6, %v2223_v30, %v1025_v28  ;;  %v1051_v4 = vmul.f32 %v1634_v19, %v1001_v48  ;;  %1655 = vpow2.f32 %v896_v53  ;;  %v2313_v31 = vadd.f32 %v2265_v44, %v2076_v58 }
 0x150   : > { %v1640_v11 = vpop.eup %1639  ;;  %1175 = vst [vmem:[%s1932_s6 + $0x98] sm:$0xff] %v1125_v20  ;;  %1657 = vtanh.f32 %v802_v36  ;;  %v779_v34 = vmul.f32 0.5, %v729_v15  ;;  %v902_v0 = vmul.f32 1.442695, %v729_v15  ;;  %v2318_v30 = vadd.f32 %v2265_v44, %v2078_v62 }
 0x151   : > { %v1642_v51 = vpop.eup %1641  ;;  %v1151_v38 = vsel %vm1101_vm7, %v2235_v18, %v1051_v4  ;;  %v974_v57 = vadd.f32 1.0, %v1640_v11  ;;  %1659 = vpow2.f32 %v948_v56  ;;  %vm1074_vm8 = vcmp.gt.f32.partialorder %v2246_v10, 0.0 }
 0x152   : > { %v1644_v59 = vpop.eup %1643  ;;  %1201 = vst [vmem:[%s1932_s6 + $0x168] sm:$0xff] %v1151_v38  ;;  %v755_v55 = vmin.f32 %v2313_v31, 0.0  ;;  %v2325_v13 = vadd.f32 %v2265_v44, %v2085_v45  ;;  %1661 = vpow2.f32 %v902_v0  ;;  %v728_v18 = vmin.f32 %v2318_v30, 0.0 }
 0x153   : > { %v1024_v58 = vmul.f32 %v1638_v6, %v974_v57  ;;  %v1000_v37 = vadd.f32 1.0, %v1644_v59  ;;  %v1646_v41 = vpop.eup %1645  ;;  %1663 = vtanh.f32 %v779_v34  ;;  %vm1100_vm9 = vcmp.gt.f32.partialorder %v2250_v35, 0.0 }
 0x154   : > { %v805_v62 = vmul.f32 0.5, %v755_v55  ;;  %v954_v42 = vmul.f32 1.442695, %v755_v55  ;;  %v754_v32 = vmin.f32 %v2325_v13, 0.0  ;;  %v1648_v21 = vpop.eup %1647  ;;  %v778_v17 = vmul.f32 0.5, %v728_v18 }
 0x155   : > { %v1124_v61 = vsel %vm1074_vm8, %v2246_v10, %v1024_v58  ;;  %v1050_v33 = vmul.f32 %v1642_v51, %v1000_v37  ;;  %v900_v45 = vmul.f32 1.442695, %v728_v18  ;;  %v1650_v8 = vpop.eup %1649  ;;  %v977_v49 = vadd.f32 1.0, %v1648_v21 }
 0x156   : > { %1174 = vst [vmem:[%s1932_s6 + $0x90] sm:$0xff] %v1124_v61  ;;  %1665 = vtanh.f32 %v805_v62  ;;  %v804_v52 = vmul.f32 0.5, %v754_v32  ;;  %v1652_v54 = vpop.eup %1651  ;;  %v952_v39 = vmul.f32 1.442695, %v754_v32  ;;  %v2335_v50 = vadd.f32 %v2265_v44, %v2094_v24 }
 0x157   : > { %v1150_v60 = vsel %vm1100_vm9, %v2250_v35, %v1050_v33  ;;  %1667 = vpow2.f32 %v954_v42  ;;  %v1027_v2 = vmul.f32 %v1646_v41, %v977_v49  ;;  %v1003_v43 = vadd.f32 1.0, %v1652_v54 }
 0x158   : > { %v1654_v10 = vpop.eup %1653  ;;  %1200 = vst [vmem:[%s1932_s6 + $0x160] sm:$0xff] %v1150_v60  ;;  %1669 = vtanh.f32 %v778_v17  ;;  %v2340_v46 = vadd.f32 %v2265_v44, %v2100_v26  ;;  %vm1077_vm10 = vcmp.gt.f32.partialorder %v2269_v40, 0.0  ;;  %vm1103_vm11 = vcmp.gt.f32.partialorder %v2273_v29, 0.0 }
 0x159   : > { %v1656_v12 = vpop.eup %1655  ;;  %1671 = vpow2.f32 %v900_v45  ;;  %v731_v35 = vmin.f32 %v2335_v50, 0.0  ;;  %v1127_v3 = vsel %vm1077_vm10, %v2269_v40, %v1027_v2  ;;  %v1053_v22 = vmul.f32 %v1650_v8, %v1003_v43 }
 0x15a   : > { %v1658_v24 = vpop.eup %1657  ;;  %v976_v7 = vadd.f32 1.0, %v1656_v12  ;;  %1673 = vtanh.f32 %v804_v52  ;;  %1177 = vst [vmem:[%s1932_s6 + $0xa8] sm:$0xff] %v1127_v3  ;;  %v730_v19 = vmin.f32 %v2340_v46, 0.0  ;;  %vm1076_vm12 = vcmp.gt.f32.partialorder %v2279_v63, 0.0 }
 0x15b   : > { %v1660_v27 = vpop.eup %1659  ;;  %1675 = vpow2.f32 %v952_v39  ;;  %v781_v26 = vmul.f32 0.5, %v731_v35  ;;  %v906_v44 = vmul.f32 1.442695, %v731_v35  ;;  %v1153_v25 = vsel %vm1103_vm11, %v2273_v29, %v1053_v22 }
 0x15c   : > { %v1026_v14 = vmul.f32 %v1654_v10, %v976_v7  ;;  %v1002_v9 = vadd.f32 1.0, %v1660_v27  ;;  %v1662_v1 = vpop.eup %1661  ;;  %1203 = vst [vmem:[%s1932_s6 + $0x178] sm:$0xff] %v1153_v25  ;;  %v780_v40 = vmul.f32 0.5, %v730_v19  ;;  %v904_v16 = vmul.f32 1.442695, %v730_v19 }
 0x15d   : > { %v1664_v53 = vpop.eup %1663  ;;  %v979_v28 = vadd.f32 1.0, %v1662_v1  ;;  %1677 = vpow2.f32 %v906_v44  ;;  %vm1102_vm13 = vcmp.gt.f32.partialorder %v2285_v23, 0.0  ;;  %vm1079_vm14 = vcmp.gt.f32.partialorder %v2296_v5, 0.0 }
 0x15e   : > { %v1126_v36 = vsel %vm1076_vm12, %v2279_v63, %v1026_v14  ;;  %v1052_v47 = vmul.f32 %v1658_v24, %v1002_v9  ;;  %1679 = vtanh.f32 %v781_v26  ;;  %vm1105_vm15 = vcmp.gt.f32.partialorder %v2313_v31, 0.0 }
 0x15f   : > { %1176 = vst [vmem:[%s1932_s6 + $0xa0] sm:$0xff] %v1126_v36  ;;  %v1029_v56 = vmul.f32 %v1664_v53, %v979_v28  ;;  %1681 = vpow2.f32 %v904_v16  ;;  %vm1078_vm0 = vcmp.gt.f32.partialorder %v2318_v30, 0.0  ;;  %vm1104_vm1 = vcmp.gt.f32.partialorder %v2325_v13, 0.0 }
 0x160   : > { %v1666_v29 = vpop.eup %1665  ;;  %v1152_v48 = vsel %vm1102_vm13, %v2285_v23, %v1052_v47  ;;  %1683 = vtanh.f32 %v780_v40  ;;  %vm1081_vm2 = vcmp.gt.f32.partialorder %v2335_v50, 0.0  ;;  %vm1080_vm3 = vcmp.gt.f32.partialorder %v2340_v46, 0.0 }
 0x161   : > { %v1668_v15 = vpop.eup %1667  ;;  %1202 = vst [vmem:[%s1932_s6 + $0x170] sm:$0xff] %v1152_v48  ;;  %v1129_v63 = vsel %vm1079_vm14, %v2296_v5, %v1029_v56 }
 0x162   : > { %v1670_v6 = vpop.eup %1669  ;;  %v1005_v20 = vadd.f32 1.0, %v1668_v15  ;;  %1179 = vst [vmem:[%s1932_s6 + $0xb8] sm:$0xff] %v1129_v63 }
 0x163   : > { %v1672_v4 = vpop.eup %1671 }
 0x164   : > { %v1674_v11 = vpop.eup %1673  ;;  %v1055_v34 = vmul.f32 %v1666_v29, %v1005_v20  ;;  %v978_v0 = vadd.f32 1.0, %v1672_v4 }
 0x165   : > { %v1676_v51 = vpop.eup %1675 }
 0x166   : > { %v1155_v23 = vsel %vm1105_vm15, %v2313_v31, %v1055_v34  ;;  %v1028_v38 = vmul.f32 %v1670_v6, %v978_v0  ;;  %v1004_v57 = vadd.f32 1.0, %v1676_v51 }
 0x167   : > { %1205 = vst [vmem:[%s1932_s6 + $0x188] sm:$0xff] %v1155_v23  ;;  %v1678_v5 = vpop.eup %1677 }
 0x168   : > { %v1128_v59 = vsel %vm1078_vm0, %v2318_v30, %v1028_v38  ;;  %v1054_v55 = vmul.f32 %v1674_v11, %v1004_v57  ;;  %v1680_v58 = vpop.eup %1679  ;;  %v981_v37 = vadd.f32 1.0, %v1678_v5 }
 0x169   : > { %1178 = vst [vmem:[%s1932_s6 + $0xb0] sm:$0xff] %v1128_v59  ;;  %v1682_v18 = vpop.eup %1681 }
 0x16a   : > { %v1154_v41 = vsel %vm1104_vm1, %v2325_v13, %v1054_v55  ;;  %v1031_v31 = vmul.f32 %v1680_v58, %v981_v37  ;;  %v980_v62 = vadd.f32 1.0, %v1682_v18  ;;  %v1684_v42 = vpop.eup %1683 }
 0x16b   : > { %1204 = vst [vmem:[%s1932_s6 + $0x180] sm:$0xff] %v1154_v41 }
 0x16c   : > { %v1131_v32 = vsel %vm1081_vm2, %v2335_v50, %v1031_v31  ;;  %v1030_v21 = vmul.f32 %v1684_v42, %v980_v62 }
 0x16d   : > { %1181 = vst [vmem:[%s1932_s6 + $0xc8] sm:$0xff] %v1131_v32 }
 0x16e   : > { %v1130_v30 = vsel %vm1080_vm3, %v2340_v46, %v1030_v21 }
 0x16f   : > { %1180 = vst [vmem:[%s1932_s6 + $0xc0] sm:$0xff] %v1130_v30 }
 0x170 PF: > { %s13_s12 = sadd.s32 1, %s1692_s12  }
 0x171   : > { %p10_p4 = scmp.ge.s32.totalorder %s13_s12, 6  }
 0x173   :  { %12 = sbr.rel (!%p10_p4) target bundleno = 1 (0x1), region = 62 }

// kernel: actor_critic_cnn_forward.5
= control target key start
LH: loop header
LB: loop body
LE: loop exit
PB: predicated region body
PF: predicated region fallthrough
CT: control target
= control target key end

     0   :  { %v1780_v0 = vmov 0.0|0.0   ;;  %vm1781_vm0 = vmmov 0   ;;  %v1782_v6 = vmov 0.0   ;;  %vm180_vm1 = vcmask 261120   ;;  %s2898_s1 = inlined_call_operand.vmem [shape: f32[288,128], index: 1, kind: input, shape index: {}]   ;;  %s2899_s0 = inlined_call_operand.vmem [shape: f32[324,288], index: 0, kind: input, shape index: {}]   ;;  %s2900_s2 = inlined_call_operand.vmem [shape: f32[1,128], index: 2, kind: input, shape index: {}]   ;;  %s2901_s3 = inlined_call_operand.vmem [shape: f32[324,128], index: 3, kind: output, shape index: {}]  }
   0x1   :  { %1476 = vmatprep.subr.bf16.mxu1 %v1780_v0  ;;  %v137_v1 = vld [vmem:[%s2898_s1] sm:$0xff]  ;;  %v138_v2 = vld [vmem:[%s2898_s1 + $0x8] sm:$0xff]  ;;  %v139_v3 = vld [vmem:[%s2898_s1 + $0x10] sm:$0xff]  ;;  %1524 = vmatprep.subr.bf16.mxu0 %v1780_v0 }
   0x2   :  { %v1477_v4 = vpack.c.bf16 %v138_v2, %v137_v1  ;;  %v140_v5 = vld [vmem:[%s2898_s1 + $0x18] sm:$0xff]  ;;  %1353 = vmatprep.mubr.msk.f32.mxu0 %vm1781_vm0, %v1782_v6  ;;  %v141_v8 = vld [vmem:[%s2898_s1 + $0x20] sm:$0xff]  ;;  %v142_v9 = vld [vmem:[%s2898_s1 + $0x28] sm:$0xff] }
   0x3   :  { %v1480_v7 = vpack.c.bf16 %v140_v5, %v139_v3  ;;  %v1483_v10 = vpack.c.bf16 %v142_v9, %v141_v8  ;;  %v143_v11 = vld [vmem:[%s2898_s1 + $0x30] sm:$0xff]  ;;  %v144_v12 = vld [vmem:[%s2898_s1 + $0x38] sm:$0xff]  ;;  %v169_v13 = vld [vmem:[%s2898_s1 + $0x100] sm:$0xff] }
   0x4   :  { %1478 = vmatpush1.bf16.msra.mxu1 %v1477_v4  ;;  %v170_v14 = vld [vmem:[%s2898_s1 + $0x108] sm:$0xff]  ;;  %v1486_v15 = vpack.c.bf16 %v144_v12, %v143_v11  ;;  %v171_v17 = vld [vmem:[%s2898_s1 + $0x110] sm:$0xff]  ;;  %v172_v18 = vld [vmem:[%s2898_s1 + $0x118] sm:$0xff] }
   0x5   :  { %1479 = vmatprep.subr.bf16.mxu1 %v1780_v0  ;;  %v1525_v16 = vpack.c.bf16 %v170_v14, %v169_v13  ;;  %v145_v19 = vld [vmem:[%s2898_s1 + $0x40] sm:$0xff]  ;;  %v146_v20 = vld [vmem:[%s2898_s1 + $0x48] sm:$0xff]  ;;  %v1528_v22 = vpack.c.bf16 %v172_v18, %v171_v17  ;;  %v147_v24 = vld [vmem:[%s2898_s1 + $0x50] sm:$0xff] }
   0x6   :  { %v15_v21 = vld [vmem:[%s2899_s0 + $0x8] sm:$0xff]  ;;  %v1489_v23 = vpack.c.bf16 %v146_v20, %v145_v19  ;;  %v148_v25 = vld [vmem:[%s2898_s1 + $0x58] sm:$0xff]  ;;  %v16_v26 = vld [vmem:[%s2899_s0 + $0x10] sm:$0xff] }
   0x7   :  { %1526 = vmatpush3.bf16.msra.mxu0 %v1525_v16  ;;  %368 = vmatprep.mubr.f32.mxu1 %v15_v21  ;;  %v1492_v27 = vpack.c.bf16 %v148_v25, %v147_v24  ;;  %v149_v28 = vld [vmem:[%s2898_s1 + $0x60] sm:$0xff]  ;;  %v150_v29 = vld [vmem:[%s2898_s1 + $0x68] sm:$0xff]  ;;  %v151_v32 = vld [vmem:[%s2898_s1 + $0x70] sm:$0xff] }
   0x8   :  { %1481 = vmatpush1.bf16.msra.mxu1 %v1480_v7  ;;  %1527 = vmatprep.subr.bf16.mxu0 %v1780_v0  ;;  %v19_v30 = vld [vmem:[%s2899_s0 + $0x28] sm:$0xff]  ;;  %v1495_v31 = vpack.c.bf16 %v150_v29, %v149_v28  ;;  %v152_v33 = vld [vmem:[%s2898_s1 + $0x78] sm:$0xff]  ;;  %v22_v34 = vld [vmem:[%s2899_s0 + $0x40] sm:$0xff] }
   0x9   :  { %1482 = vmatprep.subr.bf16.mxu1 %v1780_v0  ;;  %v1498_v35 = vpack.c.bf16 %v152_v33, %v151_v32  ;;  %v153_v36 = vld [vmem:[%s2898_s1 + $0x80] sm:$0xff]  ;;  %v154_v37 = vld [vmem:[%s2898_s1 + $0x88] sm:$0xff]  ;;  %v25_v38 = vld [vmem:[%s2899_s0 + $0x58] sm:$0xff] }
   0xa   :  { %v1501_v39 = vpack.c.bf16 %v154_v37, %v153_v36  ;;  %v155_v40 = vld [vmem:[%s2898_s1 + $0x90] sm:$0xff]  ;;  %v156_v41 = vld [vmem:[%s2898_s1 + $0x98] sm:$0xff]  ;;  %v157_v44 = vld [vmem:[%s2898_s1 + $0xa0] sm:$0xff] }
   0xb   :  { %1529 = vmatpush3.bf16.msra.mxu0 %v1528_v22  ;;  %v28_v42 = vld [vmem:[%s2899_s0 + $0x70] sm:$0xff]  ;;  %v1504_v43 = vpack.c.bf16 %v156_v41, %v155_v40  ;;  %v158_v45 = vld [vmem:[%s2898_s1 + $0xa8] sm:$0xff]  ;;  %v160_v49 = vld [vmem:[%s2898_s1 + $0xb8] sm:$0xff] }
   0xc   :  { %1484 = vmatpush1.bf16.msra.mxu1 %v1483_v10  ;;  %v31_v46 = vld [vmem:[%s2899_s0 + $0x88] sm:$0xff]  ;;  %v1507_v47 = vpack.c.bf16 %v158_v45, %v157_v44  ;;  %v159_v48 = vld [vmem:[%s2898_s1 + $0xb0] sm:$0xff]  ;;  %v34_v50 = vld [vmem:[%s2899_s0 + $0xa0] sm:$0xff] }
   0xd   :  { %1485 = vmatprep.subr.bf16.mxu1 %v1780_v0  ;;  %v1510_v51 = vpack.c.bf16 %v160_v49, %v159_v48  ;;  %v161_v52 = vld [vmem:[%s2898_s1 + $0xc0] sm:$0xff]  ;;  %v162_v53 = vld [vmem:[%s2898_s1 + $0xc8] sm:$0xff]  ;;  %v37_v54 = vld [vmem:[%s2899_s0 + $0xb8] sm:$0xff] }
   0xe   :  { %1354 = vmatmul.mubr.msk.f32.vlgmr.msra.gmra.mrb[0].mxu0 %vm180_vm1, %v16_v26  ;;  %v1513_v55 = vpack.c.bf16 %v162_v53, %v161_v52  ;;  %v163_v56 = vld [vmem:[%s2898_s1 + $0xd0] sm:$0xff]  ;;  %v164_v57 = vld [vmem:[%s2898_s1 + $0xd8] sm:$0xff]  ;;  %v165_v60 = vld [vmem:[%s2898_s1 + $0xe0] sm:$0xff] }
   0xf   :  { %1356 = vmatprep.mubr.msk.f32.mxu0 %vm1781_vm0, %v1782_v6  ;;  %v40_v58 = vld [vmem:[%s2899_s0 + $0xd0] sm:$0xff]  ;;  %v1516_v59 = vpack.c.bf16 %v164_v57, %v163_v56  ;;  %v166_v61 = vld [vmem:[%s2898_s1 + $0xe8] sm:$0xff]  ;;  %v168_v2 = vld [vmem:[%s2898_s1 + $0xf8] sm:$0xff] }
  0x10   :  { %1487 = vmatpush1.bf16.msra.mxu1 %v1486_v15  ;;  %v43_v62 = vld [vmem:[%s2899_s0 + $0xe8] sm:$0xff]  ;;  %v1519_v63 = vpack.c.bf16 %v166_v61, %v165_v60  ;;  %v167_v1 = vld [vmem:[%s2898_s1 + $0xf0] sm:$0xff]  ;;  %v46_v3 = vld [vmem:[%s2899_s0 + $0x100] sm:$0xff] }
  0x11   :  { %1488 = vmatprep.subr.bf16.mxu1 %v1780_v0  ;;  %v1522_v4 = vpack.c.bf16 %v168_v2, %v167_v1  ;;  %v49_v5 = vld [vmem:[%s2899_s0 + $0x118] sm:$0xff]  ;;  %v14_v7 = vld [vmem:[%s2899_s0] sm:$0xff]  ;;  %v55_v11 = vld [vmem:[%s2899_s0 + $0x148] sm:$0xff] }
  0x12   :  { %1357 = vmatmul.mubr.msk.f32.gmra.mrb[2].mxu0 %vm180_vm1, %v19_v30  ;;  %v18_v8 = vld [vmem:[%s2899_s0 + $0x20] sm:$0xff]  ;;  %v17_v9 = vld [vmem:[%s2899_s0 + $0x18] sm:$0xff]  ;;  %v20_v12 = vld [vmem:[%s2899_s0 + $0x30] sm:$0xff] }
  0x13   :  { %1359 = vmatprep.mubr.msk.f32.mxu0 %vm1781_vm0, %v1782_v6  ;;  %v21_v10 = vld [vmem:[%s2899_s0 + $0x38] sm:$0xff]  ;;  %v24_v13 = vld [vmem:[%s2899_s0 + $0x50] sm:$0xff]  ;;  %v58_v14 = vld [vmem:[%s2899_s0 + $0x160] sm:$0xff] }
  0x14   :  { %1490 = vmatpush1.bf16.msra.mxu1 %v1489_v23  ;;  %v23_v15 = vld [vmem:[%s2899_s0 + $0x48] sm:$0xff]  ;;  %v61_v17 = vld [vmem:[%s2899_s0 + $0x178] sm:$0xff]  ;;  %v26_v18 = vld [vmem:[%s2899_s0 + $0x60] sm:$0xff] }
  0x15   :  { %1491 = vmatprep.subr.bf16.mxu1 %v1780_v0  ;;  %v27_v16 = vld [vmem:[%s2899_s0 + $0x68] sm:$0xff]  ;;  %v30_v19 = vld [vmem:[%s2899_s0 + $0x80] sm:$0xff]  ;;  %v64_v20 = vld [vmem:[%s2899_s0 + $0x190] sm:$0xff] }
  0x16   :  { %1360 = vmatmul.mubr.msk.f32.gmra.mrb[4].mxu0 %vm180_vm1, %v22_v34  ;;  %v29_v21 = vld [vmem:[%s2899_s0 + $0x78] sm:$0xff]  ;;  %v67_v23 = vld [vmem:[%s2899_s0 + $0x1a8] sm:$0xff]  ;;  %v32_v24 = vld [vmem:[%s2899_s0 + $0x90] sm:$0xff] }
  0x17   :  { %1362 = vmatprep.mubr.msk.f32.mxu0 %vm1781_vm0, %v1782_v6  ;;  %v33_v22 = vld [vmem:[%s2899_s0 + $0x98] sm:$0xff]  ;;  %v36_v25 = vld [vmem:[%s2899_s0 + $0xb0] sm:$0xff]  ;;  %v70_v26 = vld [vmem:[%s2899_s0 + $0x1c0] sm:$0xff] }
  0x18   :  { %1493 = vmatpush1.bf16.msra.mxu1 %v1492_v27  ;;  %v35_v27 = vld [vmem:[%s2899_s0 + $0xa8] sm:$0xff]  ;;  %v73_v29 = vld [vmem:[%s2899_s0 + $0x1d8] sm:$0xff]  ;;  %v38_v30 = vld [vmem:[%s2899_s0 + $0xc0] sm:$0xff] }
  0x19   :  { %1494 = vmatprep.subr.bf16.mxu1 %v1780_v0  ;;  %v39_v28 = vld [vmem:[%s2899_s0 + $0xc8] sm:$0xff]  ;;  %v76_v32 = vld [vmem:[%s2899_s0 + $0x1f0] sm:$0xff]  ;;  %v41_v33 = vld [vmem:[%s2899_s0 + $0xd8] sm:$0xff] }
  0x1a   :  { %1363 = vmatmul.mubr.msk.f32.gmra.mrb[6].mxu0 %vm180_vm1, %v25_v38  ;;  %v45_v34 = vld [vmem:[%s2899_s0 + $0xf8] sm:$0xff]  ;;  %v44_v36 = vld [vmem:[%s2899_s0 + $0xf0] sm:$0xff]  ;;  %v82_v38 = vld [vmem:[%s2899_s0 + $0x220] sm:$0xff] }
  0x1b   :  { %1365 = vmatprep.mubr.msk.f32.mxu0 %vm1781_vm0, %v1782_v6  ;;  %v48_v37 = vld [vmem:[%s2899_s0 + $0x110] sm:$0xff]  ;;  %v51_v40 = vld [vmem:[%s2899_s0 + $0x128] sm:$0xff]  ;;  %v85_v41 = vld [vmem:[%s2899_s0 + $0x238] sm:$0xff] }
  0x1c   :  { %1496 = vmatpush1.bf16.msra.mxu1 %v1495_v31  ;;  %v42_v31 = vld [vmem:[%s2899_s0 + $0xe0] sm:$0xff]  ;;  %v88_v44 = vld [vmem:[%s2899_s0 + $0x250] sm:$0xff]  ;;  %v53_v45 = vld [vmem:[%s2899_s0 + $0x138] sm:$0xff] }
  0x1d   :  { %1497 = vmatprep.subr.bf16.mxu1 %v1780_v0  ;;  %v56_v48 = vld [vmem:[%s2899_s0 + $0x150] sm:$0xff]  ;;  %v63_v52 = vld [vmem:[%s2899_s0 + $0x188] sm:$0xff]  ;;  %v97_v53 = vld [vmem:[%s2899_s0 + $0x298] sm:$0xff] }
  0x1e   :  { %1366 = vmatmul.mubr.msk.f32.gmra.mrb[8].mxu0 %vm180_vm1, %v28_v42  ;;  %v50_v42 = vld [vmem:[%s2899_s0 + $0x120] sm:$0xff]  ;;  %v60_v49 = vld [vmem:[%s2899_s0 + $0x170] sm:$0xff]  ;;  %v65_v57 = vld [vmem:[%s2899_s0 + $0x198] sm:$0xff] }
  0x1f   :  { %1368 = vmatprep.mubr.msk.f32.mxu0 %vm1781_vm0, %v1782_v6  ;;  %v100_v56 = vld [vmem:[%s2899_s0 + $0x2b0] sm:$0xff]  ;;  %v75_v1 = vld [vmem:[%s2899_s0 + $0x1e8] sm:$0xff]  ;;  %v109_v2 = vld [vmem:[%s2899_s0 + $0x2f8] sm:$0xff] }
  0x20   :  { %1499 = vmatpush1.bf16.msra.mxu1 %v1498_v35  ;;  %v79_v35 = vld [vmem:[%s2899_s0 + $0x208] sm:$0xff]  ;;  %v68_v60 = vld [vmem:[%s2899_s0 + $0x1b0] sm:$0xff] }
  0x21   :  { %1500 = vmatprep.subr.bf16.mxu1 %v1780_v0  ;;  %v72_v61 = vld [vmem:[%s2899_s0 + $0x1d0] sm:$0xff] }
  0x22   :  { %1369 = vmatmul.mubr.msk.f32.gmra.mrb[10].mxu0 %vm180_vm1, %v31_v46  ;;  %v57_v46 = vld [vmem:[%s2899_s0 + $0x158] sm:$0xff] }
  0x23   :  { %1371 = vmatprep.mubr.msk.f32.mxu0 %vm1781_vm0, %v1782_v6 }
  0x24   :  { %1502 = vmatpush1.bf16.msra.mxu1 %v1501_v39  ;;  %v47_v39 = vld [vmem:[%s2899_s0 + $0x108] sm:$0xff] }
  0x25   :  { %1503 = vmatprep.subr.bf16.mxu1 %v1780_v0 }
  0x26   :  { %1372 = vmatmul.mubr.msk.f32.gmra.mrb[12].mxu0 %vm180_vm1, %v34_v50  ;;  %v94_v50 = vld [vmem:[%s2899_s0 + $0x280] sm:$0xff] }
  0x27   :  { %1374 = vmatprep.mubr.msk.f32.mxu0 %vm1781_vm0, %v1782_v6 }
  0x28   :  { %1505 = vmatpush1.bf16.msra.mxu1 %v1504_v43  ;;  %v54_v43 = vld [vmem:[%s2899_s0 + $0x140] sm:$0xff] }
  0x29   :  { %1506 = vmatprep.subr.bf16.mxu1 %v1780_v0 }
  0x2a   :  { %1375 = vmatmul.mubr.msk.f32.gmra.mrb[14].mxu0 %vm180_vm1, %v37_v54  ;;  %v62_v54 = vld [vmem:[%s2899_s0 + $0x180] sm:$0xff] }
  0x2b   :  { %1377 = vmatprep.mubr.msk.f32.mxu0 %vm1781_vm0, %v1782_v6 }
  0x2c   :  { %1508 = vmatpush1.bf16.msra.mxu1 %v1507_v47  ;;  %v91_v47 = vld [vmem:[%s2899_s0 + $0x268] sm:$0xff] }
  0x2d   :  { %1509 = vmatprep.subr.bf16.mxu1 %v1780_v0 }
  0x2e   :  { %1378 = vmatmul.mubr.msk.f32.gmra.mrb[16].mxu0 %vm180_vm1, %v40_v58  ;;  %v69_v58 = vld [vmem:[%s2899_s0 + $0x1b8] sm:$0xff] }
  0x2f   :  { %1380 = vmatprep.mubr.msk.f32.mxu0 %vm1781_vm0, %v1782_v6 }
  0x30   :  { %1511 = vmatpush1.bf16.msra.mxu1 %v1510_v51  ;;  %v59_v51 = vld [vmem:[%s2899_s0 + $0x168] sm:$0xff] }
  0x31   :  { %1512 = vmatprep.subr.bf16.mxu1 %v1780_v0 }
  0x32   :  { %1381 = vmatmul.mubr.msk.f32.gmra.mrb[18].mxu0 %vm180_vm1, %v43_v62  ;;  %v106_v62 = vld [vmem:[%s2899_s0 + $0x2e0] sm:$0xff] }
  0x33   :  { %1383 = vmatprep.mubr.msk.f32.mxu0 %vm1781_vm0, %v1782_v6 }
  0x34   :  { %1514 = vmatpush1.bf16.msra.mxu1 %v1513_v55  ;;  %v66_v55 = vld [vmem:[%s2899_s0 + $0x1a0] sm:$0xff] }
  0x35   :  { %1515 = vmatprep.subr.bf16.mxu1 %v1780_v0 }
  0x36   :  { %1384 = vmatmul.mubr.msk.f32.gmra.mrb[20].mxu0 %vm180_vm1, %v46_v3  ;;  %v74_v3 = vld [vmem:[%s2899_s0 + $0x1e0] sm:$0xff] }
  0x37   :  { %1386 = vmatprep.mubr.msk.f32.mxu0 %vm1781_vm0, %v1782_v6 }
  0x38   :  { %1517 = vmatpush1.bf16.msra.mxu1 %v1516_v59  ;;  %v103_v59 = vld [vmem:[%s2899_s0 + $0x2c8] sm:$0xff] }
  0x39   :  { %1518 = vmatprep.subr.bf16.mxu1 %v1780_v0 }
  0x3a   :  { %1387 = vmatmul.mubr.msk.f32.gmra.mrb[22].mxu0 %vm180_vm1, %v49_v5  ;;  %v112_v5 = vld [vmem:[%s2899_s0 + $0x310] sm:$0xff] }
  0x3b   :  { %1389 = vmatprep.mubr.msk.f32.mxu0 %vm1781_vm0, %v1782_v6 }
  0x3c   :  { %1520 = vmatpush1.bf16.msra.mxu1 %v1519_v63  ;;  %v71_v63 = vld [vmem:[%s2899_s0 + $0x1c8] sm:$0xff] }
  0x3d   :  { %1521 = vmatprep.subr.bf16.mxu1 %v1780_v0  ;;  %v52_v0 = vld [vmem:[%s2899_s0 + $0x130] sm:$0xff] }
  0x3e   :  { %1390 = vmatmul.mubr.msk.f32.gmra.mrb[24].mxu0 %vm180_vm1, %v52_v0  ;;  %v115_v0 = vld [vmem:[%s2899_s0 + $0x328] sm:$0xff] }
  0x3f   :  { %1392 = vmatprep.mubr.msk.f32.mxu0 %vm1781_vm0, %v1782_v6 }
  0x40   :  { %1523 = vmatpush1.bf16.msra.mxu1 %v1522_v4  ;;  %v78_v4 = vld [vmem:[%s2899_s0 + $0x200] sm:$0xff] }
  0x42   :  { %1393 = vmatmul.mubr.msk.f32.gmra.mrb[26].mxu0 %vm180_vm1, %v55_v11  ;;  %v118_v11 = vld [vmem:[%s2899_s0 + $0x340] sm:$0xff] }
  0x43   :  { %369 = vmatmul.mubr.f32.vlgmr.msra.gmra.mrb[0].mxu1 %v14_v7  ;;  %1395 = vmatprep.mubr.msk.f32.mxu0 %vm1781_vm0, %v1782_v6  ;;  %v77_v7 = vld [vmem:[%s2899_s0 + $0x1f8] sm:$0xff] }
  0x44   :  { %373 = vmatprep.mubr.f32.mxu1 %v18_v8  ;;  %v81_v8 = vld [vmem:[%s2899_s0 + $0x218] sm:$0xff] }
  0x46   :  { %1396 = vmatmul.mubr.msk.f32.gmra.mrb[28].mxu0 %vm180_vm1, %v58_v14  ;;  %v121_v14 = vld [vmem:[%s2899_s0 + $0x358] sm:$0xff] }
  0x47   :  { %374 = vmatmul.mubr.f32.gmra.mrb[2].mxu1 %v17_v9  ;;  %1398 = vmatprep.mubr.msk.f32.mxu0 %vm1781_vm0, %v1782_v6  ;;  %v80_v9 = vld [vmem:[%s2899_s0 + $0x210] sm:$0xff] }
  0x48   :  { %378 = vmatprep.mubr.f32.mxu1 %v21_v10  ;;  %v84_v10 = vld [vmem:[%s2899_s0 + $0x230] sm:$0xff] }
  0x4a   :  { %1399 = vmatmul.mubr.msk.f32.gmra.mrb[30].mxu0 %vm180_vm1, %v61_v17  ;;  %v124_v17 = vld [vmem:[%s2899_s0 + $0x370] sm:$0xff] }
  0x4b   :  { %379 = vmatmul.mubr.f32.gmra.mrb[4].mxu1 %v20_v12  ;;  %1401 = vmatprep.mubr.msk.f32.mxu0 %vm1781_vm0, %v1782_v6  ;;  %v83_v12 = vld [vmem:[%s2899_s0 + $0x228] sm:$0xff] }
  0x4c   :  { %383 = vmatprep.mubr.f32.mxu1 %v24_v13  ;;  %v87_v13 = vld [vmem:[%s2899_s0 + $0x248] sm:$0xff] }
  0x4e   :  { %1402 = vmatmul.mubr.msk.f32.gmra.mrb[32].mxu0 %vm180_vm1, %v64_v20  ;;  %v127_v20 = vld [vmem:[%s2899_s0 + $0x388] sm:$0xff] }
  0x4f   :  { %384 = vmatmul.mubr.f32.gmra.mrb[6].mxu1 %v23_v15  ;;  %1404 = vmatprep.mubr.msk.f32.mxu0 %vm1781_vm0, %v1782_v6  ;;  %v86_v15 = vld [vmem:[%s2899_s0 + $0x240] sm:$0xff] }
  0x50   :  { %388 = vmatprep.mubr.f32.mxu1 %v27_v16  ;;  %v90_v16 = vld [vmem:[%s2899_s0 + $0x260] sm:$0xff] }
  0x52   :  { %1405 = vmatmul.mubr.msk.f32.gmra.mrb[34].mxu0 %vm180_vm1, %v67_v23  ;;  %v130_v23 = vld [vmem:[%s2899_s0 + $0x3a0] sm:$0xff] }
  0x53   :  { %389 = vmatmul.mubr.f32.gmra.mrb[8].mxu1 %v26_v18  ;;  %1407 = vmatprep.mubr.msk.f32.mxu0 %vm1781_vm0, %v1782_v6  ;;  %v89_v18 = vld [vmem:[%s2899_s0 + $0x258] sm:$0xff] }
  0x54   :  { %393 = vmatprep.mubr.f32.mxu1 %v30_v19  ;;  %v93_v19 = vld [vmem:[%s2899_s0 + $0x278] sm:$0xff] }
  0x56   :  { %1408 = vmatmul.mubr.msk.f32.gmra.mrb[36].mxu0 %vm180_vm1, %v70_v26  ;;  %v133_v26 = vld [vmem:[%s2899_s0 + $0x3b8] sm:$0xff] }
  0x57   :  { %394 = vmatmul.mubr.f32.gmra.mrb[10].mxu1 %v29_v21  ;;  %1410 = vmatprep.mubr.msk.f32.mxu0 %vm1781_vm0, %v1782_v6  ;;  %v92_v21 = vld [vmem:[%s2899_s0 + $0x270] sm:$0xff] }
  0x58   :  { %398 = vmatprep.mubr.f32.mxu1 %v33_v22  ;;  %v96_v22 = vld [vmem:[%s2899_s0 + $0x290] sm:$0xff] }
  0x5a   :  { %1411 = vmatmul.mubr.msk.f32.gmra.mrb[38].mxu0 %vm180_vm1, %v73_v29  ;;  %v136_v29 = vld [vmem:[%s2899_s0 + $0x3d0] sm:$0xf] }
  0x5b   :  { %399 = vmatmul.mubr.f32.gmra.mrb[12].mxu1 %v32_v24  ;;  %1413 = vmatprep.mubr.msk.f32.mxu0 %vm1781_vm0, %v1782_v6  ;;  %v95_v24 = vld [vmem:[%s2899_s0 + $0x288] sm:$0xff] }
  0x5c   :  { %403 = vmatprep.mubr.f32.mxu1 %v36_v25  ;;  %v99_v25 = vld [vmem:[%s2899_s0 + $0x2a8] sm:$0xff] }
  0x5e   :  { %1414 = vmatmul.mubr.msk.f32.gmra.mrb[40].mxu0 %vm180_vm1, %v76_v32  ;;  %v108_v32 = vld [vmem:[%s2899_s0 + $0x2f0] sm:$0xff] }
  0x5f   :  { %404 = vmatmul.mubr.f32.gmra.mrb[14].mxu1 %v35_v27  ;;  %1416 = vmatprep.mubr.msk.f32.mxu0 %vm1781_vm0, %v1782_v6  ;;  %v98_v27 = vld [vmem:[%s2899_s0 + $0x2a0] sm:$0xff] }
  0x60   :  { %408 = vmatprep.mubr.f32.mxu1 %v39_v28  ;;  %v102_v28 = vld [vmem:[%s2899_s0 + $0x2c0] sm:$0xff] }
  0x62   :  { %1417 = vmatmul.mubr.msk.f32.gmra.mrb[42].mxu0 %vm180_vm1, %v79_v35  ;;  %v110_v35 = vld [vmem:[%s2899_s0 + $0x300] sm:$0xff] }
  0x63   :  { %409 = vmatmul.mubr.f32.gmra.mrb[16].mxu1 %v38_v30  ;;  %1419 = vmatprep.mubr.msk.f32.mxu0 %vm1781_vm0, %v1782_v6  ;;  %v101_v30 = vld [vmem:[%s2899_s0 + $0x2b8] sm:$0xff] }
  0x64   :  { %413 = vmatprep.mubr.f32.mxu1 %v42_v31  ;;  %v105_v31 = vld [vmem:[%s2899_s0 + $0x2d8] sm:$0xff] }
  0x66   :  { %1420 = vmatmul.mubr.msk.f32.gmra.mrb[44].mxu0 %vm180_vm1, %v82_v38  ;;  %v117_v38 = vld [vmem:[%s2899_s0 + $0x338] sm:$0xff] }
  0x67   :  { %414 = vmatmul.mubr.f32.gmra.mrb[18].mxu1 %v41_v33  ;;  %1422 = vmatprep.mubr.msk.f32.mxu0 %vm1781_vm0, %v1782_v6  ;;  %v107_v33 = vld [vmem:[%s2899_s0 + $0x2e8] sm:$0xff] }
  0x68   :  { %418 = vmatprep.mubr.f32.mxu1 %v45_v34  ;;  %v111_v34 = vld [vmem:[%s2899_s0 + $0x308] sm:$0xff] }
  0x6a   :  { %1423 = vmatmul.mubr.msk.f32.gmra.mrb[46].mxu0 %vm180_vm1, %v85_v41  ;;  %v119_v41 = vld [vmem:[%s2899_s0 + $0x348] sm:$0xff] }
  0x6b   :  { %419 = vmatmul.mubr.f32.gmra.mrb[20].mxu1 %v44_v36  ;;  %1425 = vmatprep.mubr.msk.f32.mxu0 %vm1781_vm0, %v1782_v6  ;;  %v114_v36 = vld [vmem:[%s2899_s0 + $0x320] sm:$0xff] }
  0x6c   :  { %423 = vmatprep.mubr.f32.mxu1 %v48_v37  ;;  %v113_v37 = vld [vmem:[%s2899_s0 + $0x318] sm:$0xff] }
  0x6e   :  { %1426 = vmatmul.mubr.msk.f32.gmra.mrb[48].mxu0 %vm180_vm1, %v88_v44  ;;  %v126_v44 = vld [vmem:[%s2899_s0 + $0x380] sm:$0xff] }
  0x6f   :  { %424 = vmatmul.mubr.f32.gmra.mrb[22].mxu1 %v47_v39  ;;  %1428 = vmatprep.mubr.msk.f32.mxu0 %vm1781_vm0, %v1782_v6  ;;  %v116_v39 = vld [vmem:[%s2899_s0 + $0x330] sm:$0xff] }
  0x70   :  { %428 = vmatprep.mubr.f32.mxu1 %v51_v40  ;;  %v120_v40 = vld [vmem:[%s2899_s0 + $0x350] sm:$0xff] }
  0x72   :  { %1429 = vmatmul.mubr.msk.f32.gmra.mrb[50].mxu0 %vm180_vm1, %v91_v47  ;;  %v128_v47 = vld [vmem:[%s2899_s0 + $0x390] sm:$0xff] }
  0x73   :  { %429 = vmatmul.mubr.f32.gmra.mrb[24].mxu1 %v50_v42  ;;  %1431 = vmatprep.mubr.msk.f32.mxu0 %vm1781_vm0, %v1782_v6  ;;  %v123_v42 = vld [vmem:[%s2899_s0 + $0x368] sm:$0xff] }
  0x74   :  { %433 = vmatprep.mubr.f32.mxu1 %v54_v43  ;;  %v122_v43 = vld [vmem:[%s2899_s0 + $0x360] sm:$0xff] }
  0x76   :  { %1432 = vmatmul.mubr.msk.f32.gmra.mrb[52].mxu0 %vm180_vm1, %v94_v50  ;;  %v135_v50 = vld [vmem:[%s2899_s0 + $0x3c8] sm:$0xf] }
  0x77   :  { %434 = vmatmul.mubr.f32.gmra.mrb[26].mxu1 %v53_v45  ;;  %1434 = vmatprep.mubr.msk.f32.mxu0 %vm1781_vm0, %v1782_v6  ;;  %v125_v45 = vld [vmem:[%s2899_s0 + $0x378] sm:$0xff] }
  0x78   :  { %438 = vmatprep.mubr.f32.mxu1 %v57_v46  ;;  %v129_v46 = vld [vmem:[%s2899_s0 + $0x398] sm:$0xff] }
  0x7a   :  { %1435 = vmatmul.mubr.msk.f32.gmra.mrb[54].mxu0 %vm180_vm1, %v97_v53 }
  0x7b   :  { %439 = vmatmul.mubr.f32.gmra.mrb[28].mxu1 %v56_v48  ;;  %1437 = vmatprep.mubr.msk.f32.mxu0 %vm1781_vm0, %v1782_v6  ;;  %v132_v48 = vld [vmem:[%s2899_s0 + $0x3b0] sm:$0xff] }
  0x7c   :  { %443 = vmatprep.mubr.f32.mxu1 %v60_v49  ;;  %v131_v49 = vld [vmem:[%s2899_s0 + $0x3a8] sm:$0xff] }
  0x7e   :  { %1438 = vmatmul.mubr.msk.f32.gmra.mrb[56].mxu0 %vm180_vm1, %v100_v56 }
  0x7f   :  { %444 = vmatmul.mubr.f32.gmra.mrb[30].mxu1 %v59_v51  ;;  %1440 = vmatprep.mubr.msk.f32.mxu0 %vm1781_vm0, %v1782_v6  ;;  %v134_v51 = vld [vmem:[%s2899_s0 + $0x3c0] sm:$0xf] }
  0x80   :  { %448 = vmatprep.mubr.f32.mxu1 %v63_v52 }
  0x82   :  { %1441 = vmatmul.mubr.msk.f32.gmra.mrb[58].mxu0 %vm180_vm1, %v103_v59 }
  0x83   :  { %449 = vmatmul.mubr.f32.gmra.mrb[32].mxu1 %v62_v54  ;;  %1443 = vmatprep.mubr.msk.f32.mxu0 %vm1781_vm0, %v1782_v6 }
  0x84   :  { %453 = vmatprep.mubr.f32.mxu1 %v66_v55 }
  0x86   :  { %1444 = vmatmul.mubr.msk.f32.gmra.mrb[60].mxu0 %vm180_vm1, %v106_v62 }
  0x87   :  { %454 = vmatmul.mubr.f32.gmra.mrb[34].mxu1 %v65_v57  ;;  %1446 = vmatprep.mubr.msk.f32.mxu0 %vm1781_vm0, %v1782_v6 }
  0x88   :  { %458 = vmatprep.mubr.f32.mxu1 %v69_v58 }
  0x8a   :  { %1447 = vmatmul.mubr.msk.f32.gmra.mrb[62].mxu0 %vm180_vm1, %v109_v2 }
  0x8b   :  { %459 = vmatmul.mubr.f32.gmra.mrb[36].mxu1 %v68_v60  ;;  %1449 = vmatprep.mubr.msk.f32.mxu0 %vm1781_vm0, %v1782_v6 }
  0x8c   :  { %463 = vmatprep.mubr.f32.mxu1 %v72_v61 }
  0x8e   :  { %1450 = vmatmul.mubr.msk.f32.gmra.mrb[64].mxu0 %vm180_vm1, %v112_v5 }
  0x8f   :  { %464 = vmatmul.mubr.f32.gmra.mrb[38].mxu1 %v71_v63  ;;  %1452 = vmatprep.mubr.msk.f32.mxu0 %vm1781_vm0, %v1782_v6 }
  0x90   :  { %468 = vmatprep.mubr.f32.mxu1 %v75_v1 }
  0x92   :  { %1453 = vmatmul.mubr.msk.f32.gmra.mrb[66].mxu0 %vm180_vm1, %v115_v0 }
  0x93   :  { %469 = vmatmul.mubr.f32.gmra.mrb[40].mxu1 %v74_v3  ;;  %1455 = vmatprep.mubr.msk.f32.mxu0 %vm1781_vm0, %v1782_v6 }
  0x94   :  { %473 = vmatprep.mubr.f32.mxu1 %v78_v4 }
  0x96   :  { %1456 = vmatmul.mubr.msk.f32.gmra.mrb[68].mxu0 %vm180_vm1, %v118_v11  ;;  %v2436_v11 = vld [vmem:[%s2900_s2] ss:$0 sm:$0xff] }
  0x97   :  { %474 = vmatmul.mubr.f32.gmra.mrb[42].mxu1 %v77_v7  ;;  %1458 = vmatprep.mubr.msk.f32.mxu0 %vm1781_vm0, %v1782_v6 }
  0x98   :  { %478 = vmatprep.mubr.f32.mxu1 %v81_v8 }
  0x9a   :  { %1459 = vmatmul.mubr.msk.f32.gmra.mrb[70].mxu0 %vm180_vm1, %v121_v14 }
  0x9b   :  { %479 = vmatmul.mubr.f32.gmra.mrb[44].mxu1 %v80_v9  ;;  %1461 = vmatprep.mubr.msk.f32.mxu0 %vm1781_vm0, %v1782_v6 }
  0x9c   :  { %483 = vmatprep.mubr.f32.mxu1 %v84_v10 }
  0x9e   :  { %1462 = vmatmul.mubr.msk.f32.gmra.mrb[72].mxu0 %vm180_vm1, %v124_v17 }
  0x9f   :  { %484 = vmatmul.mubr.f32.gmra.mrb[46].mxu1 %v83_v12  ;;  %1464 = vmatprep.mubr.msk.f32.mxu0 %vm1781_vm0, %v1782_v6 }
  0xa0   :  { %488 = vmatprep.mubr.f32.mxu1 %v87_v13 }
  0xa2   :  { %1465 = vmatmul.mubr.msk.f32.gmra.mrb[74].mxu0 %vm180_vm1, %v127_v20 }
  0xa3   :  { %489 = vmatmul.mubr.f32.gmra.mrb[48].mxu1 %v86_v15  ;;  %1467 = vmatprep.mubr.msk.f32.mxu0 %vm1781_vm0, %v1782_v6 }
  0xa4   :  { %493 = vmatprep.mubr.f32.mxu1 %v90_v16 }
  0xa6   :  { %1468 = vmatmul.mubr.msk.f32.gmra.mrb[76].mxu0 %vm180_vm1, %v130_v23 }
  0xa7   :  { %494 = vmatmul.mubr.f32.gmra.mrb[50].mxu1 %v89_v18  ;;  %1470 = vmatprep.mubr.msk.f32.mxu0 %vm1781_vm0, %v1782_v6 }
  0xa8   :  { %498 = vmatprep.mubr.f32.mxu1 %v93_v19 }
  0xaa   :  { %1471 = vmatmul.mubr.msk.f32.gmra.mrb[78].mxu0 %vm180_vm1, %v133_v26 }
  0xab   :  { %499 = vmatmul.mubr.f32.gmra.mrb[52].mxu1 %v92_v21  ;;  %1473 = vmatprep.mubr.msk.f32.mxu0 %vm1781_vm0, %v1782_v6  ;;  %v104_v6 = vld [vmem:[%s2899_s0 + $0x2d0] sm:$0xff] }
  0xac   :  { %503 = vmatprep.mubr.f32.mxu1 %v96_v22 }
  0xae   :  { %1474 = vmatmul.mubr.msk.f32.gmra.mrb[80].mxu0 %vm180_vm1, %v136_v29 }
  0xaf   :  { %504 = vmatmul.mubr.f32.gmra.mrb[54].mxu1 %v95_v24 }
  0xb0   :  { %508 = vmatprep.mubr.f32.mxu1 %v99_v25 }
  0xb3   :  { %509 = vmatmul.mubr.f32.gmra.mrb[56].mxu1 %v98_v27 }
  0xb4   :  { %513 = vmatprep.mubr.f32.mxu1 %v102_v28 }
  0xb7   :  { %514 = vmatmul.mubr.f32.gmra.mrb[58].mxu1 %v101_v30 }
  0xb8   :  { %518 = vmatprep.mubr.f32.mxu1 %v105_v31 }
  0xbb   :  { %519 = vmatmul.mubr.f32.gmra.mrb[60].mxu1 %v104_v6 }
  0xbc   :  { %523 = vmatprep.mubr.f32.mxu1 %v108_v32 }
  0xbf   :  { %524 = vmatmul.mubr.f32.gmra.mrb[62].mxu1 %v107_v33 }
  0xc0   :  { %528 = vmatprep.mubr.f32.mxu1 %v111_v34 }
  0xc3   :  { %529 = vmatmul.mubr.f32.gmra.mrb[64].mxu1 %v110_v35 }
  0xc4   :  { %533 = vmatprep.mubr.f32.mxu1 %v114_v36 }
  0xc7   :  { %534 = vmatmul.mubr.f32.gmra.mrb[66].mxu1 %v113_v37 }
  0xc8   :  { %538 = vmatprep.mubr.f32.mxu1 %v117_v38 }
  0xcb   :  { %539 = vmatmul.mubr.f32.gmra.mrb[68].mxu1 %v116_v39 }
  0xcc   :  { %543 = vmatprep.mubr.f32.mxu1 %v120_v40 }
  0xcf   :  { %544 = vmatmul.mubr.f32.gmra.mrb[70].mxu1 %v119_v41 }
  0xd0   :  { %548 = vmatprep.mubr.f32.mxu1 %v123_v42 }
  0xd3   :  { %549 = vmatmul.mubr.f32.gmra.mrb[72].mxu1 %v122_v43 }
  0xd4   :  { %553 = vmatprep.mubr.f32.mxu1 %v126_v44 }
  0xd7   :  { %554 = vmatmul.mubr.f32.gmra.mrb[74].mxu1 %v125_v45 }
  0xd8   :  { %558 = vmatprep.mubr.f32.mxu1 %v129_v46 }
  0xdb   :  { %559 = vmatmul.mubr.f32.gmra.mrb[76].mxu1 %v128_v47 }
  0xdc   :  { %563 = vmatprep.mubr.f32.mxu1 %v132_v48 }
  0xdf   :  { %564 = vmatmul.mubr.f32.gmra.mrb[78].mxu1 %v131_v49 }
  0xe0   :  { %568 = vmatprep.mubr.f32.mxu1 %v135_v50 }
  0xe1   :  { %v640_v52 = vpop.f32.mrb[0].mxu0 }
  0xe2   :  { %v1355_v53 = vpop.f32.mrb[1].mxu0 }
  0xe3   :  { %569 = vmatmul.mubr.f32.gmra.mrb[80].mxu1 %v134_v51 }
  0xe5   :  { %v645_v54 = vpop.f32.mrb[2].mxu0 }
  0xe6   :  { %v1358_v55 = vpop.f32.mrb[3].mxu0 }
  0xe9   :  { %v650_v56 = vpop.f32.mrb[4].mxu0 }
  0xea   :  { %v1361_v57 = vpop.f32.mrb[5].mxu0 }
  0xed   :  { %v655_v58 = vpop.f32.mrb[6].mxu0 }
  0xee   :  { %v1364_v59 = vpop.f32.mrb[7].mxu0 }
  0xf1   :  { %v660_v60 = vpop.f32.mrb[8].mxu0 }
  0xf2   :  { %v1367_v61 = vpop.f32.mrb[9].mxu0 }
  0xf5   :  { %v2421_v62 = vpop.f32.mrb[10].mxu0 }
  0xf6   :  { %v1370_v63 = vpop.f32.mrb[11].mxu0 }
  0xf9   :  { %v2423_v1 = vpop.f32.mrb[12].mxu0 }
  0xfa   :  { %v1373_v2 = vpop.f32.mrb[13].mxu0 }
  0xfd   :  { %v2425_v3 = vpop.f32.mrb[14].mxu0 }
  0xfe   :  { %v1376_v4 = vpop.f32.mrb[15].mxu0 }
 0x101   :  { %v2427_v5 = vpop.f32.mrb[16].mxu0 }
 0x102   :  { %v1379_v7 = vpop.f32.mrb[17].mxu0 }
 0x105   :  { %v2429_v8 = vpop.f32.mrb[18].mxu0 }
 0x106   :  { %v1382_v0 = vpop.f32.mrb[19].mxu0 }
 0x109   :  { %v2431_v9 = vpop.f32.mrb[20].mxu0 }
 0x10a   :  { %v1385_v10 = vpop.f32.mrb[21].mxu0 }
 0x10d   :  { %v2438_v12 = vpop.f32.mrb[22].mxu0 }
 0x10e   :  { %v1388_v13 = vpop.f32.mrb[23].mxu0 }
 0x111   :  { %v2441_v17 = vpop.f32.mrb[24].mxu0 }
 0x112   :  { %v1391_v19 = vpop.f32.mrb[25].mxu0 }
 0x115   :  { %v2447_v24 = vpop.f32.mrb[26].mxu0 }
 0x116   :  { %v370_v14 = vpop.f32.mrb[0].mxu1  ;;  %v1394_v27 = vpop.f32.mrb[27].mxu0 }
 0x117   :  { %v371_v15 = vadd.f32 %v2436_v11, %v370_v14  ;;  %v372_v16 = vpop.f32.mrb[1].mxu1 }
 0x119   :  { %v2443_v18 = vadd.f32 %v640_v52, %v371_v15  ;;  %v2453_v32 = vpop.f32.mrb[28].mxu0 }
 0x11a   :  { %v375_v20 = vpop.f32.mrb[2].mxu1  ;;  %v1397_v35 = vpop.f32.mrb[29].mxu0 }
 0x11b   :  { %v844_v21 = vmin.f32 %v2443_v18, 0.0  ;;  %v376_v22 = vadd.f32 %v2436_v11, %v375_v20  ;;  %v377_v23 = vpop.f32.mrb[3].mxu1  ;;  %vm1131_vm2 = vcmp.gt.f32.partialorder %v2443_v18, 0.0 }
 0x11d   :  { %v967_v25 = vmul.f32 1.442695, %v844_v21  ;;  %v2449_v26 = vadd.f32 %v645_v54, %v376_v22  ;;  %v885_v28 = vmul.f32 0.5, %v844_v21  ;;  %v2459_v41 = vpop.f32.mrb[30].mxu0 }
 0x11e   :  { %v380_v29 = vpop.f32.mrb[4].mxu1  ;;  %v1400_v44 = vpop.f32.mrb[31].mxu0 }
 0x11f   :  { %v845_v30 = vmin.f32 %v2449_v26, 0.0  ;;  %v381_v31 = vadd.f32 %v2436_v11, %v380_v29  ;;  %v382_v6 = vpop.f32.mrb[5].mxu1  ;;  %1615 = vpow2.f32 %v967_v25  ;;  %vm1132_vm3 = vcmp.gt.f32.partialorder %v2449_v26, 0.0 }
 0x120   :  { %1617 = vtanh.f32 %v885_v28 }
 0x121   :  { %v969_v33 = vmul.f32 1.442695, %v845_v30  ;;  %v2455_v34 = vadd.f32 %v650_v56, %v381_v31  ;;  %v886_v36 = vmul.f32 0.5, %v845_v30  ;;  %v2465_v50 = vpop.f32.mrb[32].mxu0 }
 0x122   :  { %v385_v37 = vpop.f32.mrb[6].mxu1  ;;  %v1403_v53 = vpop.f32.mrb[33].mxu0 }
 0x123   :  { %v846_v38 = vmin.f32 %v2455_v34, 0.0  ;;  %v386_v39 = vadd.f32 %v2436_v11, %v385_v37  ;;  %v387_v40 = vpop.f32.mrb[7].mxu1  ;;  %1619 = vpow2.f32 %v969_v33  ;;  %vm1133_vm4 = vcmp.gt.f32.partialorder %v2455_v34, 0.0 }
 0x124   :  { %1621 = vtanh.f32 %v886_v36 }
 0x125   :  { %v971_v42 = vmul.f32 1.442695, %v846_v38  ;;  %v2461_v43 = vadd.f32 %v655_v58, %v386_v39  ;;  %v887_v45 = vmul.f32 0.5, %v846_v38  ;;  %v2471_v2 = vpop.f32.mrb[34].mxu0 }
 0x126   :  { %v390_v46 = vpop.f32.mrb[8].mxu1  ;;  %v1406_v0 = vpop.f32.mrb[35].mxu0 }
 0x127   :  { %v847_v47 = vmin.f32 %v2461_v43, 0.0  ;;  %v391_v48 = vadd.f32 %v2436_v11, %v390_v46  ;;  %v392_v49 = vpop.f32.mrb[9].mxu1  ;;  %1623 = vpow2.f32 %v971_v42  ;;  %vm1134_vm5 = vcmp.gt.f32.partialorder %v2461_v43, 0.0 }
 0x128   :  { %1625 = vtanh.f32 %v887_v45 }
 0x129   :  { %v973_v51 = vmul.f32 1.442695, %v847_v47  ;;  %v2467_v52 = vadd.f32 %v660_v60, %v391_v48  ;;  %v1616_v54 = vpop.eup %1615  ;;  %v888_v55 = vmul.f32 0.5, %v847_v47  ;;  %v2483_v23 = vpop.f32.mrb[36].mxu0 }
 0x12a   :  { %v395_v56 = vpop.f32.mrb[10].mxu1  ;;  %v1049_v57 = vadd.f32 1.0, %v1616_v54  ;;  %v1618_v61 = vpop.eup %1617 }
 0x12b   :  { %v848_v58 = vmin.f32 %v2467_v52, 0.0  ;;  %v397_v59 = vpop.f32.mrb[11].mxu1  ;;  %1627 = vpow2.f32 %v973_v51  ;;  %v396_v63 = vadd.f32 %v2436_v11, %v395_v56  ;;  %v1409_v27 = vpop.f32.mrb[37].mxu0  ;;  %vm1135_vm6 = vcmp.gt.f32.partialorder %v2467_v52, 0.0 }
 0x12c   :  { %v1090_v4 = vmul.f32 %v1618_v61, %v1049_v57  ;;  %1629 = vtanh.f32 %v888_v55 }
 0x12d   :  { %v975_v7 = vmul.f32 1.442695, %v848_v58  ;;  %v1620_v60 = vpop.eup %1619  ;;  %v889_v10 = vmul.f32 0.5, %v848_v58  ;;  %v2475_v13 = vadd.f32 %v2421_v62, %v396_v63  ;;  %v2495_v37 = vpop.f32.mrb[38].mxu0 }
 0x12e   :  { %v400_v14 = vpop.f32.mrb[12].mxu1  ;;  %v1172_v15 = vsel %vm1131_vm2, %v2443_v18, %v1090_v4  ;;  %v1050_v16 = vadd.f32 1.0, %v1620_v60  ;;  %v1622_v21 = vpop.eup %1621 }
 0x12f   :  { %v401_v19 = vadd.f32 %v2436_v11, %v400_v14  ;;  %v402_v20 = vpop.f32.mrb[13].mxu1  ;;  %1213 = vst [vmem:[%s2901_s3] sm:$0xff] %v1172_v15  ;;  %1631 = vpow2.f32 %v975_v7  ;;  %v849_v22 = vmin.f32 %v2475_v13, 0.0  ;;  %v1412_v40 = vpop.f32.mrb[39].mxu0  ;;  %vm1136_vm7 = vcmp.gt.f32.partialorder %v2475_v13, 0.0 }
 0x130   :  { %v1091_v25 = vmul.f32 %v1622_v21, %v1050_v16  ;;  %1633 = vtanh.f32 %v889_v10 }
 0x131   :  { %v2486_v62 = vadd.f32 %v2423_v1, %v401_v19  ;;  %v1624_v18 = vpop.eup %1623  ;;  %v977_v28 = vmul.f32 1.442695, %v849_v22  ;;  %v890_v6 = vmul.f32 0.5, %v849_v22  ;;  %v2507_v54 = vpop.f32.mrb[40].mxu0 }
 0x132   :  { %v405_v29 = vpop.f32.mrb[14].mxu1  ;;  %v1173_v30 = vsel %vm1132_vm3, %v2449_v26, %v1091_v25  ;;  %v1051_v31 = vadd.f32 1.0, %v1624_v18  ;;  %v1626_v36 = vpop.eup %1625 }
 0x133   :  { %v850_v33 = vmin.f32 %v2486_v62, 0.0  ;;  %v407_v35 = vpop.f32.mrb[15].mxu1  ;;  %1214 = vst [vmem:[%s2901_s3 + $0x8] sm:$0xff] %v1173_v30  ;;  %v406_v1 = vadd.f32 %v2436_v11, %v405_v29  ;;  %1635 = vpow2.f32 %v977_v28  ;;  %vm1137_vm8 = vcmp.gt.f32.partialorder %v2486_v62, 0.0 }
 0x134   :  { %v1092_v38 = vmul.f32 %v1626_v36, %v1051_v31  ;;  %1637 = vtanh.f32 %v890_v6 }
 0x135   :  { %v979_v39 = vmul.f32 1.442695, %v850_v33  ;;  %v1628_v42 = vpop.eup %1627  ;;  %v891_v26 = vmul.f32 0.5, %v850_v33  ;;  %v2499_v44 = vadd.f32 %v2425_v3, %v406_v1 }
 0x136   :  { %v410_v45 = vpop.f32.mrb[16].mxu1  ;;  %v1174_v46 = vsel %vm1133_vm4, %v2455_v34, %v1092_v38  ;;  %v1052_v47 = vadd.f32 1.0, %v1628_v42  ;;  %v1630_v51 = vpop.eup %1629 }
 0x137   :  { %v411_v48 = vadd.f32 %v2436_v11, %v410_v45  ;;  %v412_v49 = vpop.f32.mrb[17].mxu1  ;;  %1215 = vst [vmem:[%s2901_s3 + $0x10] sm:$0xff] %v1174_v46  ;;  %1639 = vpow2.f32 %v979_v39  ;;  %v851_v53 = vmin.f32 %v2499_v44, 0.0  ;;  %v1415_v34 = vpop.f32.mrb[41].mxu0  ;;  %vm1138_vm9 = vcmp.gt.f32.partialorder %v2499_v44, 0.0 }
 0x138   :  { %v1093_v3 = vmul.f32 %v1630_v51, %v1052_v47  ;;  %1641 = vtanh.f32 %v891_v26  ;;  %v2519_v60 = vpop.f32.mrb[42].mxu0 }
 0x139   :  { %v2510_v55 = vadd.f32 %v2427_v5, %v411_v48  ;;  %v1632_v56 = vpop.eup %1631  ;;  %v981_v57 = vmul.f32 1.442695, %v851_v53  ;;  %v892_v63 = vmul.f32 0.5, %v851_v53  ;;  %v1418_v15 = vpop.f32.mrb[43].mxu0 }
 0x13a   :  { %v415_v58 = vpop.f32.mrb[18].mxu1  ;;  %v1175_v59 = vsel %vm1134_vm5, %v2461_v43, %v1093_v3  ;;  %v1053_v61 = vadd.f32 1.0, %v1632_v56  ;;  %v1634_v0 = vpop.eup %1633 }
 0x13b   :  { %v852_v4 = vmin.f32 %v2510_v55, 0.0  ;;  %v417_v7 = vpop.f32.mrb[19].mxu1  ;;  %1216 = vst [vmem:[%s2901_s3 + $0x18] sm:$0xff] %v1175_v59  ;;  %v416_v5 = vadd.f32 %v2436_v11, %v415_v58  ;;  %1643 = vpow2.f32 %v981_v57  ;;  %v2531_v28 = vpop.f32.mrb[44].mxu0  ;;  %vm1139_vm10 = vcmp.gt.f32.partialorder %v2510_v55, 0.0 }
 0x13c   :  { %v1094_v10 = vmul.f32 %v1634_v0, %v1053_v61  ;;  %1645 = vtanh.f32 %v892_v63  ;;  %v1421_v30 = vpop.f32.mrb[45].mxu0 }
 0x13d   :  { %v983_v14 = vmul.f32 1.442695, %v852_v4  ;;  %v893_v43 = vmul.f32 0.5, %v852_v4  ;;  %v2523_v16 = vadd.f32 %v2429_v8, %v416_v5  ;;  %v1636_v20 = vpop.eup %1635 }
 0x13e   :  { %v420_v19 = vpop.f32.mrb[20].mxu1  ;;  %v1176_v21 = vsel %vm1135_vm6, %v2467_v52, %v1094_v10  ;;  %v1054_v27 = vadd.f32 1.0, %v1636_v20  ;;  %v1638_v8 = vpop.eup %1637 }
 0x13f   :  { %v421_v22 = vadd.f32 %v2436_v11, %v420_v19  ;;  %v422_v25 = vpop.f32.mrb[21].mxu1  ;;  %1217 = vst [vmem:[%s2901_s3 + $0x20] sm:$0xff] %v1176_v21  ;;  %1647 = vpow2.f32 %v983_v14  ;;  %v853_v18 = vmin.f32 %v2523_v16, 0.0  ;;  %vm1140_vm11 = vcmp.gt.f32.partialorder %v2523_v16, 0.0 }
 0x140   :  { %v1095_v31 = vmul.f32 %v1638_v8, %v1054_v27  ;;  %1649 = vtanh.f32 %v893_v43 }
 0x141   :  { %v2534_v29 = vadd.f32 %v2431_v9, %v421_v22  ;;  %v1640_v52 = vpop.eup %1639  ;;  %v985_v6 = vmul.f32 1.442695, %v853_v18  ;;  %v894_v36 = vmul.f32 0.5, %v853_v18  ;;  %v2540_v9 = vpop.f32.mrb[46].mxu0 }
 0x142   :  { %v425_v33 = vpop.f32.mrb[22].mxu1  ;;  %v1055_v35 = vadd.f32 1.0, %v1640_v52  ;;  %v1642_v40 = vpop.eup %1641  ;;  %v1177_v42 = vsel %vm1136_vm7, %v2475_v13, %v1095_v31 }
 0x143   :  { %v854_v1 = vmin.f32 %v2534_v29, 0.0  ;;  %v426_v38 = vadd.f32 %v2436_v11, %v425_v33  ;;  %v427_v39 = vpop.f32.mrb[23].mxu1  ;;  %1218 = vst [vmem:[%s2901_s3 + $0x28] sm:$0xff] %v1177_v42  ;;  %1651 = vpow2.f32 %v985_v6  ;;  %v1424_v46 = vpop.f32.mrb[47].mxu0  ;;  %vm1141_vm12 = vcmp.gt.f32.partialorder %v2534_v29, 0.0 }
 0x144   :  { %v1096_v26 = vmul.f32 %v1642_v40, %v1055_v35  ;;  %1653 = vtanh.f32 %v894_v36  ;;  %v2555_v57 = vpop.f32.mrb[48].mxu0 }
 0x145   :  { %v987_v45 = vmul.f32 1.442695, %v854_v1  ;;  %v895_v47 = vmul.f32 0.5, %v854_v1  ;;  %v2547_v48 = vadd.f32 %v2438_v12, %v426_v38  ;;  %v1644_v51 = vpop.eup %1643  ;;  %v1427_v59 = vpop.f32.mrb[49].mxu0 }
 0x146   :  { %v430_v49 = vpop.f32.mrb[24].mxu1  ;;  %v1178_v13 = vsel %vm1137_vm8, %v2486_v62, %v1096_v26  ;;  %v1056_v34 = vadd.f32 1.0, %v1644_v51  ;;  %v1646_v12 = vpop.eup %1645 }
 0x147   :  { %v431_v53 = vadd.f32 %v2436_v11, %v430_v49  ;;  %v432_v3 = vpop.f32.mrb[25].mxu1  ;;  %1219 = vst [vmem:[%s2901_s3 + $0x30] sm:$0xff] %v1178_v13  ;;  %1655 = vpow2.f32 %v987_v45  ;;  %v855_v56 = vmin.f32 %v2547_v48, 0.0  ;;  %vm1142_vm13 = vcmp.gt.f32.partialorder %v2547_v48, 0.0 }
 0x148   :  { %v1097_v61 = vmul.f32 %v1646_v12, %v1056_v34  ;;  %1657 = vtanh.f32 %v895_v47 }
 0x149   :  { %v2558_v58 = vadd.f32 %v2441_v17, %v431_v53  ;;  %v1648_v62 = vpop.eup %1647  ;;  %v989_v63 = vmul.f32 1.442695, %v855_v56  ;;  %v896_v0 = vmul.f32 0.5, %v855_v56  ;;  %v2564_v17 = vpop.f32.mrb[50].mxu0 }
 0x14a   :  { %v435_v4 = vpop.f32.mrb[26].mxu1  ;;  %v1057_v7 = vadd.f32 1.0, %v1648_v62  ;;  %v1650_v15 = vpop.eup %1649  ;;  %v1179_v43 = vsel %vm1138_vm9, %v2499_v44, %v1097_v61 }
 0x14b   :  { %v856_v5 = vmin.f32 %v2558_v58, 0.0  ;;  %v436_v10 = vadd.f32 %v2436_v11, %v435_v4  ;;  %v437_v14 = vpop.f32.mrb[27].mxu1  ;;  %1220 = vst [vmem:[%s2901_s3 + $0x38] sm:$0xff] %v1179_v43  ;;  %1659 = vpow2.f32 %v989_v63  ;;  %v1430_v21 = vpop.f32.mrb[51].mxu0  ;;  %vm1143_vm14 = vcmp.gt.f32.partialorder %v2558_v58, 0.0 }
 0x14c   :  { %v1098_v19 = vmul.f32 %v1650_v15, %v1057_v7  ;;  %1661 = vtanh.f32 %v896_v0  ;;  %v2579_v6 = vpop.f32.mrb[52].mxu0 }
 0x14d   :  { %v991_v20 = vmul.f32 1.442695, %v856_v5  ;;  %v897_v22 = vmul.f32 0.5, %v856_v5  ;;  %v2571_v25 = vadd.f32 %v2447_v24, %v436_v10  ;;  %v1652_v18 = vpop.eup %1651  ;;  %v1433_v35 = vpop.f32.mrb[53].mxu0 }
 0x14e   :  { %v440_v27 = vpop.f32.mrb[28].mxu1  ;;  %v1180_v44 = vsel %vm1139_vm10, %v2510_v55, %v1098_v19  ;;  %v1058_v52 = vadd.f32 1.0, %v1652_v18  ;;  %v1654_v24 = vpop.eup %1653 }
 0x14f   :  { %v441_v8 = vadd.f32 %v2436_v11, %v440_v27  ;;  %v442_v30 = vpop.f32.mrb[29].mxu1  ;;  %1221 = vst [vmem:[%s2901_s3 + $0x40] sm:$0xff] %v1180_v44  ;;  %1663 = vpow2.f32 %v991_v20  ;;  %v857_v31 = vmin.f32 %v2571_v25, 0.0  ;;  %vm1144_vm15 = vcmp.gt.f32.partialorder %v2571_v25, 0.0 }
 0x150   :  { %v1099_v36 = vmul.f32 %v1654_v24, %v1058_v52  ;;  %1665 = vtanh.f32 %v897_v22 }
 0x151   :  { %v2582_v33 = vadd.f32 %v2453_v32, %v441_v8  ;;  %v1656_v55 = vpop.eup %1655  ;;  %v993_v1 = vmul.f32 1.442695, %v857_v31  ;;  %v898_v40 = vmul.f32 0.5, %v857_v31  ;;  %v2588_v32 = vpop.f32.mrb[54].mxu0 }
 0x152   :  { %v445_v38 = vpop.f32.mrb[30].mxu1  ;;  %v1059_v39 = vadd.f32 1.0, %v1656_v55  ;;  %v1658_v46 = vpop.eup %1657  ;;  %v1181_v47 = vsel %vm1140_vm11, %v2523_v16, %v1099_v36 }
 0x153   :  { %v858_v42 = vmin.f32 %v2582_v33, 0.0  ;;  %v446_v26 = vadd.f32 %v2436_v11, %v445_v38  ;;  %v447_v45 = vpop.f32.mrb[31].mxu1  ;;  %1222 = vst [vmem:[%s2901_s3 + $0x48] sm:$0xff] %v1181_v47  ;;  %1667 = vpow2.f32 %v993_v1  ;;  %v1436_v13 = vpop.f32.mrb[55].mxu0  ;;  %vm1145_vm0 = vcmp.gt.f32.partialorder %v2582_v33, 0.0 }
 0x154   :  { %v1100_v49 = vmul.f32 %v1658_v46, %v1059_v39  ;;  %1669 = vtanh.f32 %v898_v40  ;;  %v2603_v63 = vpop.f32.mrb[56].mxu0 }
 0x155   :  { %v995_v51 = vmul.f32 1.442695, %v858_v42  ;;  %v899_v53 = vmul.f32 0.5, %v858_v42  ;;  %v2595_v3 = vadd.f32 %v2459_v41, %v446_v26  ;;  %v1660_v56 = vpop.eup %1659  ;;  %v1439_v7 = vpop.f32.mrb[57].mxu0 }
 0x156   :  { %v450_v34 = vpop.f32.mrb[32].mxu1  ;;  %v1182_v16 = vsel %vm1141_vm12, %v2534_v29, %v1100_v49  ;;  %v1060_v62 = vadd.f32 1.0, %v1660_v56  ;;  %v1662_v41 = vpop.eup %1661 }
 0x157   :  { %v451_v12 = vadd.f32 %v2436_v11, %v450_v34  ;;  %v452_v59 = vpop.f32.mrb[33].mxu1  ;;  %1223 = vst [vmem:[%s2901_s3 + $0x50] sm:$0xff] %v1182_v16  ;;  %1671 = vpow2.f32 %v995_v51  ;;  %v859_v61 = vmin.f32 %v2595_v3, 0.0  ;;  %vm1146_vm1 = vcmp.gt.f32.partialorder %v2595_v3, 0.0 }
 0x158   :  { %v1101_v0 = vmul.f32 %v1662_v41, %v1060_v62  ;;  %1673 = vtanh.f32 %v899_v53 }
 0x159   :  { %v2606_v4 = vadd.f32 %v2465_v50, %v451_v12  ;;  %v1664_v29 = vpop.eup %1663  ;;  %v997_v5 = vmul.f32 1.442695, %v859_v61  ;;  %v900_v15 = vmul.f32 0.5, %v859_v61  ;;  %v2612_v50 = vpop.f32.mrb[58].mxu0 }
 0x15a   :  { %v455_v10 = vpop.f32.mrb[34].mxu1  ;;  %v1061_v14 = vadd.f32 1.0, %v1664_v29  ;;  %v1666_v21 = vpop.eup %1665  ;;  %v1183_v22 = vsel %vm1142_vm13, %v2547_v48, %v1101_v0 }
 0x15b   :  { %v860_v43 = vmin.f32 %v2606_v4, 0.0  ;;  %v456_v19 = vadd.f32 %v2436_v11, %v455_v10  ;;  %v457_v20 = vpop.f32.mrb[35].mxu1  ;;  %1224 = vst [vmem:[%s2901_s3 + $0x58] sm:$0xff] %v1183_v22  ;;  %1675 = vpow2.f32 %v997_v5  ;;  %v1442_v44 = vpop.f32.mrb[59].mxu0  ;;  %vm1147_vm2 = vcmp.gt.f32.partialorder %v2606_v4, 0.0 }
 0x15c   :  { %v1102_v27 = vmul.f32 %v1666_v21, %v1061_v14  ;;  %1677 = vtanh.f32 %v900_v15  ;;  %v2627_v1 = vpop.f32.mrb[60].mxu0 }
 0x15d   :  { %v999_v18 = vmul.f32 1.442695, %v860_v43  ;;  %v901_v8 = vmul.f32 0.5, %v860_v43  ;;  %v2619_v30 = vadd.f32 %v2471_v2, %v456_v19  ;;  %v1668_v31 = vpop.eup %1667  ;;  %v1445_v39 = vpop.f32.mrb[61].mxu0 }
 0x15e   :  { %v460_v52 = vpop.f32.mrb[36].mxu1  ;;  %v1184_v48 = vsel %vm1143_vm14, %v2558_v58, %v1102_v27  ;;  %v1062_v55 = vadd.f32 1.0, %v1668_v31  ;;  %v1670_v2 = vpop.eup %1669 }
 0x15f   :  { %v461_v24 = vadd.f32 %v2436_v11, %v460_v52  ;;  %v462_v35 = vpop.f32.mrb[37].mxu1  ;;  %1225 = vst [vmem:[%s2901_s3 + $0x60] sm:$0xff] %v1184_v48  ;;  %1679 = vpow2.f32 %v999_v18  ;;  %v861_v36 = vmin.f32 %v2619_v30, 0.0  ;;  %vm1148_vm3 = vcmp.gt.f32.partialorder %v2619_v30, 0.0 }
 0x160   :  { %v1103_v40 = vmul.f32 %v1670_v2, %v1062_v55  ;;  %1681 = vtanh.f32 %v901_v8 }
 0x161   :  { %v2630_v38 = vadd.f32 %v2483_v23, %v461_v24  ;;  %v1672_v58 = vpop.eup %1671  ;;  %v1001_v42 = vmul.f32 1.442695, %v861_v36  ;;  %v902_v46 = vmul.f32 0.5, %v861_v36  ;;  %v2636_v23 = vpop.f32.mrb[62].mxu0 }
 0x162   :  { %v465_v26 = vpop.f32.mrb[38].mxu1  ;;  %v1063_v45 = vadd.f32 1.0, %v1672_v58  ;;  %v1674_v13 = vpop.eup %1673  ;;  %v1185_v53 = vsel %vm1144_vm15, %v2571_v25, %v1103_v40 }
 0x163   :  { %v862_v47 = vmin.f32 %v2630_v38, 0.0  ;;  %v466_v49 = vadd.f32 %v2436_v11, %v465_v26  ;;  %v467_v51 = vpop.f32.mrb[39].mxu1  ;;  %1226 = vst [vmem:[%s2901_s3 + $0x68] sm:$0xff] %v1185_v53  ;;  %1683 = vpow2.f32 %v1001_v42  ;;  %v1448_v16 = vpop.f32.mrb[63].mxu0  ;;  %vm1149_vm4 = vcmp.gt.f32.partialorder %v2630_v38, 0.0 }
 0x164   :  { %v1104_v34 = vmul.f32 %v1674_v13, %v1063_v45  ;;  %1685 = vtanh.f32 %v902_v46  ;;  %v2651_v5 = vpop.f32.mrb[64].mxu0 }
 0x165   :  { %v1003_v56 = vmul.f32 1.442695, %v862_v47  ;;  %v903_v12 = vmul.f32 0.5, %v862_v47  ;;  %v2643_v59 = vadd.f32 %v2495_v37, %v466_v49  ;;  %v1676_v61 = vpop.eup %1675  ;;  %v1451_v14 = vpop.f32.mrb[65].mxu0 }
 0x166   :  { %v470_v62 = vpop.f32.mrb[40].mxu1  ;;  %v1186_v25 = vsel %vm1145_vm0, %v2582_v33, %v1104_v34  ;;  %v1064_v29 = vadd.f32 1.0, %v1676_v61  ;;  %v1678_v37 = vpop.eup %1677 }
 0x167   :  { %v471_v41 = vadd.f32 %v2436_v11, %v470_v62  ;;  %v472_v7 = vpop.f32.mrb[41].mxu1  ;;  %1227 = vst [vmem:[%s2901_s3 + $0x70] sm:$0xff] %v1186_v25  ;;  %1687 = vpow2.f32 %v1003_v56  ;;  %v863_v0 = vmin.f32 %v2643_v59, 0.0  ;;  %vm1150_vm5 = vcmp.gt.f32.partialorder %v2643_v59, 0.0 }
 0x168   :  { %v1105_v15 = vmul.f32 %v1678_v37, %v1064_v29  ;;  %1689 = vtanh.f32 %v903_v12 }
 0x169   :  { %v2654_v10 = vadd.f32 %v2507_v54, %v471_v41  ;;  %v1680_v33 = vpop.eup %1679  ;;  %v1005_v43 = vmul.f32 1.442695, %v863_v0  ;;  %v904_v21 = vmul.f32 0.5, %v863_v0  ;;  %v2660_v54 = vpop.f32.mrb[66].mxu0 }
 0x16a   :  { %v475_v19 = vpop.f32.mrb[42].mxu1  ;;  %v1065_v20 = vadd.f32 1.0, %v1680_v33  ;;  %v1682_v44 = vpop.eup %1681  ;;  %v1187_v8 = vsel %vm1146_vm1, %v2595_v3, %v1105_v15 }
 0x16b   :  { %v864_v22 = vmin.f32 %v2654_v10, 0.0  ;;  %v476_v27 = vadd.f32 %v2436_v11, %v475_v19  ;;  %v477_v18 = vpop.f32.mrb[43].mxu1  ;;  %1228 = vst [vmem:[%s2901_s3 + $0x78] sm:$0xff] %v1187_v8  ;;  %1691 = vpow2.f32 %v1005_v43  ;;  %v1454_v48 = vpop.f32.mrb[67].mxu0  ;;  %vm1151_vm6 = vcmp.gt.f32.partialorder %v2654_v10, 0.0 }
 0x16c   :  { %v1106_v52 = vmul.f32 %v1682_v44, %v1065_v20  ;;  %1693 = vtanh.f32 %v904_v21  ;;  %v2675_v42 = vpop.f32.mrb[68].mxu0 }
 0x16d   :  { %v1007_v31 = vmul.f32 1.442695, %v864_v22  ;;  %v905_v24 = vmul.f32 0.5, %v864_v22  ;;  %v2667_v35 = vadd.f32 %v2519_v60, %v476_v27  ;;  %v1684_v36 = vpop.eup %1683  ;;  %v1457_v45 = vpop.f32.mrb[69].mxu0 }
 0x16e   :  { %v480_v55 = vpop.f32.mrb[44].mxu1  ;;  %v1188_v3 = vsel %vm1147_vm2, %v2606_v4, %v1106_v52  ;;  %v1066_v58 = vadd.f32 1.0, %v1684_v36  ;;  %v1686_v60 = vpop.eup %1685 }
 0x16f   :  { %v481_v2 = vadd.f32 %v2436_v11, %v480_v55  ;;  %v482_v39 = vpop.f32.mrb[45].mxu1  ;;  %1229 = vst [vmem:[%s2901_s3 + $0x80] sm:$0xff] %v1188_v3  ;;  %1695 = vpow2.f32 %v1007_v31  ;;  %v865_v40 = vmin.f32 %v2667_v35, 0.0  ;;  %vm1152_vm7 = vcmp.gt.f32.partialorder %v2667_v35, 0.0 }
 0x170   :  { %v1107_v46 = vmul.f32 %v1686_v60, %v1066_v58  ;;  %1697 = vtanh.f32 %v905_v24 }
 0x171   :  { %v2678_v26 = vadd.f32 %v2531_v28, %v481_v2  ;;  %v1688_v4 = vpop.eup %1687  ;;  %v1009_v47 = vmul.f32 1.442695, %v865_v40  ;;  %v906_v13 = vmul.f32 0.5, %v865_v40  ;;  %v2684_v28 = vpop.f32.mrb[70].mxu0 }
 0x172   :  { %v485_v49 = vpop.f32.mrb[46].mxu1  ;;  %v1067_v51 = vadd.f32 1.0, %v1688_v4  ;;  %v1690_v16 = vpop.eup %1689  ;;  %v1189_v12 = vsel %vm1148_vm3, %v2619_v30, %v1107_v46 }
 0x173   :  { %v866_v53 = vmin.f32 %v2678_v26, 0.0  ;;  %v486_v34 = vadd.f32 %v2436_v11, %v485_v49  ;;  %v487_v56 = vpop.f32.mrb[47].mxu1  ;;  %1230 = vst [vmem:[%s2901_s3 + $0x88] sm:$0xff] %v1189_v12  ;;  %1699 = vpow2.f32 %v1009_v47  ;;  %v1460_v25 = vpop.f32.mrb[71].mxu0  ;;  %vm1153_vm8 = vcmp.gt.f32.partialorder %v2678_v26, 0.0 }
 0x174   :  { %v1108_v62 = vmul.f32 %v1690_v16, %v1067_v51  ;;  %1701 = vtanh.f32 %v906_v13  ;;  %v2699_v43 = vpop.f32.mrb[72].mxu0 }
 0x175   :  { %v1011_v61 = vmul.f32 1.442695, %v866_v53  ;;  %v907_v41 = vmul.f32 0.5, %v866_v53  ;;  %v2691_v7 = vadd.f32 %v2540_v9, %v486_v34  ;;  %v1692_v0 = vpop.eup %1691  ;;  %v1463_v20 = vpop.f32.mrb[73].mxu0 }
 0x176   :  { %v490_v29 = vpop.f32.mrb[48].mxu1  ;;  %v1190_v30 = vsel %vm1149_vm4, %v2630_v38, %v1108_v62  ;;  %v1068_v33 = vadd.f32 1.0, %v1692_v0  ;;  %v1694_v9 = vpop.eup %1693 }
 0x177   :  { %v491_v37 = vadd.f32 %v2436_v11, %v490_v29  ;;  %v492_v14 = vpop.f32.mrb[49].mxu1  ;;  %1231 = vst [vmem:[%s2901_s3 + $0x90] sm:$0xff] %v1190_v30  ;;  %1703 = vpow2.f32 %v1011_v61  ;;  %v867_v15 = vmin.f32 %v2691_v7, 0.0  ;;  %vm1154_vm9 = vcmp.gt.f32.partialorder %v2691_v7, 0.0 }
 0x178   :  { %v1109_v21 = vmul.f32 %v1694_v9, %v1068_v33  ;;  %1705 = vtanh.f32 %v907_v41 }
 0x179   :  { %v2702_v19 = vadd.f32 %v2555_v57, %v491_v37  ;;  %v1696_v38 = vpop.eup %1695  ;;  %v1013_v22 = vmul.f32 1.442695, %v867_v15  ;;  %v908_v44 = vmul.f32 0.5, %v867_v15  ;;  %v2708_v57 = vpop.f32.mrb[74].mxu0 }
 0x17a   :  { %v495_v27 = vpop.f32.mrb[50].mxu1  ;;  %v1069_v18 = vadd.f32 1.0, %v1696_v38  ;;  %v1698_v48 = vpop.eup %1697  ;;  %v1191_v24 = vsel %vm1150_vm5, %v2643_v59, %v1109_v21 }
 0x17b   :  { %v868_v8 = vmin.f32 %v2702_v19, 0.0  ;;  %v496_v52 = vadd.f32 %v2436_v11, %v495_v27  ;;  %v497_v31 = vpop.f32.mrb[51].mxu1  ;;  %1232 = vst [vmem:[%s2901_s3 + $0x98] sm:$0xff] %v1191_v24  ;;  %1707 = vpow2.f32 %v1013_v22  ;;  %v1466_v3 = vpop.f32.mrb[75].mxu0  ;;  %vm1155_vm10 = vcmp.gt.f32.partialorder %v2702_v19, 0.0 }
 0x17c   :  { %v1110_v55 = vmul.f32 %v1698_v48, %v1069_v18  ;;  %1709 = vtanh.f32 %v908_v44  ;;  %v2723_v47 = vpop.f32.mrb[76].mxu0 }
 0x17d   :  { %v1015_v36 = vmul.f32 1.442695, %v868_v8  ;;  %v909_v2 = vmul.f32 0.5, %v868_v8  ;;  %v2715_v39 = vadd.f32 %v2564_v17, %v496_v52  ;;  %v1700_v40 = vpop.eup %1699  ;;  %v1469_v51 = vpop.f32.mrb[77].mxu0 }
 0x17e   :  { %v500_v58 = vpop.f32.mrb[52].mxu1  ;;  %v1192_v59 = vsel %vm1151_vm6, %v2654_v10, %v1110_v55  ;;  %v1070_v4 = vadd.f32 1.0, %v1700_v40  ;;  %v1702_v17 = vpop.eup %1701 }
 0x17f   :  { %v501_v60 = vadd.f32 %v2436_v11, %v500_v58  ;;  %v502_v45 = vpop.f32.mrb[53].mxu1  ;;  %1233 = vst [vmem:[%s2901_s3 + $0xa0] sm:$0xff] %v1192_v59  ;;  %1711 = vpow2.f32 %v1015_v36  ;;  %v869_v46 = vmin.f32 %v2715_v39, 0.0  ;;  %vm1156_vm11 = vcmp.gt.f32.partialorder %v2715_v39, 0.0 }
 0x180   :  { %v1111_v13 = vmul.f32 %v1702_v17, %v1070_v4  ;;  %1713 = vtanh.f32 %v909_v2 }
 0x181   :  { %v2726_v49 = vadd.f32 %v2579_v6, %v501_v60  ;;  %v1704_v10 = vpop.eup %1703  ;;  %v1017_v53 = vmul.f32 1.442695, %v869_v46  ;;  %v910_v16 = vmul.f32 0.5, %v869_v46  ;;  %v2732_v6 = vpop.f32.mrb[78].mxu0 }
 0x182   :  { %v505_v34 = vpop.f32.mrb[54].mxu1  ;;  %v1071_v56 = vadd.f32 1.0, %v1704_v10  ;;  %v1706_v25 = vpop.eup %1705  ;;  %v1193_v41 = vsel %vm1152_vm7, %v2667_v35, %v1111_v13 }
 0x183   :  { %v870_v12 = vmin.f32 %v2726_v49, 0.0  ;;  %v506_v62 = vadd.f32 %v2436_v11, %v505_v34  ;;  %v507_v61 = vpop.f32.mrb[55].mxu1  ;;  %1234 = vst [vmem:[%s2901_s3 + $0xa8] sm:$0xff] %v1193_v41  ;;  %1715 = vpow2.f32 %v1017_v53  ;;  %v1472_v30 = vpop.f32.mrb[79].mxu0  ;;  %vm1157_vm12 = vcmp.gt.f32.partialorder %v2726_v49, 0.0 }
 0x184   :  { %v1112_v29 = vmul.f32 %v1706_v25, %v1071_v56  ;;  %1717 = vtanh.f32 %v910_v16  ;;  %v2747_v22 = vpop.f32.mrb[80].mxu0 }
 0x185   :  { %v1019_v0 = vmul.f32 1.442695, %v870_v12  ;;  %v911_v37 = vmul.f32 0.5, %v870_v12  ;;  %v2739_v14 = vadd.f32 %v2588_v32, %v506_v62  ;;  %v1708_v15 = vpop.eup %1707  ;;  %v1475_v18 = vpop.f32.mrb[81].mxu0  ;;  %v2777_v12 = vld [vmem:[%s2900_s2] ss:$0 sm:$0xff] }
 0x186   :  { %v510_v33 = vpop.f32.mrb[56].mxu1  ;;  %v1194_v35 = vsel %vm1153_vm8, %v2678_v26, %v1112_v29  ;;  %v1072_v38 = vadd.f32 1.0, %v1708_v15  ;;  %v1710_v32 = vpop.eup %1709 }
 0x187   :  { %v511_v9 = vadd.f32 %v2436_v11, %v510_v33  ;;  %v512_v20 = vpop.f32.mrb[57].mxu1  ;;  %1235 = vst [vmem:[%s2901_s3 + $0xb0] sm:$0xff] %v1194_v35  ;;  %1719 = vpow2.f32 %v1019_v0  ;;  %v871_v21 = vmin.f32 %v2739_v14, 0.0  ;;  %vm1158_vm13 = vcmp.gt.f32.partialorder %v2739_v14, 0.0 }
 0x188   :  { %v1113_v44 = vmul.f32 %v1710_v32, %v1072_v38  ;;  %1721 = vtanh.f32 %v911_v37 }
 0x189   :  { %v2750_v27 = vadd.f32 %v2603_v63, %v511_v9  ;;  %v1712_v26 = vpop.eup %1711  ;;  %v1021_v8 = vmul.f32 1.442695, %v871_v21  ;;  %v912_v48 = vmul.f32 0.5, %v871_v21 }
 0x18a   :  { %v515_v52 = vpop.f32.mrb[58].mxu1  ;;  %v1073_v31 = vadd.f32 1.0, %v1712_v26  ;;  %v1714_v3 = vpop.eup %1713  ;;  %v1195_v2 = vsel %vm1154_vm9, %v2691_v7, %v1113_v44 }
 0x18b   :  { %v872_v24 = vmin.f32 %v2750_v27, 0.0  ;;  %v516_v55 = vadd.f32 %v2436_v11, %v515_v52  ;;  %v517_v36 = vpop.f32.mrb[59].mxu1  ;;  %1236 = vst [vmem:[%s2901_s3 + $0xb8] sm:$0xff] %v1195_v2  ;;  %1723 = vpow2.f32 %v1021_v8  ;;  %vm1159_vm14 = vcmp.gt.f32.partialorder %v2750_v27, 0.0 }
 0x18c   :  { %v1114_v63 = vmul.f32 %v1714_v3, %v1073_v31  ;;  %1725 = vtanh.f32 %v912_v48 }
 0x18d   :  { %v1023_v58 = vmul.f32 1.442695, %v872_v24  ;;  %v913_v40 = vmul.f32 0.5, %v872_v24  ;;  %v2761_v59 = vadd.f32 %v2612_v50, %v516_v55  ;;  %v1716_v45 = vpop.eup %1715 }
 0x18e   :  { %v520_v60 = vpop.f32.mrb[60].mxu1  ;;  %v1196_v4 = vsel %vm1155_vm10, %v2702_v19, %v1114_v63  ;;  %v1074_v17 = vadd.f32 1.0, %v1716_v45  ;;  %v1718_v10 = vpop.eup %1717 }
 0x18f   :  { %v521_v7 = vadd.f32 %v2436_v11, %v520_v60  ;;  %v522_v46 = vpop.f32.mrb[61].mxu1  ;;  %1237 = vst [vmem:[%s2901_s3 + $0xc0] sm:$0xff] %v1196_v4  ;;  %1727 = vpow2.f32 %v1023_v58  ;;  %v873_v51 = vmin.f32 %v2761_v59, 0.0  ;;  %vm1160_vm15 = vcmp.gt.f32.partialorder %v2761_v59, 0.0 }
 0x190   :  { %v1115_v53 = vmul.f32 %v1718_v10, %v1074_v17  ;;  %1729 = vtanh.f32 %v913_v40 }
 0x191   :  { %v2770_v50 = vadd.f32 %v2627_v1, %v521_v7  ;;  %v1720_v13 = vpop.eup %1719  ;;  %v1025_v19 = vmul.f32 1.442695, %v873_v51  ;;  %v914_v56 = vmul.f32 0.5, %v873_v51 }
 0x192   :  { %v525_v11 = vpop.f32.mrb[62].mxu1  ;;  %v1075_v34 = vadd.f32 1.0, %v1720_v13  ;;  %v1722_v61 = vpop.eup %1721  ;;  %v1197_v25 = vsel %vm1156_vm11, %v2715_v39, %v1115_v53 }
 0x193   :  { %v874_v16 = vmin.f32 %v2770_v50, 0.0  ;;  %v526_v62 = vadd.f32 %v2777_v12, %v525_v11  ;;  %v527_v1 = vpop.f32.mrb[63].mxu1  ;;  %1238 = vst [vmem:[%s2901_s3 + $0xc8] sm:$0xff] %v1197_v25  ;;  %1731 = vpow2.f32 %v1025_v19  ;;  %vm1161_vm0 = vcmp.gt.f32.partialorder %v2770_v50, 0.0 }
 0x194   :  { %v1116_v41 = vmul.f32 %v1722_v61, %v1075_v34  ;;  %1733 = vtanh.f32 %v914_v56 }
 0x195   :  { %v1027_v29 = vmul.f32 1.442695, %v874_v16  ;;  %v915_v0 = vmul.f32 0.5, %v874_v16  ;;  %v2786_v30 = vadd.f32 %v2636_v23, %v526_v62  ;;  %v1724_v33 = vpop.eup %1723 }
 0x196   :  { %v530_v37 = vpop.f32.mrb[64].mxu1  ;;  %v1198_v15 = vsel %vm1157_vm12, %v2726_v49, %v1116_v41  ;;  %v1076_v9 = vadd.f32 1.0, %v1724_v33  ;;  %v1726_v38 = vpop.eup %1725 }
 0x197   :  { %v531_v39 = vadd.f32 %v2777_v12, %v530_v37  ;;  %v532_v35 = vpop.f32.mrb[65].mxu1  ;;  %1239 = vst [vmem:[%s2901_s3 + $0xd0] sm:$0xff] %v1198_v15  ;;  %1735 = vpow2.f32 %v1027_v29  ;;  %v875_v20 = vmin.f32 %v2786_v30, 0.0  ;;  %vm1162_vm1 = vcmp.gt.f32.partialorder %v2786_v30, 0.0 }
 0x198   :  { %v1117_v32 = vmul.f32 %v1726_v38, %v1076_v9  ;;  %1737 = vtanh.f32 %v915_v0 }
 0x199   :  { %v2795_v23 = vadd.f32 %v2651_v5, %v531_v39  ;;  %v1728_v21 = vpop.eup %1727  ;;  %v1029_v49 = vmul.f32 1.442695, %v875_v20  ;;  %v916_v44 = vmul.f32 0.5, %v875_v20 }
 0x19a   :  { %v535_v18 = vpop.f32.mrb[66].mxu1  ;;  %v1077_v26 = vadd.f32 1.0, %v1728_v21  ;;  %v1730_v48 = vpop.eup %1729  ;;  %v1199_v24 = vsel %vm1158_vm13, %v2739_v14, %v1117_v32 }
 0x19b   :  { %v876_v8 = vmin.f32 %v2795_v23, 0.0  ;;  %v536_v52 = vadd.f32 %v2777_v12, %v535_v18  ;;  %v537_v31 = vpop.f32.mrb[67].mxu1  ;;  %1240 = vst [vmem:[%s2901_s3 + $0xd8] sm:$0xff] %v1199_v24  ;;  %1739 = vpow2.f32 %v1029_v49  ;;  %vm1163_vm2 = vcmp.gt.f32.partialorder %v2795_v23, 0.0 }
 0x19c   :  { %v1118_v5 = vmul.f32 %v1730_v48, %v1077_v26  ;;  %1741 = vtanh.f32 %v916_v44 }
 0x19d   :  { %v1031_v55 = vmul.f32 1.442695, %v876_v8  ;;  %v917_v36 = vmul.f32 0.5, %v876_v8  ;;  %v2806_v3 = vadd.f32 %v2660_v54, %v536_v52  ;;  %v1732_v63 = vpop.eup %1731 }
 0x19e   :  { %v540_v2 = vpop.f32.mrb[68].mxu1  ;;  %v1200_v58 = vsel %vm1159_vm14, %v2750_v27, %v1118_v5  ;;  %v1078_v60 = vadd.f32 1.0, %v1732_v63  ;;  %v1734_v4 = vpop.eup %1733 }
 0x19f   :  { %v541_v14 = vadd.f32 %v2777_v12, %v540_v2  ;;  %v542_v40 = vpop.f32.mrb[69].mxu1  ;;  %1241 = vst [vmem:[%s2901_s3 + $0xe0] sm:$0xff] %v1200_v58  ;;  %1743 = vpow2.f32 %v1031_v55  ;;  %v877_v45 = vmin.f32 %v2806_v3, 0.0  ;;  %vm1164_vm3 = vcmp.gt.f32.partialorder %v2806_v3, 0.0 }
 0x1a0   :  { %v1119_v46 = vmul.f32 %v1734_v4, %v1078_v60  ;;  %1745 = vtanh.f32 %v917_v36 }
 0x1a1   :  { %v2815_v54 = vadd.f32 %v2675_v42, %v541_v14  ;;  %v1736_v7 = vpop.eup %1735  ;;  %v1033_v27 = vmul.f32 1.442695, %v877_v45  ;;  %v918_v10 = vmul.f32 0.5, %v877_v45 }
 0x1a2   :  { %v545_v17 = vpop.f32.mrb[70].mxu1  ;;  %v1079_v51 = vadd.f32 1.0, %v1736_v7  ;;  %v1738_v11 = vpop.eup %1737  ;;  %v1201_v34 = vsel %vm1160_vm15, %v2761_v59, %v1119_v46 }
 0x1a3   :  { %v878_v13 = vmin.f32 %v2815_v54, 0.0  ;;  %v546_v53 = vadd.f32 %v2777_v12, %v545_v17  ;;  %v547_v19 = vpop.f32.mrb[71].mxu1  ;;  %1242 = vst [vmem:[%s2901_s3 + $0xe8] sm:$0xff] %v1201_v34  ;;  %1747 = vpow2.f32 %v1033_v27  ;;  %vm1165_vm4 = vcmp.gt.f32.partialorder %v2815_v54, 0.0 }
 0x1a4   :  { %v1120_v42 = vmul.f32 %v1738_v11, %v1079_v51  ;;  %1749 = vtanh.f32 %v918_v10 }
 0x1a5   :  { %v1035_v56 = vmul.f32 1.442695, %v878_v13  ;;  %v919_v16 = vmul.f32 0.5, %v878_v13  ;;  %v2826_v62 = vadd.f32 %v2684_v28, %v546_v53  ;;  %v1740_v61 = vpop.eup %1739 }
 0x1a6   :  { %v550_v1 = vpop.f32.mrb[72].mxu1  ;;  %v1202_v25 = vsel %vm1161_vm0, %v2770_v50, %v1120_v42  ;;  %v1080_v29 = vadd.f32 1.0, %v1740_v61  ;;  %v1742_v37 = vpop.eup %1741 }
 0x1a7   :  { %v551_v59 = vadd.f32 %v2777_v12, %v550_v1  ;;  %v552_v41 = vpop.f32.mrb[73].mxu1  ;;  %1243 = vst [vmem:[%s2901_s3 + $0xf0] sm:$0xff] %v1202_v25  ;;  %1751 = vpow2.f32 %v1035_v56  ;;  %v879_v0 = vmin.f32 %v2826_v62, 0.0  ;;  %vm1166_vm5 = vcmp.gt.f32.partialorder %v2826_v62, 0.0 }
 0x1a8   :  { %v1121_v15 = vmul.f32 %v1742_v37, %v1080_v29  ;;  %1753 = vtanh.f32 %v919_v16 }
 0x1a9   :  { %v2835_v28 = vadd.f32 %v2699_v43, %v551_v59  ;;  %v1744_v33 = vpop.eup %1743  ;;  %v1037_v50 = vmul.f32 1.442695, %v879_v0  ;;  %v920_v9 = vmul.f32 0.5, %v879_v0 }
 0x1aa   :  { %v555_v39 = vpop.f32.mrb[74].mxu1  ;;  %v1081_v35 = vadd.f32 1.0, %v1744_v33  ;;  %v1746_v32 = vpop.eup %1745  ;;  %v1203_v49 = vsel %vm1162_vm1, %v2786_v30, %v1121_v15 }
 0x1ab   :  { %v880_v20 = vmin.f32 %v2835_v28, 0.0  ;;  %v556_v38 = vadd.f32 %v2777_v12, %v555_v39  ;;  %v557_v21 = vpop.f32.mrb[75].mxu1  ;;  %1244 = vst [vmem:[%s2901_s3 + $0xf8] sm:$0xff] %v1203_v49  ;;  %1755 = vpow2.f32 %v1037_v50  ;;  %vm1167_vm6 = vcmp.gt.f32.partialorder %v2835_v28, 0.0 }
 0x1ac   :  { %v1122_v43 = vmul.f32 %v1746_v32, %v1081_v35  ;;  %1757 = vtanh.f32 %v920_v9 }
 0x1ad   :  { %v1039_v18 = vmul.f32 1.442695, %v880_v20  ;;  %v921_v26 = vmul.f32 0.5, %v880_v20  ;;  %v2846_v44 = vadd.f32 %v2708_v57, %v556_v38  ;;  %v1748_v52 = vpop.eup %1747 }
 0x1ae   :  { %v560_v8 = vpop.f32.mrb[76].mxu1  ;;  %v1204_v31 = vsel %vm1163_vm2, %v2795_v23, %v1122_v43  ;;  %v1082_v24 = vadd.f32 1.0, %v1748_v52  ;;  %v1750_v55 = vpop.eup %1749 }
 0x1af   :  { %v561_v30 = vadd.f32 %v2777_v12, %v560_v8  ;;  %v562_v48 = vpop.f32.mrb[77].mxu1  ;;  %1245 = vst [vmem:[%s2901_s3 + $0x100] sm:$0xff] %v1204_v31  ;;  %1759 = vpow2.f32 %v1039_v18  ;;  %v881_v5 = vmin.f32 %v2846_v44, 0.0  ;;  %vm1168_vm7 = vcmp.gt.f32.partialorder %v2846_v44, 0.0 }
 0x1b0   :  { %v1123_v2 = vmul.f32 %v1750_v55, %v1082_v24  ;;  %1761 = vtanh.f32 %v921_v26 }
 0x1b1   :  { %v2855_v57 = vadd.f32 %v2723_v47, %v561_v30  ;;  %v1752_v36 = vpop.eup %1751  ;;  %v1041_v23 = vmul.f32 1.442695, %v881_v5  ;;  %v922_v14 = vmul.f32 0.5, %v881_v5 }
 0x1b2   :  { %v565_v63 = vpop.f32.mrb[78].mxu1  ;;  %v1083_v58 = vadd.f32 1.0, %v1752_v36  ;;  %v1754_v4 = vpop.eup %1753  ;;  %v1205_v7 = vsel %vm1164_vm3, %v2806_v3, %v1123_v2 }
 0x1b3   :  { %v882_v40 = vmin.f32 %v2855_v57, 0.0  ;;  %v566_v60 = vadd.f32 %v2777_v12, %v565_v63  ;;  %v567_v45 = vpop.f32.mrb[79].mxu1  ;;  %1246 = vst [vmem:[%s2901_s3 + $0x108] sm:$0xff] %v1205_v7  ;;  %1763 = vpow2.f32 %v1041_v23  ;;  %vm1169_vm8 = vcmp.gt.f32.partialorder %v2855_v57, 0.0 }
 0x1b4   :  { %v1124_v47 = vmul.f32 %v1754_v4, %v1083_v58  ;;  %1765 = vtanh.f32 %v922_v14 }
 0x1b5   :  { %v1043_v46 = vmul.f32 1.442695, %v882_v40  ;;  %v923_v27 = vmul.f32 0.5, %v882_v40  ;;  %v836_v17 = vadd.f32 %v2732_v6, %v566_v60  ;;  %v1756_v10 = vpop.eup %1755 }
 0x1b6   :  { %v570_v51 = vpop.f32.mrb[80].mxu1  ;;  %v1206_v13 = vsel %vm1165_vm4, %v2815_v54, %v1124_v47  ;;  %v1084_v19 = vadd.f32 1.0, %v1756_v10  ;;  %v1758_v34 = vpop.eup %1757 }
 0x1b7   :  { %v571_v53 = vadd.f32 %v2777_v12, %v570_v51  ;;  %v572_v3 = vpop.f32.mrb[81].mxu1  ;;  %1247 = vst [vmem:[%s2901_s3 + $0x110] sm:$0xff] %v1206_v13  ;;  %1767 = vpow2.f32 %v1043_v46  ;;  %v883_v11 = vmin.f32 %v836_v17, 0.0  ;;  %vm1170_vm9 = vcmp.gt.f32.partialorder %v836_v17, 0.0 }
 0x1b8   :  { %v1125_v6 = vmul.f32 %v1758_v34, %v1084_v19  ;;  %1769 = vtanh.f32 %v923_v27 }
 0x1b9   :  { %v841_v42 = vadd.f32 %v2747_v22, %v571_v53  ;;  %v1760_v56 = vpop.eup %1759  ;;  %v1045_v16 = vmul.f32 1.442695, %v883_v11  ;;  %v924_v1 = vmul.f32 0.5, %v883_v11 }
 0x1ba   :  { %v1085_v54 = vadd.f32 1.0, %v1760_v56  ;;  %v1762_v61 = vpop.eup %1761  ;;  %v1207_v25 = vsel %vm1166_vm5, %v2826_v62, %v1125_v6 }
 0x1bb   :  { %v884_v12 = vmin.f32 %v841_v42, 0.0  ;;  %1248 = vst [vmem:[%s2901_s3 + $0x118] sm:$0xff] %v1207_v25  ;;  %1771 = vpow2.f32 %v1045_v16  ;;  %vm1171_vm10 = vcmp.gt.f32.partialorder %v841_v42, 0.0 }
 0x1bc   :  { %v1126_v59 = vmul.f32 %v1762_v61, %v1085_v54  ;;  %1773 = vtanh.f32 %v924_v1 }
 0x1bd   :  { %v1047_v41 = vmul.f32 1.442695, %v884_v12  ;;  %v925_v22 = vmul.f32 0.5, %v884_v12  ;;  %v1764_v29 = vpop.eup %1763 }
 0x1be   :  { %v1208_v0 = vsel %vm1167_vm6, %v2835_v28, %v1126_v59  ;;  %v1086_v37 = vadd.f32 1.0, %v1764_v29  ;;  %v1766_v62 = vpop.eup %1765 }
 0x1bf   :  { %1249 = vst [vmem:[%s2901_s3 + $0x120] sm:$0xff] %v1208_v0  ;;  %1775 = vpow2.f32 %v1047_v41 }
 0x1c0   :  { %v1127_v15 = vmul.f32 %v1766_v62, %v1086_v37  ;;  %1777 = vtanh.f32 %v925_v22 }
 0x1c1   :  { %v1768_v33 = vpop.eup %1767 }
 0x1c2   :  { %v1087_v50 = vadd.f32 1.0, %v1768_v33  ;;  %v1770_v39 = vpop.eup %1769  ;;  %v1209_v35 = vsel %vm1168_vm7, %v2846_v44, %v1127_v15 }
 0x1c3   :  { %1250 = vst [vmem:[%s2901_s3 + $0x128] sm:$0xff] %v1209_v35 }
 0x1c4   :  { %v1128_v28 = vmul.f32 %v1770_v39, %v1087_v50 }
 0x1c5   :  { %v1772_v9 = vpop.eup %1771 }
 0x1c6   :  { %v1210_v20 = vsel %vm1169_vm8, %v2855_v57, %v1128_v28  ;;  %v1088_v38 = vadd.f32 1.0, %v1772_v9  ;;  %v1774_v21 = vpop.eup %1773 }
 0x1c7   :  { %1251 = vst [vmem:[%s2901_s3 + $0x130] sm:$0xff] %v1210_v20 }
 0x1c8   :  { %v1129_v49 = vmul.f32 %v1774_v21, %v1088_v38 }
 0x1c9   :  { %v1776_v32 = vpop.eup %1775 }
 0x1ca   :  { %v1089_v43 = vadd.f32 1.0, %v1776_v32  ;;  %v1778_v18 = vpop.eup %1777  ;;  %v1211_v26 = vsel %vm1170_vm9, %v836_v17, %v1129_v49 }
 0x1cb   :  { %1252 = vst [vmem:[%s2901_s3 + $0x138] sm:$0xff] %v1211_v26 }
 0x1cc   :  { %v1130_v44 = vmul.f32 %v1778_v18, %v1089_v43 }
 0x1ce   :  { %v1212_v8 = vsel %vm1171_vm10, %v841_v42, %v1130_v44 }
 0x1cf   :  { %1253 = vst [vmem:[%s2901_s3 + $0x140] sm:$0xf] %v1212_v8 }

// kernel: actor_critic_cnn_forward.6
= control target key start
LH: loop header
LB: loop body
LE: loop exit
PB: predicated region body
PF: predicated region fallthrough
CT: control target
= control target key end

     0   :  { %vm81_vm0 = vcmask 261120   ;;  %s860_s1 = inlined_call_operand.vmem [shape: f32[288,128], index: 1, kind: input, shape index: {}]   ;;  %s861_s0 = inlined_call_operand.vmem [shape: f32[64,288], index: 0, kind: input, shape index: {}]   ;;  %s862_s2 = inlined_call_operand.vmem [shape: f32[1,128], index: 2, kind: input, shape index: {}]   ;;  %s863_s3 = inlined_call_operand.vmem [shape: f32[64,128], index: 3, kind: output, shape index: {}]  }
   0x1   :  { %v54_v0 = vld [vmem:[%s860_s1 + $0x80] sm:$0xff]  ;;  %v55_v1 = vld [vmem:[%s860_s1 + $0x88] sm:$0xff]  ;;  %v56_v5 = vld [vmem:[%s860_s1 + $0x90] sm:$0xff] }
   0x2   :  { %v38_v2 = vld [vmem:[%s860_s1] sm:$0xff]  ;;  %v497_v3 = vpack.c.bf16 %v55_v1, %v54_v0  ;;  %v39_v4 = vld [vmem:[%s860_s1 + $0x8] sm:$0xff]  ;;  %v57_v6 = vld [vmem:[%s860_s1 + $0x98] sm:$0xff] }
   0x3   :  { %v499_v7 = vpack.c.bf16 %v39_v4, %v38_v2  ;;  %v501_v8 = vpack.c.bf16 %v57_v6, %v56_v5  ;;  %v40_v9 = vld [vmem:[%s860_s1 + $0x10] sm:$0xff]  ;;  %v41_v10 = vld [vmem:[%s860_s1 + $0x18] sm:$0xff]  ;;  %v58_v11 = vld [vmem:[%s860_s1 + $0xa0] sm:$0xff] }
   0x4   :  { %498 = vmatprep.subr.bf16.mxu0 %v497_v3  ;;  %537 = vmatprep.subr.bf16.mxu1 %v497_v3  ;;  %v59_v12 = vld [vmem:[%s860_s1 + $0xa8] sm:$0xff]  ;;  %v503_v13 = vpack.c.bf16 %v41_v10, %v40_v9  ;;  %v42_v15 = vld [vmem:[%s860_s1 + $0x20] sm:$0xff]  ;;  %v60_v17 = vld [vmem:[%s860_s1 + $0xb0] sm:$0xff] }
   0x5   :  { %500 = vmatpush3.bf16.msra.mxu0 %v499_v7  ;;  %545 = vmatpush3.bf16.msra.mxu1 %v499_v7  ;;  %v505_v14 = vpack.c.bf16 %v59_v12, %v58_v11  ;;  %v43_v16 = vld [vmem:[%s860_s1 + $0x28] sm:$0xff]  ;;  %v61_v18 = vld [vmem:[%s860_s1 + $0xb8] sm:$0xff]  ;;  %v44_v21 = vld [vmem:[%s860_s1 + $0x30] sm:$0xff] }
   0x6   :  { %502 = vmatprep.subr.bf16.mxu0 %v501_v8  ;;  %538 = vmatprep.subr.bf16.mxu1 %v501_v8  ;;  %v507_v19 = vpack.c.bf16 %v43_v16, %v42_v15  ;;  %v509_v20 = vpack.c.bf16 %v61_v18, %v60_v17  ;;  %v45_v22 = vld [vmem:[%s860_s1 + $0x38] sm:$0xff]  ;;  %v62_v23 = vld [vmem:[%s860_s1 + $0xc0] sm:$0xff]  ;;  %v63_v24 = vld [vmem:[%s860_s1 + $0xc8] sm:$0xff] }
   0x7   :  { %v15_v25 = vld [vmem:[%s861_s0 + $0x8] sm:$0xff]  ;;  %v33_v26 = vld [vmem:[%s861_s0 + $0x98] sm:$0xff]  ;;  %v511_v27 = vpack.c.bf16 %v45_v22, %v44_v21  ;;  %v513_v28 = vpack.c.bf16 %v63_v24, %v62_v23  ;;  %v46_v29 = vld [vmem:[%s860_s1 + $0x40] sm:$0xff] }
   0x8   :  { %170 = vmatprep.mubr.f32.mxu0 %v15_v25  ;;  %v47_v30 = vld [vmem:[%s860_s1 + $0x48] sm:$0xff]  ;;  %v64_v31 = vld [vmem:[%s860_s1 + $0xd0] sm:$0xff]  ;;  %v65_v32 = vld [vmem:[%s860_s1 + $0xd8] sm:$0xff]  ;;  %200 = vmatprep.mubr.f32.mxu1 %v33_v26 }
   0x9   :  { %504 = vmatpush3.bf16.msra.mxu0 %v503_v13  ;;  %546 = vmatpush3.bf16.msra.mxu1 %v503_v13  ;;  %v515_v33 = vpack.c.bf16 %v47_v30, %v46_v29  ;;  %v517_v34 = vpack.c.bf16 %v65_v32, %v64_v31  ;;  %v48_v35 = vld [vmem:[%s860_s1 + $0x50] sm:$0xff]  ;;  %v49_v36 = vld [vmem:[%s860_s1 + $0x58] sm:$0xff]  ;;  %v66_v37 = vld [vmem:[%s860_s1 + $0xe0] sm:$0xff] }
   0xa   :  { %506 = vmatprep.subr.bf16.mxu0 %v505_v14  ;;  %539 = vmatprep.subr.bf16.mxu1 %v505_v14  ;;  %v67_v38 = vld [vmem:[%s860_s1 + $0xe8] sm:$0xff]  ;;  %v519_v39 = vpack.c.bf16 %v49_v36, %v48_v35  ;;  %v50_v41 = vld [vmem:[%s860_s1 + $0x60] sm:$0xff]  ;;  %v68_v43 = vld [vmem:[%s860_s1 + $0xf0] sm:$0xff] }
   0xb   :  { %v521_v40 = vpack.c.bf16 %v67_v38, %v66_v37  ;;  %v51_v42 = vld [vmem:[%s860_s1 + $0x68] sm:$0xff]  ;;  %v69_v44 = vld [vmem:[%s860_s1 + $0xf8] sm:$0xff]  ;;  %v52_v47 = vld [vmem:[%s860_s1 + $0x70] sm:$0xff] }
   0xc   :  { %v523_v45 = vpack.c.bf16 %v51_v42, %v50_v41  ;;  %v525_v46 = vpack.c.bf16 %v69_v44, %v68_v43  ;;  %v53_v48 = vld [vmem:[%s860_s1 + $0x78] sm:$0xff]  ;;  %v70_v49 = vld [vmem:[%s860_s1 + $0x100] sm:$0xff]  ;;  %v71_v50 = vld [vmem:[%s860_s1 + $0x108] sm:$0xff] }
   0xd   :  { %508 = vmatpush3.bf16.msra.mxu0 %v507_v19  ;;  %547 = vmatpush3.bf16.msra.mxu1 %v507_v19  ;;  %v527_v51 = vpack.c.bf16 %v53_v48, %v52_v47  ;;  %v529_v52 = vpack.c.bf16 %v71_v50, %v70_v49  ;;  %v72_v53 = vld [vmem:[%s860_s1 + $0x110] sm:$0xff]  ;;  %v73_v54 = vld [vmem:[%s860_s1 + $0x118] sm:$0xff]  ;;  %v14_v55 = vld [vmem:[%s861_s0] sm:$0xff] }
   0xe   :  { %510 = vmatprep.subr.bf16.mxu0 %v509_v20  ;;  %540 = vmatprep.subr.bf16.mxu1 %v509_v20  ;;  %v32_v56 = vld [vmem:[%s861_s0 + $0x90] sm:$0xff]  ;;  %v18_v57 = vld [vmem:[%s861_s0 + $0x20] sm:$0xff]  ;;  %v533_v58 = vpack.c.bf16 %v73_v54, %v72_v53  ;;  %v17_v60 = vld [vmem:[%s861_s0 + $0x18] sm:$0xff] }
   0xf   :  { %v36_v59 = vld [vmem:[%s861_s0 + $0xb0] sm:$0xff]  ;;  %v35_v61 = vld [vmem:[%s861_s0 + $0xa8] sm:$0xff]  ;;  %v21_v62 = vld [vmem:[%s861_s0 + $0x38] sm:$0xff] }
  0x10   :  { %v16_v63 = vld [vmem:[%s861_s0 + $0x10] sm:$0xff]  ;;  %v19_v1 = vld [vmem:[%s861_s0 + $0x28] sm:$0xff]  ;;  %v22_v3 = vld [vmem:[%s861_s0 + $0x40] sm:$0xff] }
  0x11   :  { %512 = vmatpush3.bf16.msra.mxu0 %v511_v27  ;;  %548 = vmatpush3.bf16.msra.mxu1 %v511_v27  ;;  %v20_v0 = vld [vmem:[%s861_s0 + $0x30] sm:$0xff]  ;;  %v23_v4 = vld [vmem:[%s861_s0 + $0x48] sm:$0xff]  ;;  %v25_v5 = vld [vmem:[%s861_s0 + $0x58] sm:$0xff] }
  0x12   :  { %514 = vmatprep.subr.bf16.mxu0 %v513_v28  ;;  %541 = vmatprep.subr.bf16.mxu1 %v513_v28  ;;  %v24_v2 = vld [vmem:[%s861_s0 + $0x50] sm:$0xff]  ;;  %v27_v6 = vld [vmem:[%s861_s0 + $0x68] sm:$0xff]  ;;  %v26_v8 = vld [vmem:[%s861_s0 + $0x60] sm:$0xff] }
  0x13   :  { %v28_v7 = vld [vmem:[%s861_s0 + $0x70] sm:$0xff]  ;;  %v31_v9 = vld [vmem:[%s861_s0 + $0x88] sm:$0xff]  ;;  %v30_v10 = vld [vmem:[%s861_s0 + $0x80] sm:$0xff] }
  0x14   :  { %v34_v11 = vld [vmem:[%s861_s0 + $0xa0] sm:$0xff]  ;;  %v29_v12 = vld [vmem:[%s861_s0 + $0x78] sm:$0xff] }
  0x15   :  { %516 = vmatpush3.bf16.msra.mxu0 %v515_v33  ;;  %549 = vmatpush3.bf16.msra.mxu1 %v515_v33  ;;  %v37_v13 = vld [vmem:[%s861_s0 + $0xb8] sm:$0xff]  ;;  %v400_v24 = vld [vmem:[%s862_s2] ss:$0 sm:$0xff] }
  0x16   :  { %518 = vmatprep.subr.bf16.mxu0 %v517_v34  ;;  %542 = vmatprep.subr.bf16.mxu1 %v517_v34 }
  0x19   :  { %520 = vmatpush3.bf16.msra.mxu0 %v519_v39  ;;  %550 = vmatpush3.bf16.msra.mxu1 %v519_v39 }
  0x1a   :  { %522 = vmatprep.subr.bf16.mxu0 %v521_v40  ;;  %543 = vmatprep.subr.bf16.mxu1 %v521_v40 }
  0x1d   :  { %524 = vmatpush3.bf16.msra.mxu0 %v523_v45  ;;  %551 = vmatpush3.bf16.msra.mxu1 %v523_v45 }
  0x1e   :  { %526 = vmatprep.subr.bf16.mxu0 %v525_v46  ;;  %544 = vmatprep.subr.bf16.mxu1 %v525_v46 }
  0x21   :  { %528 = vmatpush3.bf16.msra.mxu0 %v527_v51  ;;  %552 = vmatpush3.bf16.msra.mxu1 %v527_v51 }
  0x22   :  { %530 = vmatprep.subr.bf16.mxu1 %v529_v52 }
  0x24   :  { %171 = vmatmul.mubr.f32.vlgmr.msra.gmra.mrb[0].mxu0 %v14_v55  ;;  %201 = vmatmul.mubr.f32.vlgmr.msra.gmra.mrb[0].mxu1 %v32_v56 }
  0x25   :  { %532 = vmatpush3.bf16.msra.mxu1 %v529_v52  ;;  %175 = vmatprep.mubr.f32.mxu0 %v18_v57 }
  0x26   :  { %205 = vmatprep.mubr.f32.mxu1 %v36_v59  ;;  %534 = vmatprep.subr.bf16.mxu1 %v533_v58 }
  0x28   :  { %176 = vmatmul.mubr.f32.gmra.mrb[2].mxu0 %v17_v60  ;;  %206 = vmatmul.mubr.f32.gmra.mrb[2].mxu1 %v35_v61 }
  0x29   :  { %536 = vmatpush3.bf16.msra.mxu1 %v533_v58  ;;  %180 = vmatprep.mubr.f32.mxu0 %v21_v62 }
  0x2a   :  { %485 = vmatprep.mubr.msk.f32.mxu1 %vm81_vm0, %v16_v63 }
  0x2c   :  { %181 = vmatmul.mubr.f32.gmra.mrb[4].mxu0 %v20_v0  ;;  %486 = vmatmul.mubr.msk.f32.vlgmr.msra.gmra.mrb[4].mxu1 %vm81_vm0, %v19_v1 }
  0x2d   :  { %185 = vmatprep.mubr.f32.mxu0 %v24_v2  ;;  %488 = vmatprep.mubr.msk.f32.mxu1 %vm81_vm0, %v22_v3 }
  0x30   :  { %186 = vmatmul.mubr.f32.gmra.mrb[6].mxu0 %v23_v4  ;;  %489 = vmatmul.mubr.msk.f32.gmra.mrb[6].mxu1 %vm81_vm0, %v25_v5 }
  0x31   :  { %190 = vmatprep.mubr.f32.mxu0 %v27_v6  ;;  %491 = vmatprep.mubr.msk.f32.mxu1 %vm81_vm0, %v28_v7 }
  0x34   :  { %191 = vmatmul.mubr.f32.gmra.mrb[8].mxu0 %v26_v8  ;;  %492 = vmatmul.mubr.msk.f32.gmra.mrb[8].mxu1 %vm81_vm0, %v31_v9 }
  0x35   :  { %195 = vmatprep.mubr.f32.mxu0 %v30_v10  ;;  %494 = vmatprep.mubr.msk.f32.mxu1 %vm81_vm0, %v34_v11 }
  0x38   :  { %196 = vmatmul.mubr.f32.gmra.mrb[10].mxu0 %v29_v12  ;;  %495 = vmatmul.mubr.msk.f32.gmra.mrb[10].mxu1 %vm81_vm0, %v37_v13 }
  0xf7   :  { %v441_v14 = vpop.f32.mrb[0].mxu0  ;;  %v459_v15 = vpop.f32.mrb[0].mxu1 }
  0xf8   :  { %v442_v16 = vpop.f32.mrb[1].mxu0  ;;  %v460_v17 = vpop.f32.mrb[1].mxu1 }
  0xf9   :  { %v443_v18 = vadd.f32 %v442_v16, %v441_v14  ;;  %v461_v19 = vadd.f32 %v460_v17, %v459_v15 }
  0xfb   :  { %v444_v20 = vpop.f32.mrb[2].mxu0  ;;  %v462_v21 = vpop.f32.mrb[2].mxu1  ;;  %v173_v30 = vadd.f32 %v443_v18, %v400_v24  ;;  %v203_v63 = vadd.f32 %v461_v19, %v400_v24 }
  0xfc   :  { %v445_v22 = vpop.f32.mrb[3].mxu0  ;;  %v463_v23 = vpop.f32.mrb[3].mxu1 }
  0xfd   :  { %v446_v25 = vadd.f32 %v445_v22, %v444_v20  ;;  %v464_v26 = vadd.f32 %v463_v23, %v462_v21 }
  0xff   :  { %v447_v27 = vpop.f32.mrb[4].mxu0  ;;  %v178_v28 = vadd.f32 %v446_v25, %v400_v24  ;;  %v487_v29 = vpop.f32.mrb[4].mxu1  ;;  %v208_v58 = vadd.f32 %v464_v26, %v400_v24 }
 0x100   :  { %v448_v31 = vpop.f32.mrb[5].mxu0  ;;  %v277_v32 = vpop.f32.mrb[5].mxu1 }
 0x101   :  { %v796_v33 = vadd.f32 %v487_v29, %v178_v28  ;;  %v449_v34 = vadd.f32 %v448_v31, %v447_v27  ;;  %v798_v35 = vadd.f32 %v277_v32, %v173_v30 }
 0x103   :  { %v317_v36 = vmin.f32 %v796_v33, 0.0  ;;  %v316_v37 = vmin.f32 %v798_v35, 0.0  ;;  %v450_v38 = vpop.f32.mrb[6].mxu0  ;;  %v490_v39 = vpop.f32.mrb[6].mxu1  ;;  %v183_v41 = vadd.f32 %v449_v34, %v400_v24  ;;  %vm373_vm1 = vcmp.gt.f32.partialorder %v796_v33, 0.0 }
 0x104   :  { %v451_v40 = vpop.f32.mrb[7].mxu0  ;;  %v287_v42 = vpop.f32.mrb[7].mxu1  ;;  %vm372_vm2 = vcmp.gt.f32.partialorder %v798_v35, 0.0 }
 0x105   :  { %v325_v43 = vmul.f32 0.5, %v317_v36  ;;  %v342_v44 = vmul.f32 1.442695, %v317_v36  ;;  %v340_v45 = vmul.f32 1.442695, %v316_v37  ;;  %v452_v46 = vadd.f32 %v451_v40, %v450_v38 }
 0x106   :  { %v802_v47 = vadd.f32 %v287_v42, %v183_v41  ;;  %v324_v50 = vmul.f32 0.5, %v316_v37 }
 0x107   :  { %v453_v48 = vpop.f32.mrb[8].mxu0  ;;  %v493_v49 = vpop.f32.mrb[8].mxu1  ;;  %553 = vpow2.f32 %v342_v44  ;;  %v188_v51 = vadd.f32 %v452_v46, %v400_v24 }
 0x108   :  { %v318_v52 = vmin.f32 %v802_v47, 0.0  ;;  %v454_v53 = vpop.f32.mrb[9].mxu0  ;;  %v297_v54 = vpop.f32.mrb[9].mxu1  ;;  %555 = vtanh.f32 %v325_v43  ;;  %vm374_vm3 = vcmp.gt.f32.partialorder %v802_v47, 0.0 }
 0x109   :  { %v455_v55 = vadd.f32 %v454_v53, %v453_v48  ;;  %557 = vpow2.f32 %v340_v45  ;;  %v805_v56 = vadd.f32 %v490_v39, %v188_v51 }
 0x10a   :  { %v344_v57 = vmul.f32 1.442695, %v318_v52  ;;  %v326_v59 = vmul.f32 0.5, %v318_v52  ;;  %559 = vtanh.f32 %v324_v50 }
 0x10b   :  { %v193_v60 = vadd.f32 %v455_v55, %v400_v24  ;;  %v456_v61 = vpop.f32.mrb[10].mxu0  ;;  %v496_v62 = vpop.f32.mrb[10].mxu1  ;;  %v319_v0 = vmin.f32 %v805_v56, 0.0  ;;  %vm375_vm4 = vcmp.gt.f32.partialorder %v805_v56, 0.0 }
 0x10c   :  { %v808_v1 = vadd.f32 %v496_v62, %v208_v58  ;;  %v457_v2 = vpop.f32.mrb[11].mxu0  ;;  %v307_v3 = vpop.f32.mrb[11].mxu1  ;;  %561 = vpow2.f32 %v344_v57 }
 0x10d   :  { %v810_v4 = vadd.f32 %v297_v54, %v193_v60  ;;  %v458_v5 = vadd.f32 %v457_v2, %v456_v61  ;;  %v812_v6 = vadd.f32 %v307_v3, %v203_v63  ;;  %v346_v7 = vmul.f32 1.442695, %v319_v0 }
 0x10e   :  { %v323_v8 = vmin.f32 %v808_v1, 0.0  ;;  %v327_v9 = vmul.f32 0.5, %v319_v0  ;;  %563 = vtanh.f32 %v326_v59  ;;  %vm379_vm6 = vcmp.gt.f32.partialorder %v808_v1, 0.0 }
 0x10f   :  { %v320_v10 = vmin.f32 %v810_v4, 0.0  ;;  %v198_v11 = vadd.f32 %v458_v5, %v400_v24  ;;  %v322_v12 = vmin.f32 %v812_v6, 0.0  ;;  %565 = vpow2.f32 %v346_v7 }
 0x110   :  { %v354_v14 = vmul.f32 1.442695, %v323_v8  ;;  %567 = vtanh.f32 %v327_v9  ;;  %v331_v20 = vmul.f32 0.5, %v323_v8  ;;  %vm376_vm5 = vcmp.gt.f32.partialorder %v810_v4, 0.0 }
 0x111   :  { %v348_v13 = vmul.f32 1.442695, %v320_v10  ;;  %v817_v15 = vadd.f32 %v493_v49, %v198_v11  ;;  %v554_v16 = vpop.eup %553  ;;  %v328_v17 = vmul.f32 0.5, %v320_v10  ;;  %v352_v24 = vmul.f32 1.442695, %v322_v12 }
 0x112   :  { %v556_v18 = vpop.eup %555  ;;  %v357_v19 = vadd.f32 1.0, %v554_v16  ;;  %v330_v32 = vmul.f32 0.5, %v322_v12  ;;  %vm378_vm8 = vcmp.gt.f32.partialorder %v812_v6, 0.0 }
 0x113   :  { %v321_v21 = vmin.f32 %v817_v15, 0.0  ;;  %v558_v22 = vpop.eup %557  ;;  %569 = vpow2.f32 %v348_v13  ;;  %vm377_vm7 = vcmp.gt.f32.partialorder %v817_v15, 0.0 }
 0x114   :  { %v365_v23 = vmul.f32 %v556_v18, %v357_v19  ;;  %v356_v25 = vadd.f32 1.0, %v558_v22  ;;  %571 = vpow2.f32 %v354_v14  ;;  %v560_v26 = vpop.eup %559 }
 0x115   :  { %573 = vtanh.f32 %v328_v17  ;;  %v329_v27 = vmul.f32 0.5, %v321_v21  ;;  %v350_v28 = vmul.f32 1.442695, %v321_v21 }
 0x116   :  { %v562_v29 = vpop.eup %561  ;;  %v381_v30 = vsel %vm373_vm1, %v796_v33, %v365_v23  ;;  %v364_v31 = vmul.f32 %v560_v26, %v356_v25  ;;  %575 = vtanh.f32 %v331_v20 }
 0x117   :  { %389 = vst [vmem:[%s863_s3 + $0x8] sm:$0xff] %v381_v30  ;;  %v358_v34 = vadd.f32 1.0, %v562_v29  ;;  %577 = vpow2.f32 %v350_v28 }
 0x118   :  { %v564_v36 = vpop.eup %563  ;;  %v380_v37 = vsel %vm372_vm2, %v798_v35, %v364_v31  ;;  %579 = vpow2.f32 %v352_v24 }
 0x119   :  { %388 = vst [vmem:[%s863_s3] sm:$0xff] %v380_v37  ;;  %v366_v33 = vmul.f32 %v564_v36, %v358_v34  ;;  %581 = vtanh.f32 %v329_v27  ;;  %v566_v38 = vpop.eup %565 }
 0x11a   :  { %583 = vtanh.f32 %v330_v32  ;;  %v359_v39 = vadd.f32 1.0, %v566_v38  ;;  %v568_v41 = vpop.eup %567 }
 0x11b   :  { %v382_v40 = vsel %vm374_vm3, %v802_v47, %v366_v33 }
 0x11c   :  { %390 = vst [vmem:[%s863_s3 + $0x10] sm:$0xff] %v382_v40  ;;  %v367_v42 = vmul.f32 %v568_v41, %v359_v39 }
 0x11d   :  { %v570_v35 = vpop.eup %569 }
 0x11e   :  { %v572_v43 = vpop.eup %571  ;;  %v360_v44 = vadd.f32 1.0, %v570_v35  ;;  %v383_v46 = vsel %vm375_vm4, %v805_v56, %v367_v42 }
 0x11f   :  { %v574_v45 = vpop.eup %573  ;;  %v363_v48 = vadd.f32 1.0, %v572_v43  ;;  %391 = vst [vmem:[%s863_s3 + $0x18] sm:$0xff] %v383_v46 }
 0x120   :  { %v576_v49 = vpop.eup %575  ;;  %v368_v47 = vmul.f32 %v574_v45, %v360_v44 }
 0x121   :  { %v578_v50 = vpop.eup %577  ;;  %v371_v51 = vmul.f32 %v576_v49, %v363_v48 }
 0x122   :  { %v580_v52 = vpop.eup %579  ;;  %v384_v53 = vsel %vm376_vm5, %v810_v4, %v368_v47  ;;  %v361_v54 = vadd.f32 1.0, %v578_v50 }
 0x123   :  { %v582_v55 = vpop.eup %581  ;;  %392 = vst [vmem:[%s863_s3 + $0x20] sm:$0xff] %v384_v53  ;;  %v387_v56 = vsel %vm379_vm6, %v808_v1, %v371_v51  ;;  %v362_v57 = vadd.f32 1.0, %v580_v52 }
 0x124   :  { %v584_v58 = vpop.eup %583  ;;  %395 = vst [vmem:[%s863_s3 + $0x38] sm:$0xff] %v387_v56  ;;  %v369_v59 = vmul.f32 %v582_v55, %v361_v54 }
 0x125   :  { %v370_v60 = vmul.f32 %v584_v58, %v362_v57 }
 0x126   :  { %v385_v61 = vsel %vm377_vm7, %v817_v15, %v369_v59 }
 0x127   :  { %393 = vst [vmem:[%s863_s3 + $0x28] sm:$0xff] %v385_v61  ;;  %v386_v62 = vsel %vm378_vm8, %v812_v6, %v370_v60 }
 0x128   :  { %394 = vst [vmem:[%s863_s3 + $0x30] sm:$0xff] %v386_v62 }

// kernel: squeeze.1
= control target key start
LH: loop header
LB: loop body
LE: loop exit
PB: predicated region body
PF: predicated region fallthrough
CT: control target
= control target key end

     0   :  { %s85_s0 = inlined_call_operand.vmem [shape: f32[4], index: 0, kind: input, shape index: {}]   ;;  %s86_s1 = inlined_call_operand.hbm [shape: f32[2,2], index: 1, kind: output, shape index: {}]  }
   0x1   :  { %v5_v0 = vld [vmem:[%s85_s0] sm:$0x1] }
   0x2   :  { %2 = vsyncpa [#allocation1], 0  ;;  %6 = vst [vmem:[#allocation3] sm:$0x1] %v5_v0  ;;  %vm8_vm0 = vcmask 15360   ;;  %s58_s0 = smov 126  }
   0x3   :  { %s59_s8 = smov [#allocation0]  }
   0x4   :  { %s26_s9 = sshll.u32 %s59_s8, 4  ;;  %s27_s9 = int_to_ptr.vmem [resolvable:$true] %s26_s9 }
   0x5   :  { %s34_s10 = scalar_lea.vmem %s27_s9, 32  ;;  %p39_p1 = scmp.lt.s32.totalorder %s27_s9, %s27_s9 }
   0x6   :  { %p35_p0 = scmp.ne.s32.totalorder %s27_s9, %s34_s10  ;;  %p40_p2 = scmp.lt.s32.totalorder %s34_s10, %s34_s10 }
   0x8   :  { %p41_p3 = por %p40_p2, %p39_p1 }
   0x9   :  { %v10_v1 = vld [vmem:[#allocation3] sm:$0x1]  }
   0xa   :  { %v7_v2 = vld [vmem:[#allocation3] sm:$0x1]   ;;  %11 = vrot.lane.b32.xlu0 %v10_v1, %s58_s0  ;;  %p42_p4 = pnand %p41_p3, %p35_p0 }
   0xb   :  { %9 = vst.msk [vmem:[#allocation2] sm:$0x1] %vm8_vm0, %v7_v2  }
  0x7c   :  { %v12_v3 = vpop.permute.xlu0 %11  }
  0x7d   :  { %15 = vst.msk [vmem:[#allocation2 + $0x1] sm:$0x1] %vm8_vm0, %v12_v3  }
  0x84   :  { %v19_v4 = vld [vmem:[#allocation2] sm:$0x3] }
  0x85   :  { %21 = vst [vmem:[#allocation0] sm:$0x3] %v19_v4 }
  0x86   :  { %45 = shalt.err (!%p42_p4)
}
  0x87   :  { %s46_s13 = scalar_lea.hbm %s86_s1, 32 }
  0x88   :  { %p47_p5 = scmp.ne.s32.totalorder %s86_s1, %s46_s13  ;;  %p50_p6 = scmp.lt.u32.totalorder %s46_s13, %s86_s1 }
  0x8a   :  { %p52_p7 = pnand %p50_p6, %p47_p5 }
  0x8c   :  { %55 = shalt.err (!%p52_p7)
}
  0x8d   :  { %29 = dma.vmem_to_hbm [thread:$0]  %s27_s9, 32, %s86_s1, [#allocation1]  }
  0x8e   :  { %56 = dma.done.wait [#allocation1], 32  }
  0x8f   :  { %57 = vsyncadd [#allocation1], 4294967264 }
  0x90   :  { %31 = vsyncpa [#allocation1], 1 }

// kernel: actor_critic_cnn_forward.7
= control target key start
LH: loop header
LB: loop body
LE: loop exit
PB: predicated region body
PF: predicated region fallthrough
CT: control target
= control target key end

     0   :  { %vm555_vm0 = vmmov 0   ;;  %s842_s1 = inlined_call_operand.vmem [shape: f32[512,128], index: 1, kind: input, shape index: {}]   ;;  %s843_s0 = inlined_call_operand.vmem [shape: f32[4,512], index: 0, kind: input, shape index: {}]   ;;  %s844_s3 = inlined_call_operand.vmem [shape: f32[128,128], index: 3, kind: input, shape index: {}]   ;;  %s845_s2 = inlined_call_operand.vmem [shape: f32[1,128], index: 2, kind: input, shape index: {}]   ;;  %s846_s4 = inlined_call_operand.vmem [shape: f32[1,128], index: 4, kind: input, shape index: {}]   ;;  %s847_s5 = inlined_call_operand.vmem [shape: f32[4,128], index: 5, kind: output, shape index: {}]  }
   0x1   :  { %v38_v0 = vld [vmem:[%s842_s1 + $0x80] sm:$0xff]  ;;  %v39_v1 = vld [vmem:[%s842_s1 + $0x88] sm:$0xff]  ;;  %v40_v11 = vld [vmem:[%s842_s1 + $0x90] sm:$0xff] }
   0x2   :  { %v22_v2 = vld [vmem:[%s842_s1] sm:$0xff]  ;;  %v461_v3 = vpack.c.bf16 %v39_v1, %v38_v0  ;;  %v23_v4 = vld [vmem:[%s842_s1 + $0x8] sm:$0xff]  ;;  %v41_v13 = vld [vmem:[%s842_s1 + $0x98] sm:$0xff] }
   0x3   :  { %v70_v5 = vld [vmem:[%s842_s1 + $0x180] sm:$0xff]  ;;  %v71_v6 = vld [vmem:[%s842_s1 + $0x188] sm:$0xff]  ;;  %v463_v7 = vpack.c.bf16 %v23_v4, %v22_v2  ;;  %v24_v14 = vld [vmem:[%s842_s1 + $0x10] sm:$0xff]  ;;  %v465_v16 = vpack.c.bf16 %v41_v13, %v40_v11 }
   0x4   :  { %v493_v8 = vpack.c.bf16 %v71_v6, %v70_v5  ;;  %v54_v9 = vld [vmem:[%s842_s1 + $0x100] sm:$0xff]  ;;  %v55_v10 = vld [vmem:[%s842_s1 + $0x108] sm:$0xff]  ;;  %462 = vmatprep.subr.bf16.mxu0 %v461_v3  ;;  %v25_v15 = vld [vmem:[%s842_s1 + $0x18] sm:$0xff] }
   0x5   :  { %v495_v12 = vpack.c.bf16 %v55_v10, %v54_v9  ;;  %464 = vmatpush3.bf16.msra.mxu0 %v463_v7  ;;  %v467_v17 = vpack.c.bf16 %v25_v15, %v24_v14  ;;  %v72_v18 = vld [vmem:[%s842_s1 + $0x190] sm:$0xff]  ;;  %v73_v19 = vld [vmem:[%s842_s1 + $0x198] sm:$0xff]  ;;  %v42_v23 = vld [vmem:[%s842_s1 + $0xa0] sm:$0xff] }
   0x6   :  { %494 = vmatprep.subr.bf16.mxu1 %v493_v8  ;;  %v56_v20 = vld [vmem:[%s842_s1 + $0x110] sm:$0xff]  ;;  %v497_v21 = vpack.c.bf16 %v73_v19, %v72_v18  ;;  %v57_v22 = vld [vmem:[%s842_s1 + $0x118] sm:$0xff]  ;;  %v43_v24 = vld [vmem:[%s842_s1 + $0xa8] sm:$0xff]  ;;  %466 = vmatprep.subr.bf16.mxu0 %v465_v16 }
   0x7   :  { %496 = vmatpush3.bf16.msra.mxu1 %v495_v12  ;;  %v499_v25 = vpack.c.bf16 %v57_v22, %v56_v20  ;;  %v469_v26 = vpack.c.bf16 %v43_v24, %v42_v23  ;;  %v26_v27 = vld [vmem:[%s842_s1 + $0x20] sm:$0xff]  ;;  %v27_v28 = vld [vmem:[%s842_s1 + $0x28] sm:$0xff]  ;;  %v44_v35 = vld [vmem:[%s842_s1 + $0xb0] sm:$0xff] }
   0x8   :  { %v74_v29 = vld [vmem:[%s842_s1 + $0x1a0] sm:$0xff]  ;;  %498 = vmatprep.subr.bf16.mxu1 %v497_v21  ;;  %v75_v30 = vld [vmem:[%s842_s1 + $0x1a8] sm:$0xff]  ;;  %v471_v33 = vpack.c.bf16 %v27_v28, %v26_v27  ;;  %v45_v36 = vld [vmem:[%s842_s1 + $0xb8] sm:$0xff] }
   0x9   :  { %v58_v31 = vld [vmem:[%s842_s1 + $0x120] sm:$0xff]  ;;  %v59_v32 = vld [vmem:[%s842_s1 + $0x128] sm:$0xff]  ;;  %468 = vmatpush3.bf16.msra.mxu0 %v467_v17  ;;  %v501_v34 = vpack.c.bf16 %v75_v30, %v74_v29  ;;  %v28_v37 = vld [vmem:[%s842_s1 + $0x30] sm:$0xff]  ;;  %v473_v39 = vpack.c.bf16 %v45_v36, %v44_v35 }
   0xa   :  { %470 = vmatprep.subr.bf16.mxu0 %v469_v26  ;;  %v503_v38 = vpack.c.bf16 %v59_v32, %v58_v31  ;;  %v29_v40 = vld [vmem:[%s842_s1 + $0x38] sm:$0xff]  ;;  %v76_v41 = vld [vmem:[%s842_s1 + $0x1b0] sm:$0xff]  ;;  %v46_v46 = vld [vmem:[%s842_s1 + $0xc0] sm:$0xff] }
   0xb   :  { %500 = vmatpush3.bf16.msra.mxu1 %v499_v25  ;;  %v77_v42 = vld [vmem:[%s842_s1 + $0x1b8] sm:$0xff]  ;;  %v60_v44 = vld [vmem:[%s842_s1 + $0x130] sm:$0xff]  ;;  %v47_v47 = vld [vmem:[%s842_s1 + $0xc8] sm:$0xff]  ;;  %v475_v48 = vpack.c.bf16 %v29_v40, %v28_v37 }
   0xc   :  { %502 = vmatprep.subr.bf16.mxu1 %v501_v34  ;;  %v505_v43 = vpack.c.bf16 %v77_v42, %v76_v41  ;;  %v61_v45 = vld [vmem:[%s842_s1 + $0x138] sm:$0xff]  ;;  %v78_v49 = vld [vmem:[%s842_s1 + $0x1c0] sm:$0xff]  ;;  %v79_v50 = vld [vmem:[%s842_s1 + $0x1c8] sm:$0xff]  ;;  %v477_v52 = vpack.c.bf16 %v47_v47, %v46_v46 }
   0xd   :  { %472 = vmatpush3.bf16.msra.mxu0 %v471_v33  ;;  %v507_v51 = vpack.c.bf16 %v61_v45, %v60_v44  ;;  %v30_v53 = vld [vmem:[%s842_s1 + $0x40] sm:$0xff]  ;;  %v31_v54 = vld [vmem:[%s842_s1 + $0x48] sm:$0xff]  ;;  %v509_v56 = vpack.c.bf16 %v79_v50, %v78_v49  ;;  %v48_v58 = vld [vmem:[%s842_s1 + $0xd0] sm:$0xff] }
   0xe   :  { %474 = vmatprep.subr.bf16.mxu0 %v473_v39  ;;  %v62_v55 = vld [vmem:[%s842_s1 + $0x140] sm:$0xff]  ;;  %v63_v57 = vld [vmem:[%s842_s1 + $0x148] sm:$0xff]  ;;  %v49_v59 = vld [vmem:[%s842_s1 + $0xd8] sm:$0xff]  ;;  %v479_v62 = vpack.c.bf16 %v31_v54, %v30_v53  ;;  %v554_v39 = vmov 0.0|0.0  }
   0xf   :  { %504 = vmatpush3.bf16.msra.mxu1 %v503_v38  ;;  %v80_v60 = vld [vmem:[%s842_s1 + $0x1d0] sm:$0xff]  ;;  %v81_v61 = vld [vmem:[%s842_s1 + $0x1d8] sm:$0xff]  ;;  %v511_v63 = vpack.c.bf16 %v63_v57, %v62_v55  ;;  %v481_v0 = vpack.c.bf16 %v49_v59, %v48_v58  ;;  %v50_v6 = vld [vmem:[%s842_s1 + $0xe0] sm:$0xff] }
  0x10   :  { %506 = vmatprep.subr.bf16.mxu1 %v505_v43  ;;  %v32_v1 = vld [vmem:[%s842_s1 + $0x50] sm:$0xff]  ;;  %v33_v2 = vld [vmem:[%s842_s1 + $0x58] sm:$0xff]  ;;  %v513_v4 = vpack.c.bf16 %v81_v61, %v80_v60  ;;  %v51_v7 = vld [vmem:[%s842_s1 + $0xe8] sm:$0xff]  ;;  %v556_v61 = vmov 0.0  }
  0x11   :  { %476 = vmatpush3.bf16.msra.mxu0 %v475_v48  ;;  %v64_v3 = vld [vmem:[%s842_s1 + $0x150] sm:$0xff]  ;;  %v65_v5 = vld [vmem:[%s842_s1 + $0x158] sm:$0xff]  ;;  %v82_v8 = vld [vmem:[%s842_s1 + $0x1e0] sm:$0xff]  ;;  %v483_v10 = vpack.c.bf16 %v33_v2, %v32_v1  ;;  %v485_v14 = vpack.c.bf16 %v51_v7, %v50_v6 }
  0x12   :  { %478 = vmatprep.subr.bf16.mxu0 %v477_v52  ;;  %v83_v9 = vld [vmem:[%s842_s1 + $0x1e8] sm:$0xff]  ;;  %v34_v11 = vld [vmem:[%s842_s1 + $0x60] sm:$0xff]  ;;  %v515_v13 = vpack.c.bf16 %v65_v5, %v64_v3  ;;  %v52_v20 = vld [vmem:[%s842_s1 + $0xf0] sm:$0xff] }
  0x13   :  { %508 = vmatpush3.bf16.msra.mxu1 %v507_v51  ;;  %v35_v12 = vld [vmem:[%s842_s1 + $0x68] sm:$0xff]  ;;  %v66_v15 = vld [vmem:[%s842_s1 + $0x160] sm:$0xff]  ;;  %v517_v18 = vpack.c.bf16 %v83_v9, %v82_v8  ;;  %v53_v21 = vld [vmem:[%s842_s1 + $0xf8] sm:$0xff] }
  0x14   :  { %510 = vmatprep.subr.bf16.mxu1 %v509_v56  ;;  %v20_v16 = vld [vmem:[%s843_s0] sm:$0xff]  ;;  %v21_v17 = vld [vmem:[%s843_s0 + $0x8] sm:$0xff]  ;;  %v84_v24 = vld [vmem:[%s842_s1 + $0x1f0] sm:$0xff]  ;;  %v487_v26 = vpack.c.bf16 %v35_v12, %v34_v11  ;;  %v489_v28 = vpack.c.bf16 %v53_v21, %v52_v20 }
  0x15   :  { %480 = vmatpush3.bf16.msra.mxu0 %v479_v62  ;;  %v67_v19 = vld [vmem:[%s842_s1 + $0x168] sm:$0xff]  ;;  %v95_v22 = vcombine.high %v20_v16, %v20_v16  ;;  %v96_v23 = vcombine.high %v21_v17, %v21_v17  ;;  %v85_v25 = vld [vmem:[%s842_s1 + $0x1f8] sm:$0xff]  ;;  %v36_v29 = vld [vmem:[%s842_s1 + $0x70] sm:$0xff] }
  0x16   :  { %482 = vmatprep.subr.bf16.mxu0 %v481_v0  ;;  %v519_v27 = vpack.c.bf16 %v67_v19, %v66_v15  ;;  %v37_v30 = vld [vmem:[%s842_s1 + $0x78] sm:$0xff]  ;;  %v521_v31 = vpack.c.bf16 %v85_v25, %v84_v24  ;;  %v68_v32 = vld [vmem:[%s842_s1 + $0x170] sm:$0xff]  ;;  %v239_v36 = vld [vmem:[%s844_s3] sm:$0xff] }
  0x17   :  { %512 = vmatpush3.bf16.msra.mxu1 %v511_v63  ;;  %163 = vmatprep.mubr.f32.mxu0 %v95_v22  ;;  %v69_v33 = vld [vmem:[%s842_s1 + $0x178] sm:$0xff]  ;;  %v491_v34 = vpack.c.bf16 %v37_v30, %v36_v29  ;;  %v240_v37 = vld [vmem:[%s844_s3 + $0x8] sm:$0xff]  ;;  %v241_v40 = vld [vmem:[%s844_s3 + $0x10] sm:$0xff] }
  0x18   :  { %514 = vmatprep.subr.bf16.mxu1 %v513_v4  ;;  %233 = vmatprep.mubr.f32.mxu1 %v96_v23  ;;  %v523_v35 = vpack.c.bf16 %v69_v33, %v68_v32  ;;  %v526_v38 = vpack.c.bf16 %v240_v37, %v239_v36  ;;  %v242_v41 = vld [vmem:[%s844_s3 + $0x18] sm:$0xff]  ;;  %v243_v43 = vld [vmem:[%s844_s3 + $0x20] sm:$0xff]  ;;  %v244_v44 = vld [vmem:[%s844_s3 + $0x28] sm:$0xff] }
  0x19   :  { %484 = vmatpush3.bf16.msra.mxu0 %v483_v10  ;;  %v529_v42 = vpack.c.bf16 %v242_v41, %v241_v40  ;;  %v532_v45 = vpack.c.bf16 %v244_v44, %v243_v43  ;;  %v245_v46 = vld [vmem:[%s844_s3 + $0x30] sm:$0xff]  ;;  %v246_v47 = vld [vmem:[%s844_s3 + $0x38] sm:$0xff]  ;;  %v247_v49 = vld [vmem:[%s844_s3 + $0x40] sm:$0xff] }
  0x1a   :  { %486 = vmatprep.subr.bf16.mxu0 %v485_v14  ;;  %v535_v48 = vpack.c.bf16 %v246_v47, %v245_v46  ;;  %v248_v50 = vld [vmem:[%s844_s3 + $0x48] sm:$0xff]  ;;  %v249_v52 = vld [vmem:[%s844_s3 + $0x50] sm:$0xff]  ;;  %v250_v53 = vld [vmem:[%s844_s3 + $0x58] sm:$0xff] }
  0x1b   :  { %516 = vmatpush3.bf16.msra.mxu1 %v515_v13  ;;  %v538_v51 = vpack.c.bf16 %v248_v50, %v247_v49  ;;  %v541_v54 = vpack.c.bf16 %v250_v53, %v249_v52  ;;  %v251_v55 = vld [vmem:[%s844_s3 + $0x60] sm:$0xff]  ;;  %v252_v56 = vld [vmem:[%s844_s3 + $0x68] sm:$0xff]  ;;  %v253_v58 = vld [vmem:[%s844_s3 + $0x70] sm:$0xff] }
  0x1c   :  { %518 = vmatprep.subr.bf16.mxu1 %v517_v18  ;;  %v544_v57 = vpack.c.bf16 %v252_v56, %v251_v55  ;;  %v254_v59 = vld [vmem:[%s844_s3 + $0x78] sm:$0xff]  ;;  %v337_v63 = vld [vmem:[%s845_s2] ss:$0 sm:$0xff] }
  0x1d   :  { %488 = vmatpush3.bf16.msra.mxu0 %v487_v26  ;;  %v547_v60 = vpack.c.bf16 %v254_v59, %v253_v58  ;;  %v338_v7 = vld [vmem:[%s846_s4] ss:$0 sm:$0xff] }
  0x1e   :  { %490 = vmatprep.subr.bf16.mxu0 %v489_v28 }
  0x1f   :  { %520 = vmatpush3.bf16.msra.mxu1 %v519_v27 }
  0x20   :  { %522 = vmatprep.subr.bf16.mxu1 %v521_v31 }
  0x21   :  { %492 = vmatpush3.bf16.msra.mxu0 %v491_v34 }
  0x22   :  { %525 = vmatprep.subr.bf16.mxu0 %v554_v39 }
  0x23   :  { %524 = vmatpush3.bf16.msra.mxu1 %v523_v35 }
  0x24   :  { %164 = vmatmul.mubr.f32.vlgmr.msra.gmra.mrb[0].mxu0 %v20_v16 }
  0x25   :  { %527 = vmatpush3.bf16.msra.mxu0 %v526_v38  ;;  %458 = vmatprep.mubr.msk.f32.mxu0 %vm555_vm0, %v556_v61 }
  0x26   :  { %234 = vmatmul.mubr.f32.vlgmr.msra.gmra.mrb[0].mxu1 %v21_v17  ;;  %528 = vmatprep.subr.bf16.mxu0 %v554_v39 }
  0x29   :  { %530 = vmatpush3.bf16.msra.mxu0 %v529_v42 }
  0x2a   :  { %531 = vmatprep.subr.bf16.mxu0 %v554_v39 }
  0x2d   :  { %533 = vmatpush3.bf16.msra.mxu0 %v532_v45 }
  0x2e   :  { %534 = vmatprep.subr.bf16.mxu0 %v554_v39 }
  0x31   :  { %536 = vmatpush3.bf16.msra.mxu0 %v535_v48 }
  0x32   :  { %537 = vmatprep.subr.bf16.mxu0 %v554_v39 }
  0x35   :  { %539 = vmatpush3.bf16.msra.mxu0 %v538_v51 }
  0x36   :  { %540 = vmatprep.subr.bf16.mxu0 %v554_v39 }
  0x39   :  { %542 = vmatpush3.bf16.msra.mxu0 %v541_v54 }
  0x3a   :  { %543 = vmatprep.subr.bf16.mxu0 %v554_v39 }
  0x3d   :  { %545 = vmatpush3.bf16.msra.mxu0 %v544_v57 }
  0x3e   :  { %546 = vmatprep.subr.bf16.mxu0 %v554_v39 }
  0x41   :  { %548 = vmatpush3.bf16.msra.mxu0 %v547_v60 }
  0xf7   :  { %v371_v62 = vpop.f32.mrb[0].mxu0 }
  0xf8   :  { %v372_v0 = vpop.f32.mrb[1].mxu0 }
  0xf9   :  { %v406_v1 = vpop.f32.mrb[0].mxu1  ;;  %v373_v2 = vadd.f32 %v372_v0, %v371_v62 }
  0xfa   :  { %v407_v3 = vpop.f32.mrb[1].mxu1 }
  0xfb   :  { %v408_v4 = vadd.f32 %v407_v3, %v406_v1  ;;  %v166_v5 = vadd.f32 %v373_v2, %v337_v63 }
  0xfd   :  { %v236_v6 = vadd.f32 %v408_v4, %v166_v5 }
  0xff   :  { %459 = vmatmul.mubr.f32.vlgmr.msra.gmra.mrb[2].mxu0 %v236_v6 }
 0x1d2   :  { %v328_v8 = vpop.f32.mrb[2].mxu0 }
 0x1d3   :  { %v329_v9 = vadd.f32 %v338_v7, %v328_v8  ;;  %v460_v10 = vpop.f32.mrb[3].mxu0 }
 0x1d5   :  { %332 = vst [vmem:[%s847_s5] sm:$0xf] %v329_v9 }

</bundles_post_ra>
